<compile_context>
chip_gen: v7x
topology: tpu7x:2x2x1
jax: 0.10.0
libtpu: 0.0.40
codegen_flags: <defaults>
</compile_context>

<pallas_src>
import math

import jax
import jax.numpy as jnp
from jax.experimental import pallas as pl
from jax.experimental.pallas import tpu as pltpu

_TM_CAP = 512  # row-tile cap; at real resolutions this yields multiple
               # "parallel" grid blocks (v7x megacore) with tiny VMEM use.


# ----------------------------------------------------------------------------
# Fused complex-GEMM Pallas kernel (one call per network layer).
#   For each phase slice (1 phase for normal convs, 4 sub-pixel phases for the
#   stride-2 transposed convs):
#       re = Pr@Wr - Pi@Wi + br_eff ,   im = Pi@Wr + Pr@Wi + bi_eff
#   optionally followed by fused complex_relu and a fused residual add.
# ----------------------------------------------------------------------------
def _make_complex_gemm_kernel(nphase, relu, has_res):
    def body(p_ref, w_ref, b_ref, r_ref, o_ref):
        br = b_ref[0]          # (1, C) effective real bias
        bi = b_ref[1]          # (1, C) effective imag bias
        for ph in range(nphase):          # static unroll (nphase is 1 or 4)
            pr = p_ref[0, ph]
            pi = p_ref[1, ph]
            wr = w_ref[0, ph]
            wi = w_ref[1, ph]
            re = (jnp.dot(pr, wr, preferred_element_type=jnp.float32)
                  - jnp.dot(pi, wi, preferred_element_type=jnp.float32) + br)
            im = (jnp.dot(pi, wr, preferred_element_type=jnp.float32)
                  + jnp.dot(pr, wi, preferred_element_type=jnp.float32) + bi)
            if relu:
                re = jnp.maximum(re, 0.0)
                im = jnp.maximum(im, 0.0)
            if r_ref is not None:          # residual is added AFTER the relu
                re = re + r_ref[0, ph]
                im = im + r_ref[1, ph]
            o_ref[0, ph] = re
            o_ref[1, ph] = im

    if has_res:
        def kernel(p_ref, w_ref, b_ref, r_ref, o_ref):
            body(p_ref, w_ref, b_ref, r_ref, o_ref)
    else:
        def kernel(p_ref, w_ref, b_ref, o_ref):
            body(p_ref, w_ref, b_ref, None, o_ref)
    return kernel


def complex_conv_gemm(patches, wmat, bias, res=None, relu=True):
    """patches:(2,P,M,K)  wmat:(2,P,K,C)  bias:(2,1,C)  res:(2,P,M,C)|None."""
    _, P, M, K = patches.shape
    C = wmat.shape[-1]
    TM = M if M <= _TM_CAP else _TM_CAP          # no pad / slice of M
    grid = (pl.cdiv(M, TM),)

    in_specs = [
        pl.BlockSpec((2, P, TM, K), lambda i: (0, 0, i, 0)),
        pl.BlockSpec((2, P, K, C), lambda i: (0, 0, 0, 0)),
        pl.BlockSpec((2, 1, C), lambda i: (0, 0, 0)),
    ]
    args = [patches, wmat, bias]
    if res is not None:
        in_specs.append(pl.BlockSpec((2, P, TM, C), lambda i: (0, 0, i, 0)))
        args.append(res)

    return pl.pallas_call(
        _make_complex_gemm_kernel(P, relu, res is not None),
        out_shape=jax.ShapeDtypeStruct((2, P, M, C), jnp.float32),
        grid=grid,
        in_specs=in_specs,
        out_specs=pl.BlockSpec((2, P, TM, C), lambda i: (0, 0, i, 0)),
        compiler_params=pltpu.CompilerParams(dimension_semantics=("parallel",)),
    )(*args)


# ----------------------------------------------------------------------------
# ComplexConv2d(k=3, stride=2, padding=1) + complex_relu (fused)
# ----------------------------------------------------------------------------
def _conv_weight_matrix(w):
    # PyTorch Conv2d layout (Cout, Cin, kh, kw) -> (kh*kw*Cin, Cout), matching
    # the im2col column order (kh-major, then kw, then channel).
    cout, cin, kh, kw = w.shape
    return jnp.transpose(w, (2, 3, 1, 0)).reshape(kh * kw * cin, cout)


def _im2col(x, kh, kw, stride, pad):
    # x: (2, N, H, W, C) stacked real/imag NHWC -> (2, N*oh*ow, kh*kw*C)
    two, n, h, w, c = x.shape
    xb = x.reshape(two * n, h, w, c)
    xp = jnp.pad(xb, ((0, 0), (pad, pad), (pad, pad), (0, 0)))
    hp, wp = h + 2 * pad, w + 2 * pad
    oh = (hp - kh) // stride + 1
    ow = (wp - kw) // stride + 1
    cols = []
    for i in range(kh):
        for j in range(kw):
            cols.append(xp[:, i:i + stride * (oh - 1) + 1:stride,
                           j:j + stride * (ow - 1) + 1:stride, :])
    patches = jnp.concatenate(cols, axis=-1)
    return patches.reshape(two, n * oh * ow, kh * kw * c), (oh, ow)


def complex_conv2d_s2(x, wr, wi, br, bi):
    two, n, h, w, cin = x.shape
    cout = wr.shape[0]
    patches, (oh, ow) = _im2col(x, 3, 3, stride=2, pad=1)
    patches = patches[:, None]                                   # (2,1,M,K)
    wmat = jnp.stack([_conv_weight_matrix(wr),
                      _conv_weight_matrix(wi)])[:, None]         # (2,1,K,C)
    # apply_complex combines both convs' biases: real += br-bi, imag += br+bi
    bias = jnp.stack([br - bi, br + bi]).reshape(2, 1, cout)
    out = complex_conv_gemm(patches, wmat, bias, relu=True)      # (2,1,M,C)
    return out.reshape(two, n, oh, ow, cout)


# ----------------------------------------------------------------------------
# ComplexConvTranspose2d(k=4, stride=2, padding=1), zero-free sub-pixel form.
# Output row 2q+rh (col 2p+rw) only sees input rows q+doff (cols p+doff) with
# the kernel taps below, so each of the 4 output phases is a dense 2x2
# stride-1 conv on the UNDILATED input (no zero-stuffing, no redundant work).
# ----------------------------------------------------------------------------
_T_TAPS = {0: ((0, 1), (-1, 3)), 1: ((0, 2), (1, 0))}   # phase -> ((doff, tap), ...)


def complex_conv_transpose2d_s2(x, wr, wi, br, bi, res=None, relu=True):
    two, n, h, w, cin = x.shape
    cout = wr.shape[1]                                   # (Cin, Cout, 4, 4)
    xb = x.reshape(two * n, h, w, cin)
    xp = jnp.pad(xb, ((0, 0), (1, 1), (1, 1), (0, 0)))

    patch_ph, wr_ph, wi_ph = [], [], []
    for rh in (0, 1):
        for rw in (0, 1):
            cols, wrb, wib = [], [], []
            for dv, kv in _T_TAPS[rh]:
                for dh, kc in _T_TAPS[rw]:
                    cols.append(xp[:, 1 + dv:1 + dv + h, 1 + dh:1 + dh + w, :])
                    wrb.append(wr[:, :, kv, kc])         # (Cin, Cout)
                    wib.append(wi[:, :, kv, kc])
            patch_ph.append(jnp.concatenate(cols, axis=-1)
                            .reshape(two, n * h * w, 4 * cin))
            wr_ph.append(jnp.concatenate(wrb, axis=0))   # (4*Cin, Cout)
            wi_ph.append(jnp.concatenate(wib, axis=0))

    patches = jnp.stack(patch_ph, axis=1)                       # (2,4,M,K)
    wmat = jnp.stack([jnp.stack(wr_ph), jnp.stack(wi_ph)])      # (2,4,K,C)
    bias = jnp.stack([br - bi, br + bi]).reshape(2, 1, cout)

    res_ph = None
    if res is not None:   # residual gathered into the same phase layout
        res_ph = jnp.stack(
            [res[:, :, rh::2, rw::2, :].reshape(two, n * h * w, cout)
             for rh in (0, 1) for rw in (0, 1)], axis=1)        # (2,4,M,C)

    out = complex_conv_gemm(patches, wmat, bias, res=res_ph, relu=relu)
    # interleave the 4 phases back to (2, N, 2H, 2W, Cout)
    out = out.reshape(two, 2, 2, n, h, w, cout)
    out = jnp.transpose(out, (0, 3, 4, 1, 5, 2, 6))
    return out.reshape(two, n, 2 * h, 2 * w, cout)


# ----------------------------------------------------------------------------
# Parameter init (deterministic, PyTorch-shaped weights for conv_r / conv_i)
# ----------------------------------------------------------------------------
def _init_complex_conv(key, wshape, cout, fan_in):
    k1, k2, k3, k4 = jax.random.split(key, 4)
    b = 1.0 / math.sqrt(fan_in)
    return dict(
        wr=jax.random.uniform(k1, wshape, jnp.float32, -b, b),
        br=jax.random.uniform(k2, (cout,), jnp.float32, -b, b),
        wi=jax.random.uniform(k3, wshape, jnp.float32, -b, b),
        bi=jax.random.uniform(k4, (cout,), jnp.float32, -b, b),
    )


def init_ccnn2(key):
    ks = jax.random.split(key, 6)
    return dict(
        down1=_init_complex_conv(ks[0], (4, 1, 3, 3), 4, 1 * 9),
        down2=_init_complex_conv(ks[1], (8, 4, 3, 3), 8, 4 * 9),
        down3=_init_complex_conv(ks[2], (16, 8, 3, 3), 16, 8 * 9),
        up3=_init_complex_conv(ks[3], (16, 8, 4, 4), 8, 8 * 16),
        up2=_init_complex_conv(ks[4], (8, 4, 4, 4), 4, 4 * 16),
        up1=_init_complex_conv(ks[5], (4, 1, 4, 4), 1, 1 * 16),
    )


# ----------------------------------------------------------------------------
# CCNN2 forward (mirrors the PyTorch module; residual adds fused in-kernel)
# ----------------------------------------------------------------------------
def ccnn2_forward(params, x):
    # x: complex64 NCHW (N, 1, H, W).  Internal layout: NHWC with a stacked
    # real/imag leading axis of size 2.
    a = jnp.stack([jnp.real(x), jnp.imag(x)]).astype(jnp.float32)  # (2,N,C,H,W)
    a = jnp.transpose(a, (0, 1, 3, 4, 2))                          # (2,N,H,W,C)

    out1 = complex_conv2d_s2(a, **params["down1"])      # (2,N,H/2,W/2,4)
    out2 = complex_conv2d_s2(out1, **params["down2"])   # (2,N,H/4,W/4,8)
    out3 = complex_conv2d_s2(out2, **params["down3"])   # (2,N,H/8,W/8,16)

    # out18 + out2 and out19 + out1 are produced directly by the up-kernels.
    t = complex_conv_transpose2d_s2(out3, res=out2, relu=True, **params["up3"])
    t = complex_conv_transpose2d_s2(t, res=out1, relu=True, **params["up2"])
    out20 = complex_conv_transpose2d_s2(t, res=None, relu=False, **params["up1"])

    # TODO(synk): atan2 has no documented Mosaic lowering; computed in XLA on
    # the tiny (N,H,W,1) output instead of being fused into the last kernel.
    holo = jnp.arctan2(out20[1], out20[0])               # (N,H,W,1)
    return jnp.transpose(holo, (0, 3, 1, 2))             # NCHW (N,1,H,W)


if __name__ == "__main__":
    key = jax.random.PRNGKey(0)
    kp, kr, ki = jax.random.split(key, 3)
    params = init_ccnn2(kp)

    n, c, h, w = 2, 1, 16, 16
    x = (jax.random.normal(kr, (n, c, h, w), jnp.float32)
         + 1j * jax.random.normal(ki, (n, c, h, w), jnp.float32)).astype(jnp.complex64)

    fwd = jax.jit(ccnn2_forward)
    holophase = fwd(params, x)
    jax.block_until_ready(holophase)

    assert holophase.shape == (n, c, h, w), holophase.shape
    assert bool(jnp.all(jnp.isfinite(holophase)))
    assert bool(jnp.all(jnp.abs(holophase) <= math.pi + 1e-5))
    print("KERNEL_OK")
</pallas_src>

<mosaic_0001>
module attributes {stable_mosaic.version = 11 : i64} {
  func.func @kernel(%arg0: i32, %arg1: memref<2x1x128x9xf32, #tpu.memory_space<vmem>>, %arg2: memref<2x1x9x4xf32, #tpu.memory_space<vmem>>, %arg3: memref<2x1x4xf32, #tpu.memory_space<vmem>>, %arg4: memref<2x1x128x4xf32, #tpu.memory_space<vmem>>) attributes {dimension_semantics = [#tpu.dimension_semantics<parallel>], iteration_bounds = array<i64: 1>, scalar_prefetch = 0 : i64, scratch_operands = 0 : i64, tpu.core_type = #tpu.core_type<tc>, window_params = [{transform_indices = @transform_0, window_bounds = array<i64: 2, 1, 128, 9>}, {pipeline_mode = #tpu.pipeline_mode<synchronous>, transform_indices = @transform_1, window_bounds = array<i64: 2, 1, 9, 4>}, {pipeline_mode = #tpu.pipeline_mode<synchronous>, transform_indices = @transform_2, window_bounds = array<i64: 2, 1, 4>}, {transform_indices = @transform_3, window_bounds = array<i64: 2, 1, 128, 4>}]} {
    %c0 = arith.constant 0 : index
    %c0_0 = arith.constant 0 : index
    %c0_1 = arith.constant 0 : index
    %0 = vector.load %arg3[%c0, %c0_0, %c0_1] : memref<2x1x4xf32, #tpu.memory_space<vmem>>, vector<1x1x4xf32>
    %1 = vector.shape_cast %0 : vector<1x1x4xf32> to vector<1x4xf32>
    %c1 = arith.constant 1 : index
    %c0_2 = arith.constant 0 : index
    %c0_3 = arith.constant 0 : index
    %2 = vector.load %arg3[%c1, %c0_2, %c0_3] : memref<2x1x4xf32, #tpu.memory_space<vmem>>, vector<1x1x4xf32>
    %3 = vector.shape_cast %2 : vector<1x1x4xf32> to vector<1x4xf32>
    %c0_4 = arith.constant 0 : index
    %c0_5 = arith.constant 0 : index
    %c0_6 = arith.constant 0 : index
    %c0_7 = arith.constant 0 : index
    %4 = vector.load %arg1[%c0_4, %c0_5, %c0_6, %c0_7] : memref<2x1x128x9xf32, #tpu.memory_space<vmem>>, vector<1x1x128x9xf32>
    %5 = vector.shape_cast %4 : vector<1x1x128x9xf32> to vector<128x9xf32>
    %c1_8 = arith.constant 1 : index
    %c0_9 = arith.constant 0 : index
    %c0_10 = arith.constant 0 : index
    %c0_11 = arith.constant 0 : index
    %6 = vector.load %arg1[%c1_8, %c0_9, %c0_10, %c0_11] : memref<2x1x128x9xf32, #tpu.memory_space<vmem>>, vector<1x1x128x9xf32>
    %7 = vector.shape_cast %6 : vector<1x1x128x9xf32> to vector<128x9xf32>
    %c0_12 = arith.constant 0 : index
    %c0_13 = arith.constant 0 : index
    %c0_14 = arith.constant 0 : index
    %c0_15 = arith.constant 0 : index
    %8 = vector.load %arg2[%c0_12, %c0_13, %c0_14, %c0_15] : memref<2x1x9x4xf32, #tpu.memory_space<vmem>>, vector<1x1x9x4xf32>
    %9 = vector.shape_cast %8 : vector<1x1x9x4xf32> to vector<9x4xf32>
    %c1_16 = arith.constant 1 : index
    %c0_17 = arith.constant 0 : index
    %c0_18 = arith.constant 0 : index
    %c0_19 = arith.constant 0 : index
    %10 = vector.load %arg2[%c1_16, %c0_17, %c0_18, %c0_19] : memref<2x1x9x4xf32, #tpu.memory_space<vmem>>, vector<1x1x9x4xf32>
    %11 = vector.shape_cast %10 : vector<1x1x9x4xf32> to vector<9x4xf32>
    %cst = arith.constant dense<0.000000e+00> : vector<128x4xf32>
    %12 = tpu.matmul %5, %9, %cst {dimension_numbers = #tpu.dot_dimension_numbers<[1], [0], [0], [1], [0, 0, 1, 1], [], []>} : vector<128x9xf32>, vector<9x4xf32>, vector<128x4xf32> -> vector<128x4xf32>
    %cst_20 = arith.constant dense<0.000000e+00> : vector<128x4xf32>
    %13 = tpu.matmul %7, %11, %cst_20 {dimension_numbers = #tpu.dot_dimension_numbers<[1], [0], [0], [1], [0, 0, 1, 1], [], []>} : vector<128x9xf32>, vector<9x4xf32>, vector<128x4xf32> -> vector<128x4xf32>
    %14 = arith.subf %12, %13 : vector<128x4xf32>
    %15 = vector.broadcast %1 : vector<1x4xf32> to vector<128x4xf32>
    %16 = arith.addf %14, %15 : vector<128x4xf32>
    %cst_21 = arith.constant dense<0.000000e+00> : vector<128x4xf32>
    %17 = tpu.matmul %7, %9, %cst_21 {dimension_numbers = #tpu.dot_dimension_numbers<[1], [0], [0], [1], [0, 0, 1, 1], [], []>} : vector<128x9xf32>, vector<9x4xf32>, vector<128x4xf32> -> vector<128x4xf32>
    %cst_22 = arith.constant dense<0.000000e+00> : vector<128x4xf32>
    %18 = tpu.matmul %5, %11, %cst_22 {dimension_numbers = #tpu.dot_dimension_numbers<[1], [0], [0], [1], [0, 0, 1, 1], [], []>} : vector<128x9xf32>, vector<9x4xf32>, vector<128x4xf32> -> vector<128x4xf32>
    %19 = arith.addf %17, %18 : vector<128x4xf32>
    %20 = vector.broadcast %3 : vector<1x4xf32> to vector<128x4xf32>
    %21 = arith.addf %19, %20 : vector<128x4xf32>
    %cst_23 = arith.constant 0.000000e+00 : f32
    %22 = vector.broadcast %cst_23 : f32 to vector<128x4xf32>
    %23 = arith.maximumf %16, %22 : vector<128x4xf32>
    %cst_24 = arith.constant 0.000000e+00 : f32
    %24 = vector.broadcast %cst_24 : f32 to vector<128x4xf32>
    %25 = arith.maximumf %21, %24 : vector<128x4xf32>
    %c0_25 = arith.constant 0 : index
    %c0_26 = arith.constant 0 : index
    %c0_27 = arith.constant 0 : index
    %c0_28 = arith.constant 0 : index
    %26 = vector.load %arg4[%c0_25, %c0_26, %c0_27, %c0_28] : memref<2x1x128x4xf32, #tpu.memory_space<vmem>>, vector<1x1x128x4xf32>
    %27 = vector.shape_cast %26 : vector<1x1x128x4xf32> to vector<128x4xf32>
    %28 = vector.shape_cast %23 : vector<128x4xf32> to vector<1x1x128x4xf32>
    tpu.vector_store %arg4[%c0_25, %c0_26, %c0_27, %c0_28], %28 {strides = array<i32>} : memref<2x1x128x4xf32, #tpu.memory_space<vmem>>, vector<1x1x128x4xf32>,
    %c1_29 = arith.constant 1 : index
    %c0_30 = arith.constant 0 : index
    %c0_31 = arith.constant 0 : index
    %c0_32 = arith.constant 0 : index
    %29 = vector.load %arg4[%c1_29, %c0_30, %c0_31, %c0_32] : memref<2x1x128x4xf32, #tpu.memory_space<vmem>>, vector<1x1x128x4xf32>
    %30 = vector.shape_cast %29 : vector<1x1x128x4xf32> to vector<128x4xf32>
    %31 = vector.shape_cast %25 : vector<128x4xf32> to vector<1x1x128x4xf32>
    tpu.vector_store %arg4[%c1_29, %c0_30, %c0_31, %c0_32], %31 {strides = array<i32>} : memref<2x1x128x4xf32, #tpu.memory_space<vmem>>, vector<1x1x128x4xf32>,
    return
  }
  func.func @transform_0(%arg0: i32) -> (i32, i32, i32, i32) {
    %c0_i32 = arith.constant 0 : i32
    %c0_i32_0 = arith.constant 0 : i32
    %c0_i32_1 = arith.constant 0 : i32
    %c0_i32_2 = arith.constant 0 : i32
    return %c0_i32, %c0_i32_0, %arg0, %c0_i32_1 : i32, i32, i32, i32
  }
  func.func @transform_1(%arg0: i32) -> (i32, i32, i32, i32) {
    %c0_i32 = arith.constant 0 : i32
    %c0_i32_0 = arith.constant 0 : i32
    %c0_i32_1 = arith.constant 0 : i32
    %c0_i32_2 = arith.constant 0 : i32
    %c0_i32_3 = arith.constant 0 : i32
    return %c0_i32, %c0_i32_0, %c0_i32_1, %c0_i32_2 : i32, i32, i32, i32
  }
  func.func @transform_2(%arg0: i32) -> (i32, i32, i32) {
    %c0_i32 = arith.constant 0 : i32
    %c0_i32_0 = arith.constant 0 : i32
    %c0_i32_1 = arith.constant 0 : i32
    %c0_i32_2 = arith.constant 0 : i32
    return %c0_i32, %c0_i32_0, %c0_i32_1 : i32, i32, i32
  }
  func.func @transform_3(%arg0: i32) -> (i32, i32, i32, i32) {
    %c0_i32 = arith.constant 0 : i32
    %c0_i32_0 = arith.constant 0 : i32
    %c0_i32_1 = arith.constant 0 : i32
    %c0_i32_2 = arith.constant 0 : i32
    return %c0_i32, %c0_i32_0, %arg0, %c0_i32_1 : i32, i32, i32, i32
  }
}

module attributes {stable_mosaic.version = 11 : i64} {
  func.func @kernel(%arg0: i32, %arg1: memref<2x1x32x36xf32, #tpu.memory_space<vmem>>, %arg2: memref<2x1x36x8xf32, #tpu.memory_space<vmem>>, %arg3: memref<2x1x8xf32, #tpu.memory_space<vmem>>, %arg4: memref<2x1x32x8xf32, #tpu.memory_space<vmem>>) attributes {dimension_semantics = [#tpu.dimension_semantics<parallel>], iteration_bounds = array<i64: 1>, scalar_prefetch = 0 : i64, scratch_operands = 0 : i64, tpu.core_type = #tpu.core_type<tc>, window_params = [{transform_indices = @transform_0, window_bounds = array<i64: 2, 1, 32, 36>}, {pipeline_mode = #tpu.pipeline_mode<synchronous>, transform_indices = @transform_1, window_bounds = array<i64: 2, 1, 36, 8>}, {pipeline_mode = #tpu.pipeline_mode<synchronous>, transform_indices = @transform_2, window_bounds = array<i64: 2, 1, 8>}, {transform_indices = @transform_3, window_bounds = array<i64: 2, 1, 32, 8>}]} {
    %c0 = arith.constant 0 : index
    %c0_0 = arith.constant 0 : index
    %c0_1 = arith.constant 0 : index
    %0 = vector.load %arg3[%c0, %c0_0, %c0_1] : memref<2x1x8xf32, #tpu.memory_space<vmem>>, vector<1x1x8xf32>
    %1 = vector.shape_cast %0 : vector<1x1x8xf32> to vector<1x8xf32>
    %c1 = arith.constant 1 : index
    %c0_2 = arith.constant 0 : index
    %c0_3 = arith.constant 0 : index
    %2 = vector.load %arg3[%c1, %c0_2, %c0_3] : memref<2x1x8xf32, #tpu.memory_space<vmem>>, vector<1x1x8xf32>
    %3 = vector.shape_cast %2 : vector<1x1x8xf32> to vector<1x8xf32>
    %c0_4 = arith.constant 0 : index
    %c0_5 = arith.constant 0 : index
    %c0_6 = arith.constant 0 : index
    %c0_7 = arith.constant 0 : index
    %4 = vector.load %arg1[%c0_4, %c0_5, %c0_6, %c0_7] : memref<2x1x32x36xf32, #tpu.memory_space<vmem>>, vector<1x1x32x36xf32>
    %5 = vector.shape_cast %4 : vector<1x1x32x36xf32> to vector<32x36xf32>
    %c1_8 = arith.constant 1 : index
    %c0_9 = arith.constant 0 : index
    %c0_10 = arith.constant 0 : index
    %c0_11 = arith.constant 0 : index
    %6 = vector.load %arg1[%c1_8, %c0_9, %c0_10, %c0_11] : memref<2x1x32x36xf32, #tpu.memory_space<vmem>>, vector<1x1x32x36xf32>
    %7 = vector.shape_cast %6 : vector<1x1x32x36xf32> to vector<32x36xf32>
    %c0_12 = arith.constant 0 : index
    %c0_13 = arith.constant 0 : index
    %c0_14 = arith.constant 0 : index
    %c0_15 = arith.constant 0 : index
    %8 = vector.load %arg2[%c0_12, %c0_13, %c0_14, %c0_15] : memref<2x1x36x8xf32, #tpu.memory_space<vmem>>, vector<1x1x36x8xf32>
    %9 = vector.shape_cast %8 : vector<1x1x36x8xf32> to vector<36x8xf32>
    %c1_16 = arith.constant 1 : index
    %c0_17 = arith.constant 0 : index
    %c0_18 = arith.constant 0 : index
    %c0_19 = arith.constant 0 : index
    %10 = vector.load %arg2[%c1_16, %c0_17, %c0_18, %c0_19] : memref<2x1x36x8xf32, #tpu.memory_space<vmem>>, vector<1x1x36x8xf32>
    %11 = vector.shape_cast %10 : vector<1x1x36x8xf32> to vector<36x8xf32>
    %cst = arith.constant dense<0.000000e+00> : vector<32x8xf32>
    %12 = tpu.matmul %5, %9, %cst {dimension_numbers = #tpu.dot_dimension_numbers<[1], [0], [0], [1], [0, 0, 1, 1], [], []>} : vector<32x36xf32>, vector<36x8xf32>, vector<32x8xf32> -> vector<32x8xf32>
    %cst_20 = arith.constant dense<0.000000e+00> : vector<32x8xf32>
    %13 = tpu.matmul %7, %11, %cst_20 {dimension_numbers = #tpu.dot_dimension_numbers<[1], [0], [0], [1], [0, 0, 1, 1], [], []>} : vector<32x36xf32>, vector<36x8xf32>, vector<32x8xf32> -> vector<32x8xf32>
    %14 = arith.subf %12, %13 : vector<32x8xf32>
    %15 = vector.broadcast %1 : vector<1x8xf32> to vector<32x8xf32>
    %16 = arith.addf %14, %15 : vector<32x8xf32>
    %cst_21 = arith.constant dense<0.000000e+00> : vector<32x8xf32>
    %17 = tpu.matmul %7, %9, %cst_21 {dimension_numbers = #tpu.dot_dimension_numbers<[1], [0], [0], [1], [0, 0, 1, 1], [], []>} : vector<32x36xf32>, vector<36x8xf32>, vector<32x8xf32> -> vector<32x8xf32>
    %cst_22 = arith.constant dense<0.000000e+00> : vector<32x8xf32>
    %18 = tpu.matmul %5, %11, %cst_22 {dimension_numbers = #tpu.dot_dimension_numbers<[1], [0], [0], [1], [0, 0, 1, 1], [], []>} : vector<32x36xf32>, vector<36x8xf32>, vector<32x8xf32> -> vector<32x8xf32>
    %19 = arith.addf %17, %18 : vector<32x8xf32>
    %20 = vector.broadcast %3 : vector<1x8xf32> to vector<32x8xf32>
    %21 = arith.addf %19, %20 : vector<32x8xf32>
    %cst_23 = arith.constant 0.000000e+00 : f32
    %22 = vector.broadcast %cst_23 : f32 to vector<32x8xf32>
    %23 = arith.maximumf %16, %22 : vector<32x8xf32>
    %cst_24 = arith.constant 0.000000e+00 : f32
    %24 = vector.broadcast %cst_24 : f32 to vector<32x8xf32>
    %25 = arith.maximumf %21, %24 : vector<32x8xf32>
    %c0_25 = arith.constant 0 : index
    %c0_26 = arith.constant 0 : index
    %c0_27 = arith.constant 0 : index
    %c0_28 = arith.constant 0 : index
    %26 = vector.load %arg4[%c0_25, %c0_26, %c0_27, %c0_28] : memref<2x1x32x8xf32, #tpu.memory_space<vmem>>, vector<1x1x32x8xf32>
    %27 = vector.shape_cast %26 : vector<1x1x32x8xf32> to vector<32x8xf32>
    %28 = vector.shape_cast %23 : vector<32x8xf32> to vector<1x1x32x8xf32>
    tpu.vector_store %arg4[%c0_25, %c0_26, %c0_27, %c0_28], %28 {strides = array<i32>} : memref<2x1x32x8xf32, #tpu.memory_space<vmem>>, vector<1x1x32x8xf32>,
    %c1_29 = arith.constant 1 : index
    %c0_30 = arith.constant 0 : index
    %c0_31 = arith.constant 0 : index
    %c0_32 = arith.constant 0 : index
    %29 = vector.load %arg4[%c1_29, %c0_30, %c0_31, %c0_32] : memref<2x1x32x8xf32, #tpu.memory_space<vmem>>, vector<1x1x32x8xf32>
    %30 = vector.shape_cast %29 : vector<1x1x32x8xf32> to vector<32x8xf32>
    %31 = vector.shape_cast %25 : vector<32x8xf32> to vector<1x1x32x8xf32>
    tpu.vector_store %arg4[%c1_29, %c0_30, %c0_31, %c0_32], %31 {strides = array<i32>} : memref<2x1x32x8xf32, #tpu.memory_space<vmem>>, vector<1x1x32x8xf32>,
    return
  }
  func.func @transform_0(%arg0: i32) -> (i32, i32, i32, i32) {
    %c0_i32 = arith.constant 0 : i32
    %c0_i32_0 = arith.constant 0 : i32
    %c0_i32_1 = arith.constant 0 : i32
    %c0_i32_2 = arith.constant 0 : i32
    return %c0_i32, %c0_i32_0, %arg0, %c0_i32_1 : i32, i32, i32, i32
  }
  func.func @transform_1(%arg0: i32) -> (i32, i32, i32, i32) {
    %c0_i32 = arith.constant 0 : i32
    %c0_i32_0 = arith.constant 0 : i32
    %c0_i32_1 = arith.constant 0 : i32
    %c0_i32_2 = arith.constant 0 : i32
    %c0_i32_3 = arith.constant 0 : i32
    return %c0_i32, %c0_i32_0, %c0_i32_1, %c0_i32_2 : i32, i32, i32, i32
  }
  func.func @transform_2(%arg0: i32) -> (i32, i32, i32) {
    %c0_i32 = arith.constant 0 : i32
    %c0_i32_0 = arith.constant 0 : i32
    %c0_i32_1 = arith.constant 0 : i32
    %c0_i32_2 = arith.constant 0 : i32
    return %c0_i32, %c0_i32_0, %c0_i32_1 : i32, i32, i32
  }
  func.func @transform_3(%arg0: i32) -> (i32, i32, i32, i32) {
    %c0_i32 = arith.constant 0 : i32
    %c0_i32_0 = arith.constant 0 : i32
    %c0_i32_1 = arith.constant 0 : i32
    %c0_i32_2 = arith.constant 0 : i32
    return %c0_i32, %c0_i32_0, %arg0, %c0_i32_1 : i32, i32, i32, i32
  }
}

module attributes {stable_mosaic.version = 11 : i64} {
  func.func @kernel(%arg0: i32, %arg1: memref<2x1x8x72xf32, #tpu.memory_space<vmem>>, %arg2: memref<2x1x72x16xf32, #tpu.memory_space<vmem>>, %arg3: memref<2x1x16xf32, #tpu.memory_space<vmem>>, %arg4: memref<2x1x8x16xf32, #tpu.memory_space<vmem>>) attributes {dimension_semantics = [#tpu.dimension_semantics<parallel>], iteration_bounds = array<i64: 1>, scalar_prefetch = 0 : i64, scratch_operands = 0 : i64, tpu.core_type = #tpu.core_type<tc>, window_params = [{transform_indices = @transform_0, window_bounds = array<i64: 2, 1, 8, 72>}, {pipeline_mode = #tpu.pipeline_mode<synchronous>, transform_indices = @transform_1, window_bounds = array<i64: 2, 1, 72, 16>}, {pipeline_mode = #tpu.pipeline_mode<synchronous>, transform_indices = @transform_2, window_bounds = array<i64: 2, 1, 16>}, {transform_indices = @transform_3, window_bounds = array<i64: 2, 1, 8, 16>}]} {
    %c0 = arith.constant 0 : index
    %c0_0 = arith.constant 0 : index
    %c0_1 = arith.constant 0 : index
    %0 = vector.load %arg3[%c0, %c0_0, %c0_1] : memref<2x1x16xf32, #tpu.memory_space<vmem>>, vector<1x1x16xf32>
    %1 = vector.shape_cast %0 : vector<1x1x16xf32> to vector<1x16xf32>
    %c1 = arith.constant 1 : index
    %c0_2 = arith.constant 0 : index
    %c0_3 = arith.constant 0 : index
    %2 = vector.load %arg3[%c1, %c0_2, %c0_3] : memref<2x1x16xf32, #tpu.memory_space<vmem>>, vector<1x1x16xf32>
    %3 = vector.shape_cast %2 : vector<1x1x16xf32> to vector<1x16xf32>
    %c0_4 = arith.constant 0 : index
    %c0_5 = arith.constant 0 : index
    %c0_6 = arith.constant 0 : index
    %c0_7 = arith.constant 0 : index
    %4 = vector.load %arg1[%c0_4, %c0_5, %c0_6, %c0_7] : memref<2x1x8x72xf32, #tpu.memory_space<vmem>>, vector<1x1x8x72xf32>
    %5 = vector.shape_cast %4 : vector<1x1x8x72xf32> to vector<8x72xf32>
    %c1_8 = arith.constant 1 : index
    %c0_9 = arith.constant 0 : index
    %c0_10 = arith.constant 0 : index
    %c0_11 = arith.constant 0 : index
    %6 = vector.load %arg1[%c1_8, %c0_9, %c0_10, %c0_11] : memref<2x1x8x72xf32, #tpu.memory_space<vmem>>, vector<1x1x8x72xf32>
    %7 = vector.shape_cast %6 : vector<1x1x8x72xf32> to vector<8x72xf32>
    %c0_12 = arith.constant 0 : index
    %c0_13 = arith.constant 0 : index
    %c0_14 = arith.constant 0 : index
    %c0_15 = arith.constant 0 : index
    %8 = vector.load %arg2[%c0_12, %c0_13, %c0_14, %c0_15] : memref<2x1x72x16xf32, #tpu.memory_space<vmem>>, vector<1x1x72x16xf32>
    %9 = vector.shape_cast %8 : vector<1x1x72x16xf32> to vector<72x16xf32>
    %c1_16 = arith.constant 1 : index
    %c0_17 = arith.constant 0 : index
    %c0_18 = arith.constant 0 : index
    %c0_19 = arith.constant 0 : index
    %10 = vector.load %arg2[%c1_16, %c0_17, %c0_18, %c0_19] : memref<2x1x72x16xf32, #tpu.memory_space<vmem>>, vector<1x1x72x16xf32>
    %11 = vector.shape_cast %10 : vector<1x1x72x16xf32> to vector<72x16xf32>
    %cst = arith.constant dense<0.000000e+00> : vector<8x16xf32>
    %12 = tpu.matmul %5, %9, %cst {dimension_numbers = #tpu.dot_dimension_numbers<[1], [0], [0], [1], [0, 0, 1, 1], [], []>} : vector<8x72xf32>, vector<72x16xf32>, vector<8x16xf32> -> vector<8x16xf32>
    %cst_20 = arith.constant dense<0.000000e+00> : vector<8x16xf32>
    %13 = tpu.matmul %7, %11, %cst_20 {dimension_numbers = #tpu.dot_dimension_numbers<[1], [0], [0], [1], [0, 0, 1, 1], [], []>} : vector<8x72xf32>, vector<72x16xf32>, vector<8x16xf32> -> vector<8x16xf32>
    %14 = arith.subf %12, %13 : vector<8x16xf32>
    %15 = vector.broadcast %1 : vector<1x16xf32> to vector<8x16xf32>
    %16 = arith.addf %14, %15 : vector<8x16xf32>
    %cst_21 = arith.constant dense<0.000000e+00> : vector<8x16xf32>
    %17 = tpu.matmul %7, %9, %cst_21 {dimension_numbers = #tpu.dot_dimension_numbers<[1], [0], [0], [1], [0, 0, 1, 1], [], []>} : vector<8x72xf32>, vector<72x16xf32>, vector<8x16xf32> -> vector<8x16xf32>
    %cst_22 = arith.constant dense<0.000000e+00> : vector<8x16xf32>
    %18 = tpu.matmul %5, %11, %cst_22 {dimension_numbers = #tpu.dot_dimension_numbers<[1], [0], [0], [1], [0, 0, 1, 1], [], []>} : vector<8x72xf32>, vector<72x16xf32>, vector<8x16xf32> -> vector<8x16xf32>
    %19 = arith.addf %17, %18 : vector<8x16xf32>
    %20 = vector.broadcast %3 : vector<1x16xf32> to vector<8x16xf32>
    %21 = arith.addf %19, %20 : vector<8x16xf32>
    %cst_23 = arith.constant 0.000000e+00 : f32
    %22 = vector.broadcast %cst_23 : f32 to vector<8x16xf32>
    %23 = arith.maximumf %16, %22 : vector<8x16xf32>
    %cst_24 = arith.constant 0.000000e+00 : f32
    %24 = vector.broadcast %cst_24 : f32 to vector<8x16xf32>
    %25 = arith.maximumf %21, %24 : vector<8x16xf32>
    %c0_25 = arith.constant 0 : index
    %c0_26 = arith.constant 0 : index
    %c0_27 = arith.constant 0 : index
    %c0_28 = arith.constant 0 : index
    %26 = vector.load %arg4[%c0_25, %c0_26, %c0_27, %c0_28] : memref<2x1x8x16xf32, #tpu.memory_space<vmem>>, vector<1x1x8x16xf32>
    %27 = vector.shape_cast %26 : vector<1x1x8x16xf32> to vector<8x16xf32>
    %28 = vector.shape_cast %23 : vector<8x16xf32> to vector<1x1x8x16xf32>
    tpu.vector_store %arg4[%c0_25, %c0_26, %c0_27, %c0_28], %28 {strides = array<i32>} : memref<2x1x8x16xf32, #tpu.memory_space<vmem>>, vector<1x1x8x16xf32>,
    %c1_29 = arith.constant 1 : index
    %c0_30 = arith.constant 0 : index
    %c0_31 = arith.constant 0 : index
    %c0_32 = arith.constant 0 : index
    %29 = vector.load %arg4[%c1_29, %c0_30, %c0_31, %c0_32] : memref<2x1x8x16xf32, #tpu.memory_space<vmem>>, vector<1x1x8x16xf32>
    %30 = vector.shape_cast %29 : vector<1x1x8x16xf32> to vector<8x16xf32>
    %31 = vector.shape_cast %25 : vector<8x16xf32> to vector<1x1x8x16xf32>
    tpu.vector_store %arg4[%c1_29, %c0_30, %c0_31, %c0_32], %31 {strides = array<i32>} : memref<2x1x8x16xf32, #tpu.memory_space<vmem>>, vector<1x1x8x16xf32>,
    return
  }
  func.func @transform_0(%arg0: i32) -> (i32, i32, i32, i32) {
    %c0_i32 = arith.constant 0 : i32
    %c0_i32_0 = arith.constant 0 : i32
    %c0_i32_1 = arith.constant 0 : i32
    %c0_i32_2 = arith.constant 0 : i32
    return %c0_i32, %c0_i32_0, %arg0, %c0_i32_1 : i32, i32, i32, i32
  }
  func.func @transform_1(%arg0: i32) -> (i32, i32, i32, i32) {
    %c0_i32 = arith.constant 0 : i32
    %c0_i32_0 = arith.constant 0 : i32
    %c0_i32_1 = arith.constant 0 : i32
    %c0_i32_2 = arith.constant 0 : i32
    %c0_i32_3 = arith.constant 0 : i32
    return %c0_i32, %c0_i32_0, %c0_i32_1, %c0_i32_2 : i32, i32, i32, i32
  }
  func.func @transform_2(%arg0: i32) -> (i32, i32, i32) {
    %c0_i32 = arith.constant 0 : i32
    %c0_i32_0 = arith.constant 0 : i32
    %c0_i32_1 = arith.constant 0 : i32
    %c0_i32_2 = arith.constant 0 : i32
    return %c0_i32, %c0_i32_0, %c0_i32_1 : i32, i32, i32
  }
  func.func @transform_3(%arg0: i32) -> (i32, i32, i32, i32) {
    %c0_i32 = arith.constant 0 : i32
    %c0_i32_0 = arith.constant 0 : i32
    %c0_i32_1 = arith.constant 0 : i32
    %c0_i32_2 = arith.constant 0 : i32
    return %c0_i32, %c0_i32_0, %arg0, %c0_i32_1 : i32, i32, i32, i32
  }
}

module attributes {stable_mosaic.version = 11 : i64} {
  func.func @kernel(%arg0: i32, %arg1: memref<2x4x8x64xf32, #tpu.memory_space<vmem>>, %arg2: memref<2x4x64x8xf32, #tpu.memory_space<vmem>>, %arg3: memref<2x1x8xf32, #tpu.memory_space<vmem>>, %arg4: memref<2x4x8x8xf32, #tpu.memory_space<vmem>>, %arg5: memref<2x4x8x8xf32, #tpu.memory_space<vmem>>) attributes {dimension_semantics = [#tpu.dimension_semantics<parallel>], iteration_bounds = array<i64: 1>, scalar_prefetch = 0 : i64, scratch_operands = 0 : i64, tpu.core_type = #tpu.core_type<tc>, window_params = [{transform_indices = @transform_0, window_bounds = array<i64: 2, 4, 8, 64>}, {pipeline_mode = #tpu.pipeline_mode<synchronous>, transform_indices = @transform_1, window_bounds = array<i64: 2, 4, 64, 8>}, {pipeline_mode = #tpu.pipeline_mode<synchronous>, transform_indices = @transform_2, window_bounds = array<i64: 2, 1, 8>}, {transform_indices = @transform_3, window_bounds = array<i64: 2, 4, 8, 8>}, {transform_indices = @transform_4, window_bounds = array<i64: 2, 4, 8, 8>}]} {
    %c0 = arith.constant 0 : index
    %c0_0 = arith.constant 0 : index
    %c0_1 = arith.constant 0 : index
    %0 = vector.load %arg3[%c0, %c0_0, %c0_1] : memref<2x1x8xf32, #tpu.memory_space<vmem>>, vector<1x1x8xf32>
    %1 = vector.shape_cast %0 : vector<1x1x8xf32> to vector<1x8xf32>
    %c1 = arith.constant 1 : index
    %c0_2 = arith.constant 0 : index
    %c0_3 = arith.constant 0 : index
    %2 = vector.load %arg3[%c1, %c0_2, %c0_3] : memref<2x1x8xf32, #tpu.memory_space<vmem>>, vector<1x1x8xf32>
    %3 = vector.shape_cast %2 : vector<1x1x8xf32> to vector<1x8xf32>
    %c0_4 = arith.constant 0 : index
    %c0_5 = arith.constant 0 : index
    %c0_6 = arith.constant 0 : index
    %c0_7 = arith.constant 0 : index
    %4 = vector.load %arg1[%c0_4, %c0_5, %c0_6, %c0_7] : memref<2x4x8x64xf32, #tpu.memory_space<vmem>>, vector<1x1x8x64xf32>
    %5 = vector.shape_cast %4 : vector<1x1x8x64xf32> to vector<8x64xf32>
    %c1_8 = arith.constant 1 : index
    %c0_9 = arith.constant 0 : index
    %c0_10 = arith.constant 0 : index
    %c0_11 = arith.constant 0 : index
    %6 = vector.load %arg1[%c1_8, %c0_9, %c0_10, %c0_11] : memref<2x4x8x64xf32, #tpu.memory_space<vmem>>, vector<1x1x8x64xf32>
    %7 = vector.shape_cast %6 : vector<1x1x8x64xf32> to vector<8x64xf32>
    %c0_12 = arith.constant 0 : index
    %c0_13 = arith.constant 0 : index
    %c0_14 = arith.constant 0 : index
    %c0_15 = arith.constant 0 : index
    %8 = vector.load %arg2[%c0_12, %c0_13, %c0_14, %c0_15] : memref<2x4x64x8xf32, #tpu.memory_space<vmem>>, vector<1x1x64x8xf32>
    %9 = vector.shape_cast %8 : vector<1x1x64x8xf32> to vector<64x8xf32>
    %c1_16 = arith.constant 1 : index
    %c0_17 = arith.constant 0 : index
    %c0_18 = arith.constant 0 : index
    %c0_19 = arith.constant 0 : index
    %10 = vector.load %arg2[%c1_16, %c0_17, %c0_18, %c0_19] : memref<2x4x64x8xf32, #tpu.memory_space<vmem>>, vector<1x1x64x8xf32>
    %11 = vector.shape_cast %10 : vector<1x1x64x8xf32> to vector<64x8xf32>
    %cst = arith.constant dense<0.000000e+00> : vector<8x8xf32>
    %12 = tpu.matmul %5, %9, %cst {dimension_numbers = #tpu.dot_dimension_numbers<[1], [0], [0], [1], [0, 0, 1, 1], [], []>} : vector<8x64xf32>, vector<64x8xf32>, vector<8x8xf32> -> vector<8x8xf32>
    %cst_20 = arith.constant dense<0.000000e+00> : vector<8x8xf32>
    %13 = tpu.matmul %7, %11, %cst_20 {dimension_numbers = #tpu.dot_dimension_numbers<[1], [0], [0], [1], [0, 0, 1, 1], [], []>} : vector<8x64xf32>, vector<64x8xf32>, vector<8x8xf32> -> vector<8x8xf32>
    %14 = arith.subf %12, %13 : vector<8x8xf32>
    %15 = vector.broadcast %1 : vector<1x8xf32> to vector<8x8xf32>
    %16 = arith.addf %14, %15 : vector<8x8xf32>
    %cst_21 = arith.constant dense<0.000000e+00> : vector<8x8xf32>
    %17 = tpu.matmul %7, %9, %cst_21 {dimension_numbers = #tpu.dot_dimension_numbers<[1], [0], [0], [1], [0, 0, 1, 1], [], []>} : vector<8x64xf32>, vector<64x8xf32>, vector<8x8xf32> -> vector<8x8xf32>
    %cst_22 = arith.constant dense<0.000000e+00> : vector<8x8xf32>
    %18 = tpu.matmul %5, %11, %cst_22 {dimension_numbers = #tpu.dot_dimension_numbers<[1], [0], [0], [1], [0, 0, 1, 1], [], []>} : vector<8x64xf32>, vector<64x8xf32>, vector<8x8xf32> -> vector<8x8xf32>
    %19 = arith.addf %17, %18 : vector<8x8xf32>
    %20 = vector.broadcast %3 : vector<1x8xf32> to vector<8x8xf32>
    %21 = arith.addf %19, %20 : vector<8x8xf32>
    %cst_23 = arith.constant 0.000000e+00 : f32
    %22 = vector.broadcast %cst_23 : f32 to vector<8x8xf32>
    %23 = arith.maximumf %16, %22 : vector<8x8xf32>
    %cst_24 = arith.constant 0.000000e+00 : f32
    %24 = vector.broadcast %cst_24 : f32 to vector<8x8xf32>
    %25 = arith.maximumf %21, %24 : vector<8x8xf32>
    %c0_25 = arith.constant 0 : index
    %c0_26 = arith.constant 0 : index
    %c0_27 = arith.constant 0 : index
    %c0_28 = arith.constant 0 : index
    %26 = vector.load %arg4[%c0_25, %c0_26, %c0_27, %c0_28] : memref<2x4x8x8xf32, #tpu.memory_space<vmem>>, vector<1x1x8x8xf32>
    %27 = vector.shape_cast %26 : vector<1x1x8x8xf32> to vector<8x8xf32>
    %28 = arith.addf %23, %27 : vector<8x8xf32>
    %c1_29 = arith.constant 1 : index
    %c0_30 = arith.constant 0 : index
    %c0_31 = arith.constant 0 : index
    %c0_32 = arith.constant 0 : index
    %29 = vector.load %arg4[%c1_29, %c0_30, %c0_31, %c0_32] : memref<2x4x8x8xf32, #tpu.memory_space<vmem>>, vector<1x1x8x8xf32>
    %30 = vector.shape_cast %29 : vector<1x1x8x8xf32> to vector<8x8xf32>
    %31 = arith.addf %25, %30 : vector<8x8xf32>
    %c0_33 = arith.constant 0 : index
    %c0_34 = arith.constant 0 : index
    %c0_35 = arith.constant 0 : index
    %c0_36 = arith.constant 0 : index
    %32 = vector.load %arg5[%c0_33, %c0_34, %c0_35, %c0_36] : memref<2x4x8x8xf32, #tpu.memory_space<vmem>>, vector<1x1x8x8xf32>
    %33 = vector.shape_cast %32 : vector<1x1x8x8xf32> to vector<8x8xf32>
    %34 = vector.shape_cast %28 : vector<8x8xf32> to vector<1x1x8x8xf32>
    tpu.vector_store %arg5[%c0_33, %c0_34, %c0_35, %c0_36], %34 {strides = array<i32>} : memref<2x4x8x8xf32, #tpu.memory_space<vmem>>, vector<1x1x8x8xf32>,
    %c1_37 = arith.constant 1 : index
    %c0_38 = arith.constant 0 : index
    %c0_39 = arith.constant 0 : index
    %c0_40 = arith.constant 0 : index
    %35 = vector.load %arg5[%c1_37, %c0_38, %c0_39, %c0_40] : memref<2x4x8x8xf32, #tpu.memory_space<vmem>>, vector<1x1x8x8xf32>
    %36 = vector.shape_cast %35 : vector<1x1x8x8xf32> to vector<8x8xf32>
    %37 = vector.shape_cast %31 : vector<8x8xf32> to vector<1x1x8x8xf32>
    tpu.vector_store %arg5[%c1_37, %c0_38, %c0_39, %c0_40], %37 {strides = array<i32>} : memref<2x4x8x8xf32, #tpu.memory_space<vmem>>, vector<1x1x8x8xf32>,
    %c0_41 = arith.constant 0 : index
    %c1_42 = arith.constant 1 : index
    %c0_43 = arith.constant 0 : index
    %c0_44 = arith.constant 0 : index
    %38 = vector.load %arg1[%c0_41, %c1_42, %c0_43, %c0_44] : memref<2x4x8x64xf32, #tpu.memory_space<vmem>>, vector<1x1x8x64xf32>
    %39 = vector.shape_cast %38 : vector<1x1x8x64xf32> to vector<8x64xf32>
    %c1_45 = arith.constant 1 : index
    %c1_46 = arith.constant 1 : index
    %c0_47 = arith.constant 0 : index
    %c0_48 = arith.constant 0 : index
    %40 = vector.load %arg1[%c1_45, %c1_46, %c0_47, %c0_48] : memref<2x4x8x64xf32, #tpu.memory_space<vmem>>, vector<1x1x8x64xf32>
    %41 = vector.shape_cast %40 : vector<1x1x8x64xf32> to vector<8x64xf32>
    %c0_49 = arith.constant 0 : index
    %c1_50 = arith.constant 1 : index
    %c0_51 = arith.constant 0 : index
    %c0_52 = arith.constant 0 : index
    %42 = vector.load %arg2[%c0_49, %c1_50, %c0_51, %c0_52] : memref<2x4x64x8xf32, #tpu.memory_space<vmem>>, vector<1x1x64x8xf32>
    %43 = vector.shape_cast %42 : vector<1x1x64x8xf32> to vector<64x8xf32>
    %c1_53 = arith.constant 1 : index
    %c1_54 = arith.constant 1 : index
    %c0_55 = arith.constant 0 : index
    %c0_56 = arith.constant 0 : index
    %44 = vector.load %arg2[%c1_53, %c1_54, %c0_55, %c0_56] : memref<2x4x64x8xf32, #tpu.memory_space<vmem>>, vector<1x1x64x8xf32>
    %45 = vector.shape_cast %44 : vector<1x1x64x8xf32> to vector<64x8xf32>
    %cst_57 = arith.constant dense<0.000000e+00> : vector<8x8xf32>
    %46 = tpu.matmul %39, %43, %cst_57 {dimension_numbers = #tpu.dot_dimension_numbers<[1], [0], [0], [1], [0, 0, 1, 1], [], []>} : vector<8x64xf32>, vector<64x8xf32>, vector<8x8xf32> -> vector<8x8xf32>
    %cst_58 = arith.constant dense<0.000000e+00> : vector<8x8xf32>
    %47 = tpu.matmul %41, %45, %cst_58 {dimension_numbers = #tpu.dot_dimension_numbers<[1], [0], [0], [1], [0, 0, 1, 1], [], []>} : vector<8x64xf32>, vector<64x8xf32>, vector<8x8xf32> -> vector<8x8xf32>
    %48 = arith.subf %46, %47 : vector<8x8xf32>
    %49 = vector.broadcast %1 : vector<1x8xf32> to vector<8x8xf32>
    %50 = arith.addf %48, %49 : vector<8x8xf32>
    %cst_59 = arith.constant dense<0.000000e+00> : vector<8x8xf32>
    %51 = tpu.matmul %41, %43, %cst_59 {dimension_numbers = #tpu.dot_dimension_numbers<[1], [0], [0], [1], [0, 0, 1, 1], [], []>} : vector<8x64xf32>, vector<64x8xf32>, vector<8x8xf32> -> vector<8x8xf32>
    %cst_60 = arith.constant dense<0.000000e+00> : vector<8x8xf32>
    %52 = tpu.matmul %39, %45, %cst_60 {dimension_numbers = #tpu.dot_dimension_numbers<[1], [0], [0], [1], [0, 0, 1, 1], [], []>} : vector<8x64xf32>, vector<64x8xf32>, vector<8x8xf32> -> vector<8x8xf32>
    %53 = arith.addf %51, %52 : vector<8x8xf32>
    %54 = vector.broadcast %3 : vector<1x8xf32> to vector<8x8xf32>
    %55 = arith.addf %53, %54 : vector<8x8xf32>
    %cst_61 = arith.constant 0.000000e+00 : f32
    %56 = vector.broadcast %cst_61 : f32 to vector<8x8xf32>
    %57 = arith.maximumf %50, %56 : vector<8x8xf32>
    %cst_62 = arith.constant 0.000000e+00 : f32
    %58 = vector.broadcast %cst_62 : f32 to vector<8x8xf32>
    %59 = arith.maximumf %55, %58 : vector<8x8xf32>
    %c0_63 = arith.constant 0 : index
    %c1_64 = arith.constant 1 : index
    %c0_65 = arith.constant 0 : index
    %c0_66 = arith.constant 0 : index
    %60 = vector.load %arg4[%c0_63, %c1_64, %c0_65, %c0_66] : memref<2x4x8x8xf32, #tpu.memory_space<vmem>>, vector<1x1x8x8xf32>
    %61 = vector.shape_cast %60 : vector<1x1x8x8xf32> to vector<8x8xf32>
    %62 = arith.addf %57, %61 : vector<8x8xf32>
    %c1_67 = arith.constant 1 : index
    %c1_68 = arith.constant 1 : index
    %c0_69 = arith.constant 0 : index
    %c0_70 = arith.constant 0 : index
    %63 = vector.load %arg4[%c1_67, %c1_68, %c0_69, %c0_70] : memref<2x4x8x8xf32, #tpu.memory_space<vmem>>, vector<1x1x8x8xf32>
    %64 = vector.shape_cast %63 : vector<1x1x8x8xf32> to vector<8x8xf32>
    %65 = arith.addf %59, %64 : vector<8x8xf32>
    %c0_71 = arith.constant 0 : index
    %c1_72 = arith.constant 1 : index
    %c0_73 = arith.constant 0 : index
    %c0_74 = arith.constant 0 : index
    %66 = vector.load %arg5[%c0_71, %c1_72, %c0_73, %c0_74] : memref<2x4x8x8xf32, #tpu.memory_space<vmem>>, vector<1x1x8x8xf32>
    %67 = vector.shape_cast %66 : vector<1x1x8x8xf32> to vector<8x8xf32>
    %68 = vector.shape_cast %62 : vector<8x8xf32> to vector<1x1x8x8xf32>
    tpu.vector_store %arg5[%c0_71, %c1_72, %c0_73, %c0_74], %68 {strides = array<i32>} : memref<2x4x8x8xf32, #tpu.memory_space<vmem>>, vector<1x1x8x8xf32>,
    %c1_75 = arith.constant 1 : index
    %c1_76 = arith.constant 1 : index
    %c0_77 = arith.constant 0 : index
    %c0_78 = arith.constant 0 : index
    %69 = vector.load %arg5[%c1_75, %c1_76, %c0_77, %c0_78] : memref<2x4x8x8xf32, #tpu.memory_space<vmem>>, vector<1x1x8x8xf32>
    %70 = vector.shape_cast %69 : vector<1x1x8x8xf32> to vector<8x8xf32>
    %71 = vector.shape_cast %65 : vector<8x8xf32> to vector<1x1x8x8xf32>
    tpu.vector_store %arg5[%c1_75, %c1_76, %c0_77, %c0_78], %71 {strides = array<i32>} : memref<2x4x8x8xf32, #tpu.memory_space<vmem>>, vector<1x1x8x8xf32>,
    %c0_79 = arith.constant 0 : index
    %c2 = arith.constant 2 : index
    %c0_80 = arith.constant 0 : index
    %c0_81 = arith.constant 0 : index
    %72 = vector.load %arg1[%c0_79, %c2, %c0_80, %c0_81] : memref<2x4x8x64xf32, #tpu.memory_space<vmem>>, vector<1x1x8x64xf32>
    %73 = vector.shape_cast %72 : vector<1x1x8x64xf32> to vector<8x64xf32>
    %c1_82 = arith.constant 1 : index
    %c2_83 = arith.constant 2 : index
    %c0_84 = arith.constant 0 : index
    %c0_85 = arith.constant 0 : index
    %74 = vector.load %arg1[%c1_82, %c2_83, %c0_84, %c0_85] : memref<2x4x8x64xf32, #tpu.memory_space<vmem>>, vector<1x1x8x64xf32>
    %75 = vector.shape_cast %74 : vector<1x1x8x64xf32> to vector<8x64xf32>
    %c0_86 = arith.constant 0 : index
    %c2_87 = arith.constant 2 : index
    %c0_88 = arith.constant 0 : index
    %c0_89 = arith.constant 0 : index
    %76 = vector.load %arg2[%c0_86, %c2_87, %c0_88, %c0_89] : memref<2x4x64x8xf32, #tpu.memory_space<vmem>>, vector<1x1x64x8xf32>
    %77 = vector.shape_cast %76 : vector<1x1x64x8xf32> to vector<64x8xf32>
    %c1_90 = arith.constant 1 : index
    %c2_91 = arith.constant 2 : index
    %c0_92 = arith.constant 0 : index
    %c0_93 = arith.constant 0 : index
    %78 = vector.load %arg2[%c1_90, %c2_91, %c0_92, %c0_93] : memref<2x4x64x8xf32, #tpu.memory_space<vmem>>, vector<1x1x64x8xf32>
    %79 = vector.shape_cast %78 : vector<1x1x64x8xf32> to vector<64x8xf32>
    %cst_94 = arith.constant dense<0.000000e+00> : vector<8x8xf32>
    %80 = tpu.matmul %73, %77, %cst_94 {dimension_numbers = #tpu.dot_dimension_numbers<[1], [0], [0], [1], [0, 0, 1, 1], [], []>} : vector<8x64xf32>, vector<64x8xf32>, vector<8x8xf32> -> vector<8x8xf32>
    %cst_95 = arith.constant dense<0.000000e+00> : vector<8x8xf32>
    %81 = tpu.matmul %75, %79, %cst_95 {dimension_numbers = #tpu.dot_dimension_numbers<[1], [0], [0], [1], [0, 0, 1, 1], [], []>} : vector<8x64xf32>, vector<64x8xf32>, vector<8x8xf32> -> vector<8x8xf32>
    %82 = arith.subf %80, %81 : vector<8x8xf32>
    %83 = vector.broadcast %1 : vector<1x8xf32> to vector<8x8xf32>
    %84 = arith.addf %82, %83 : vector<8x8xf32>
    %cst_96 = arith.constant dense<0.000000e+00> : vector<8x8xf32>
    %85 = tpu.matmul %75, %77, %cst_96 {dimension_numbers = #tpu.dot_dimension_numbers<[1], [0], [0], [1], [0, 0, 1, 1], [], []>} : vector<8x64xf32>, vector<64x8xf32>, vector<8x8xf32> -> vector<8x8xf32>
    %cst_97 = arith.constant dense<0.000000e+00> : vector<8x8xf32>
    %86 = tpu.matmul %73, %79, %cst_97 {dimension_numbers = #tpu.dot_dimension_numbers<[1], [0], [0], [1], [0, 0, 1, 1], [], []>} : vector<8x64xf32>, vector<64x8xf32>, vector<8x8xf32> -> vector<8x8xf32>
    %87 = arith.addf %85, %86 : vector<8x8xf32>
    %88 = vector.broadcast %3 : vector<1x8xf32> to vector<8x8xf32>
    %89 = arith.addf %87, %88 : vector<8x8xf32>
    %cst_98 = arith.constant 0.000000e+00 : f32
    %90 = vector.broadcast %cst_98 : f32 to vector<8x8xf32>
    %91 = arith.maximumf %84, %90 : vector<8x8xf32>
    %cst_99 = arith.constant 0.000000e+00 : f32
    %92 = vector.broadcast %cst_99 : f32 to vector<8x8xf32>
    %93 = arith.maximumf %89, %92 : vector<8x8xf32>
    %c0_100 = arith.constant 0 : index
    %c2_101 = arith.constant 2 : index
    %c0_102 = arith.constant 0 : index
    %c0_103 = arith.constant 0 : index
    %94 = vector.load %arg4[%c0_100, %c2_101, %c0_102, %c0_103] : memref<2x4x8x8xf32, #tpu.memory_space<vmem>>, vector<1x1x8x8xf32>
    %95 = vector.shape_cast %94 : vector<1x1x8x8xf32> to vector<8x8xf32>
    %96 = arith.addf %91, %95 : vector<8x8xf32>
    %c1_104 = arith.constant 1 : index
    %c2_105 = arith.constant 2 : index
    %c0_106 = arith.constant 0 : index
    %c0_107 = arith.constant 0 : index
    %97 = vector.load %arg4[%c1_104, %c2_105, %c0_106, %c0_107] : memref<2x4x8x8xf32, #tpu.memory_space<vmem>>, vector<1x1x8x8xf32>
    %98 = vector.shape_cast %97 : vector<1x1x8x8xf32> to vector<8x8xf32>
    %99 = arith.addf %93, %98 : vector<8x8xf32>
    %c0_108 = arith.constant 0 : index
    %c2_109 = arith.constant 2 : index
    %c0_110 = arith.constant 0 : index
    %c0_111 = arith.constant 0 : index
    %100 = vector.load %arg5[%c0_108, %c2_109, %c0_110, %c0_111] : memref<2x4x8x8xf32, #tpu.memory_space<vmem>>, vector<1x1x8x8xf32>
    %101 = vector.shape_cast %100 : vector<1x1x8x8xf32> to vector<8x8xf32>
    %102 = vector.shape_cast %96 : vector<8x8xf32> to vector<1x1x8x8xf32>
    tpu.vector_store %arg5[%c0_108, %c2_109, %c0_110, %c0_111], %102 {strides = array<i32>} : memref<2x4x8x8xf32, #tpu.memory_space<vmem>>, vector<1x1x8x8xf32>,
    %c1_112 = arith.constant 1 : index
    %c2_113 = arith.constant 2 : index
    %c0_114 = arith.constant 0 : index
    %c0_115 = arith.constant 0 : index
    %103 = vector.load %arg5[%c1_112, %c2_113, %c0_114, %c0_115] : memref<2x4x8x8xf32, #tpu.memory_space<vmem>>, vector<1x1x8x8xf32>
    %104 = vector.shape_cast %103 : vector<1x1x8x8xf32> to vector<8x8xf32>
    %105 = vector.shape_cast %99 : vector<8x8xf32> to vector<1x1x8x8xf32>
    tpu.vector_store %arg5[%c1_112, %c2_113, %c0_114, %c0_115], %105 {strides = array<i32>} : memref<2x4x8x8xf32, #tpu.memory_space<vmem>>, vector<1x1x8x8xf32>,
    %c0_116 = arith.constant 0 : index
    %c3 = arith.constant 3 : index
    %c0_117 = arith.constant 0 : index
    %c0_118 = arith.constant 0 : index
    %106 = vector.load %arg1[%c0_116, %c3, %c0_117, %c0_118] : memref<2x4x8x64xf32, #tpu.memory_space<vmem>>, vector<1x1x8x64xf32>
    %107 = vector.shape_cast %106 : vector<1x1x8x64xf32> to vector<8x64xf32>
    %c1_119 = arith.constant 1 : index
    %c3_120 = arith.constant 3 : index
    %c0_121 = arith.constant 0 : index
    %c0_122 = arith.constant 0 : index
    %108 = vector.load %arg1[%c1_119, %c3_120, %c0_121, %c0_122] : memref<2x4x8x64xf32, #tpu.memory_space<vmem>>, vector<1x1x8x64xf32>
    %109 = vector.shape_cast %108 : vector<1x1x8x64xf32> to vector<8x64xf32>
    %c0_123 = arith.constant 0 : index
    %c3_124 = arith.constant 3 : index
    %c0_125 = arith.constant 0 : index
    %c0_126 = arith.constant 0 : index
    %110 = vector.load %arg2[%c0_123, %c3_124, %c0_125, %c0_126] : memref<2x4x64x8xf32, #tpu.memory_space<vmem>>, vector<1x1x64x8xf32>
    %111 = vector.shape_cast %110 : vector<1x1x64x8xf32> to vector<64x8xf32>
    %c1_127 = arith.constant 1 : index
    %c3_128 = arith.constant 3 : index
    %c0_129 = arith.constant 0 : index
    %c0_130 = arith.constant 0 : index
    %112 = vector.load %arg2[%c1_127, %c3_128, %c0_129, %c0_130] : memref<2x4x64x8xf32, #tpu.memory_space<vmem>>, vector<1x1x64x8xf32>
    %113 = vector.shape_cast %112 : vector<1x1x64x8xf32> to vector<64x8xf32>
    %cst_131 = arith.constant dense<0.000000e+00> : vector<8x8xf32>
    %114 = tpu.matmul %107, %111, %cst_131 {dimension_numbers = #tpu.dot_dimension_numbers<[1], [0], [0], [1], [0, 0, 1, 1], [], []>} : vector<8x64xf32>, vector<64x8xf32>, vector<8x8xf32> -> vector<8x8xf32>
    %cst_132 = arith.constant dense<0.000000e+00> : vector<8x8xf32>
    %115 = tpu.matmul %109, %113, %cst_132 {dimension_numbers = #tpu.dot_dimension_numbers<[1], [0], [0], [1], [0, 0, 1, 1], [], []>} : vector<8x64xf32>, vector<64x8xf32>, vector<8x8xf32> -> vector<8x8xf32>
    %116 = arith.subf %114, %115 : vector<8x8xf32>
    %117 = vector.broadcast %1 : vector<1x8xf32> to vector<8x8xf32>
    %118 = arith.addf %116, %117 : vector<8x8xf32>
    %cst_133 = arith.constant dense<0.000000e+00> : vector<8x8xf32>
    %119 = tpu.matmul %109, %111, %cst_133 {dimension_numbers = #tpu.dot_dimension_numbers<[1], [0], [0], [1], [0, 0, 1, 1], [], []>} : vector<8x64xf32>, vector<64x8xf32>, vector<8x8xf32> -> vector<8x8xf32>
    %cst_134 = arith.constant dense<0.000000e+00> : vector<8x8xf32>
    %120 = tpu.matmul %107, %113, %cst_134 {dimension_numbers = #tpu.dot_dimension_numbers<[1], [0], [0], [1], [0, 0, 1, 1], [], []>} : vector<8x64xf32>, vector<64x8xf32>, vector<8x8xf32> -> vector<8x8xf32>
    %121 = arith.addf %119, %120 : vector<8x8xf32>
    %122 = vector.broadcast %3 : vector<1x8xf32> to vector<8x8xf32>
    %123 = arith.addf %121, %122 : vector<8x8xf32>
    %cst_135 = arith.constant 0.000000e+00 : f32
    %124 = vector.broadcast %cst_135 : f32 to vector<8x8xf32>
    %125 = arith.maximumf %118, %124 : vector<8x8xf32>
    %cst_136 = arith.constant 0.000000e+00 : f32
    %126 = vector.broadcast %cst_136 : f32 to vector<8x8xf32>
    %127 = arith.maximumf %123, %126 : vector<8x8xf32>
    %c0_137 = arith.constant 0 : index
    %c3_138 = arith.constant 3 : index
    %c0_139 = arith.constant 0 : index
    %c0_140 = arith.constant 0 : index
    %128 = vector.load %arg4[%c0_137, %c3_138, %c0_139, %c0_140] : memref<2x4x8x8xf32, #tpu.memory_space<vmem>>, vector<1x1x8x8xf32>
    %129 = vector.shape_cast %128 : vector<1x1x8x8xf32> to vector<8x8xf32>
    %130 = arith.addf %125, %129 : vector<8x8xf32>
    %c1_141 = arith.constant 1 : index
    %c3_142 = arith.constant 3 : index
    %c0_143 = arith.constant 0 : index
    %c0_144 = arith.constant 0 : index
    %131 = vector.load %arg4[%c1_141, %c3_142, %c0_143, %c0_144] : memref<2x4x8x8xf32, #tpu.memory_space<vmem>>, vector<1x1x8x8xf32>
    %132 = vector.shape_cast %131 : vector<1x1x8x8xf32> to vector<8x8xf32>
    %133 = arith.addf %127, %132 : vector<8x8xf32>
    %c0_145 = arith.constant 0 : index
    %c3_146 = arith.constant 3 : index
    %c0_147 = arith.constant 0 : index
    %c0_148 = arith.constant 0 : index
    %134 = vector.load %arg5[%c0_145, %c3_146, %c0_147, %c0_148] : memref<2x4x8x8xf32, #tpu.memory_space<vmem>>, vector<1x1x8x8xf32>
    %135 = vector.shape_cast %134 : vector<1x1x8x8xf32> to vector<8x8xf32>
    %136 = vector.shape_cast %130 : vector<8x8xf32> to vector<1x1x8x8xf32>
    tpu.vector_store %arg5[%c0_145, %c3_146, %c0_147, %c0_148], %136 {strides = array<i32>} : memref<2x4x8x8xf32, #tpu.memory_space<vmem>>, vector<1x1x8x8xf32>,
    %c1_149 = arith.constant 1 : index
    %c3_150 = arith.constant 3 : index
    %c0_151 = arith.constant 0 : index
    %c0_152 = arith.constant 0 : index
    %137 = vector.load %arg5[%c1_149, %c3_150, %c0_151, %c0_152] : memref<2x4x8x8xf32, #tpu.memory_space<vmem>>, vector<1x1x8x8xf32>
    %138 = vector.shape_cast %137 : vector<1x1x8x8xf32> to vector<8x8xf32>
    %139 = vector.shape_cast %133 : vector<8x8xf32> to vector<1x1x8x8xf32>
    tpu.vector_store %arg5[%c1_149, %c3_150, %c0_151, %c0_152], %139 {strides = array<i32>} : memref<2x4x8x8xf32, #tpu.memory_space<vmem>>, vector<1x1x8x8xf32>,
    return
  }
  func.func @transform_0(%arg0: i32) -> (i32, i32, i32, i32) {
    %c0_i32 = arith.constant 0 : i32
    %c0_i32_0 = arith.constant 0 : i32
    %c0_i32_1 = arith.constant 0 : i32
    %c0_i32_2 = arith.constant 0 : i32
    return %c0_i32, %c0_i32_0, %arg0, %c0_i32_1 : i32, i32, i32, i32
  }
  func.func @transform_1(%arg0: i32) -> (i32, i32, i32, i32) {
    %c0_i32 = arith.constant 0 : i32
    %c0_i32_0 = arith.constant 0 : i32
    %c0_i32_1 = arith.constant 0 : i32
    %c0_i32_2 = arith.constant 0 : i32
    %c0_i32_3 = arith.constant 0 : i32
    return %c0_i32, %c0_i32_0, %c0_i32_1, %c0_i32_2 : i32, i32, i32, i32
  }
  func.func @transform_2(%arg0: i32) -> (i32, i32, i32) {
    %c0_i32 = arith.constant 0 : i32
    %c0_i32_0 = arith.constant 0 : i32
    %c0_i32_1 = arith.constant 0 : i32
    %c0_i32_2 = arith.constant 0 : i32
    return %c0_i32, %c0_i32_0, %c0_i32_1 : i32, i32, i32
  }
  func.func @transform_3(%arg0: i32) -> (i32, i32, i32, i32) {
    %c0_i32 = arith.constant 0 : i32
    %c0_i32_0 = arith.constant 0 : i32
    %c0_i32_1 = arith.constant 0 : i32
    %c0_i32_2 = arith.constant 0 : i32
    return %c0_i32, %c0_i32_0, %arg0, %c0_i32_1 : i32, i32, i32, i32
  }
  func.func @transform_4(%arg0: i32) -> (i32, i32, i32, i32) {
    %c0_i32 = arith.constant 0 : i32
    %c0_i32_0 = arith.constant 0 : i32
    %c0_i32_1 = arith.constant 0 : i32
    %c0_i32_2 = arith.constant 0 : i32
    return %c0_i32, %c0_i32_0, %arg0, %c0_i32_1 : i32, i32, i32, i32
  }
}

module attributes {stable_mosaic.version = 11 : i64} {
  func.func @kernel(%arg0: i32, %arg1: memref<2x4x32x32xf32, #tpu.memory_space<vmem>>, %arg2: memref<2x4x32x4xf32, #tpu.memory_space<vmem>>, %arg3: memref<2x1x4xf32, #tpu.memory_space<vmem>>, %arg4: memref<2x4x32x4xf32, #tpu.memory_space<vmem>>, %arg5: memref<2x4x32x4xf32, #tpu.memory_space<vmem>>) attributes {dimension_semantics = [#tpu.dimension_semantics<parallel>], iteration_bounds = array<i64: 1>, scalar_prefetch = 0 : i64, scratch_operands = 0 : i64, tpu.core_type = #tpu.core_type<tc>, window_params = [{transform_indices = @transform_0, window_bounds = array<i64: 2, 4, 32, 32>}, {pipeline_mode = #tpu.pipeline_mode<synchronous>, transform_indices = @transform_1, window_bounds = array<i64: 2, 4, 32, 4>}, {pipeline_mode = #tpu.pipeline_mode<synchronous>, transform_indices = @transform_2, window_bounds = array<i64: 2, 1, 4>}, {transform_indices = @transform_3, window_bounds = array<i64: 2, 4, 32, 4>}, {transform_indices = @transform_4, window_bounds = array<i64: 2, 4, 32, 4>}]} {
    %c0 = arith.constant 0 : index
    %c0_0 = arith.constant 0 : index
    %c0_1 = arith.constant 0 : index
    %0 = vector.load %arg3[%c0, %c0_0, %c0_1] : memref<2x1x4xf32, #tpu.memory_space<vmem>>, vector<1x1x4xf32>
    %1 = vector.shape_cast %0 : vector<1x1x4xf32> to vector<1x4xf32>
    %c1 = arith.constant 1 : index
    %c0_2 = arith.constant 0 : index
    %c0_3 = arith.constant 0 : index
    %2 = vector.load %arg3[%c1, %c0_2, %c0_3] : memref<2x1x4xf32, #tpu.memory_space<vmem>>, vector<1x1x4xf32>
    %3 = vector.shape_cast %2 : vector<1x1x4xf32> to vector<1x4xf32>
    %c0_4 = arith.constant 0 : index
    %c0_5 = arith.constant 0 : index
    %c0_6 = arith.constant 0 : index
    %c0_7 = arith.constant 0 : index
    %4 = vector.load %arg1[%c0_4, %c0_5, %c0_6, %c0_7] : memref<2x4x32x32xf32, #tpu.memory_space<vmem>>, vector<1x1x32x32xf32>
    %5 = vector.shape_cast %4 : vector<1x1x32x32xf32> to vector<32x32xf32>
    %c1_8 = arith.constant 1 : index
    %c0_9 = arith.constant 0 : index
    %c0_10 = arith.constant 0 : index
    %c0_11 = arith.constant 0 : index
    %6 = vector.load %arg1[%c1_8, %c0_9, %c0_10, %c0_11] : memref<2x4x32x32xf32, #tpu.memory_space<vmem>>, vector<1x1x32x32xf32>
    %7 = vector.shape_cast %6 : vector<1x1x32x32xf32> to vector<32x32xf32>
    %c0_12 = arith.constant 0 : index
    %c0_13 = arith.constant 0 : index
    %c0_14 = arith.constant 0 : index
    %c0_15 = arith.constant 0 : index
    %8 = vector.load %arg2[%c0_12, %c0_13, %c0_14, %c0_15] : memref<2x4x32x4xf32, #tpu.memory_space<vmem>>, vector<1x1x32x4xf32>
    %9 = vector.shape_cast %8 : vector<1x1x32x4xf32> to vector<32x4xf32>
    %c1_16 = arith.constant 1 : index
    %c0_17 = arith.constant 0 : index
    %c0_18 = arith.constant 0 : index
    %c0_19 = arith.constant 0 : index
    %10 = vector.load %arg2[%c1_16, %c0_17, %c0_18, %c0_19] : memref<2x4x32x4xf32, #tpu.memory_space<vmem>>, vector<1x1x32x4xf32>
    %11 = vector.shape_cast %10 : vector<1x1x32x4xf32> to vector<32x4xf32>
    %cst = arith.constant dense<0.000000e+00> : vector<32x4xf32>
    %12 = tpu.matmul %5, %9, %cst {dimension_numbers = #tpu.dot_dimension_numbers<[1], [0], [0], [1], [0, 0, 1, 1], [], []>} : vector<32x32xf32>, vector<32x4xf32>, vector<32x4xf32> -> vector<32x4xf32>
    %cst_20 = arith.constant dense<0.000000e+00> : vector<32x4xf32>
    %13 = tpu.matmul %7, %11, %cst_20 {dimension_numbers = #tpu.dot_dimension_numbers<[1], [0], [0], [1], [0, 0, 1, 1], [], []>} : vector<32x32xf32>, vector<32x4xf32>, vector<32x4xf32> -> vector<32x4xf32>
    %14 = arith.subf %12, %13 : vector<32x4xf32>
    %15 = vector.broadcast %1 : vector<1x4xf32> to vector<32x4xf32>
    %16 = arith.addf %14, %15 : vector<32x4xf32>
    %cst_21 = arith.constant dense<0.000000e+00> : vector<32x4xf32>
    %17 = tpu.matmul %7, %9, %cst_21 {dimension_numbers = #tpu.dot_dimension_numbers<[1], [0], [0], [1], [0, 0, 1, 1], [], []>} : vector<32x32xf32>, vector<32x4xf32>, vector<32x4xf32> -> vector<32x4xf32>
    %cst_22 = arith.constant dense<0.000000e+00> : vector<32x4xf32>
    %18 = tpu.matmul %5, %11, %cst_22 {dimension_numbers = #tpu.dot_dimension_numbers<[1], [0], [0], [1], [0, 0, 1, 1], [], []>} : vector<32x32xf32>, vector<32x4xf32>, vector<32x4xf32> -> vector<32x4xf32>
    %19 = arith.addf %17, %18 : vector<32x4xf32>
    %20 = vector.broadcast %3 : vector<1x4xf32> to vector<32x4xf32>
    %21 = arith.addf %19, %20 : vector<32x4xf32>
    %cst_23 = arith.constant 0.000000e+00 : f32
    %22 = vector.broadcast %cst_23 : f32 to vector<32x4xf32>
    %23 = arith.maximumf %16, %22 : vector<32x4xf32>
    %cst_24 = arith.constant 0.000000e+00 : f32
    %24 = vector.broadcast %cst_24 : f32 to vector<32x4xf32>
    %25 = arith.maximumf %21, %24 : vector<32x4xf32>
    %c0_25 = arith.constant 0 : index
    %c0_26 = arith.constant 0 : index
    %c0_27 = arith.constant 0 : index
    %c0_28 = arith.constant 0 : index
    %26 = vector.load %arg4[%c0_25, %c0_26, %c0_27, %c0_28] : memref<2x4x32x4xf32, #tpu.memory_space<vmem>>, vector<1x1x32x4xf32>
    %27 = vector.shape_cast %26 : vector<1x1x32x4xf32> to vector<32x4xf32>
    %28 = arith.addf %23, %27 : vector<32x4xf32>
    %c1_29 = arith.constant 1 : index
    %c0_30 = arith.constant 0 : index
    %c0_31 = arith.constant 0 : index
    %c0_32 = arith.constant 0 : index
    %29 = vector.load %arg4[%c1_29, %c0_30, %c0_31, %c0_32] : memref<2x4x32x4xf32, #tpu.memory_space<vmem>>, vector<1x1x32x4xf32>
    %30 = vector.shape_cast %29 : vector<1x1x32x4xf32> to vector<32x4xf32>
    %31 = arith.addf %25, %30 : vector<32x4xf32>
    %c0_33 = arith.constant 0 : index
    %c0_34 = arith.constant 0 : index
    %c0_35 = arith.constant 0 : index
    %c0_36 = arith.constant 0 : index
    %32 = vector.load %arg5[%c0_33, %c0_34, %c0_35, %c0_36] : memref<2x4x32x4xf32, #tpu.memory_space<vmem>>, vector<1x1x32x4xf32>
    %33 = vector.shape_cast %32 : vector<1x1x32x4xf32> to vector<32x4xf32>
    %34 = vector.shape_cast %28 : vector<32x4xf32> to vector<1x1x32x4xf32>
    tpu.vector_store %arg5[%c0_33, %c0_34, %c0_35, %c0_36], %34 {strides = array<i32>} : memref<2x4x32x4xf32, #tpu.memory_space<vmem>>, vector<1x1x32x4xf32>,
    %c1_37 = arith.constant 1 : index
    %c0_38 = arith.constant 0 : index
    %c0_39 = arith.constant 0 : index
    %c0_40 = arith.constant 0 : index
    %35 = vector.load %arg5[%c1_37, %c0_38, %c0_39, %c0_40] : memref<2x4x32x4xf32, #tpu.memory_space<vmem>>, vector<1x1x32x4xf32>
    %36 = vector.shape_cast %35 : vector<1x1x32x4xf32> to vector<32x4xf32>
    %37 = vector.shape_cast %31 : vector<32x4xf32> to vector<1x1x32x4xf32>
    tpu.vector_store %arg5[%c1_37, %c0_38, %c0_39, %c0_40], %37 {strides = array<i32>} : memref<2x4x32x4xf32, #tpu.memory_space<vmem>>, vector<1x1x32x4xf32>,
    %c0_41 = arith.constant 0 : index
    %c1_42 = arith.constant 1 : index
    %c0_43 = arith.constant 0 : index
    %c0_44 = arith.constant 0 : index
    %38 = vector.load %arg1[%c0_41, %c1_42, %c0_43, %c0_44] : memref<2x4x32x32xf32, #tpu.memory_space<vmem>>, vector<1x1x32x32xf32>
    %39 = vector.shape_cast %38 : vector<1x1x32x32xf32> to vector<32x32xf32>
    %c1_45 = arith.constant 1 : index
    %c1_46 = arith.constant 1 : index
    %c0_47 = arith.constant 0 : index
    %c0_48 = arith.constant 0 : index
    %40 = vector.load %arg1[%c1_45, %c1_46, %c0_47, %c0_48] : memref<2x4x32x32xf32, #tpu.memory_space<vmem>>, vector<1x1x32x32xf32>
    %41 = vector.shape_cast %40 : vector<1x1x32x32xf32> to vector<32x32xf32>
    %c0_49 = arith.constant 0 : index
    %c1_50 = arith.constant 1 : index
    %c0_51 = arith.constant 0 : index
    %c0_52 = arith.constant 0 : index
    %42 = vector.load %arg2[%c0_49, %c1_50, %c0_51, %c0_52] : memref<2x4x32x4xf32, #tpu.memory_space<vmem>>, vector<1x1x32x4xf32>
    %43 = vector.shape_cast %42 : vector<1x1x32x4xf32> to vector<32x4xf32>
    %c1_53 = arith.constant 1 : index
    %c1_54 = arith.constant 1 : index
    %c0_55 = arith.constant 0 : index
    %c0_56 = arith.constant 0 : index
    %44 = vector.load %arg2[%c1_53, %c1_54, %c0_55, %c0_56] : memref<2x4x32x4xf32, #tpu.memory_space<vmem>>, vector<1x1x32x4xf32>
    %45 = vector.shape_cast %44 : vector<1x1x32x4xf32> to vector<32x4xf32>
    %cst_57 = arith.constant dense<0.000000e+00> : vector<32x4xf32>
    %46 = tpu.matmul %39, %43, %cst_57 {dimension_numbers = #tpu.dot_dimension_numbers<[1], [0], [0], [1], [0, 0, 1, 1], [], []>} : vector<32x32xf32>, vector<32x4xf32>, vector<32x4xf32> -> vector<32x4xf32>
    %cst_58 = arith.constant dense<0.000000e+00> : vector<32x4xf32>
    %47 = tpu.matmul %41, %45, %cst_58 {dimension_numbers = #tpu.dot_dimension_numbers<[1], [0], [0], [1], [0, 0, 1, 1], [], []>} : vector<32x32xf32>, vector<32x4xf32>, vector<32x4xf32> -> vector<32x4xf32>
    %48 = arith.subf %46, %47 : vector<32x4xf32>
    %49 = vector.broadcast %1 : vector<1x4xf32> to vector<32x4xf32>
    %50 = arith.addf %48, %49 : vector<32x4xf32>
    %cst_59 = arith.constant dense<0.000000e+00> : vector<32x4xf32>
    %51 = tpu.matmul %41, %43, %cst_59 {dimension_numbers = #tpu.dot_dimension_numbers<[1], [0], [0], [1], [0, 0, 1, 1], [], []>} : vector<32x32xf32>, vector<32x4xf32>, vector<32x4xf32> -> vector<32x4xf32>
    %cst_60 = arith.constant dense<0.000000e+00> : vector<32x4xf32>
    %52 = tpu.matmul %39, %45, %cst_60 {dimension_numbers = #tpu.dot_dimension_numbers<[1], [0], [0], [1], [0, 0, 1, 1], [], []>} : vector<32x32xf32>, vector<32x4xf32>, vector<32x4xf32> -> vector<32x4xf32>
    %53 = arith.addf %51, %52 : vector<32x4xf32>
    %54 = vector.broadcast %3 : vector<1x4xf32> to vector<32x4xf32>
    %55 = arith.addf %53, %54 : vector<32x4xf32>
    %cst_61 = arith.constant 0.000000e+00 : f32
    %56 = vector.broadcast %cst_61 : f32 to vector<32x4xf32>
    %57 = arith.maximumf %50, %56 : vector<32x4xf32>
    %cst_62 = arith.constant 0.000000e+00 : f32
    %58 = vector.broadcast %cst_62 : f32 to vector<32x4xf32>
    %59 = arith.maximumf %55, %58 : vector<32x4xf32>
    %c0_63 = arith.constant 0 : index
    %c1_64 = arith.constant 1 : index
    %c0_65 = arith.constant 0 : index
    %c0_66 = arith.constant 0 : index
    %60 = vector.load %arg4[%c0_63, %c1_64, %c0_65, %c0_66] : memref<2x4x32x4xf32, #tpu.memory_space<vmem>>, vector<1x1x32x4xf32>
    %61 = vector.shape_cast %60 : vector<1x1x32x4xf32> to vector<32x4xf32>
    %62 = arith.addf %57, %61 : vector<32x4xf32>
    %c1_67 = arith.constant 1 : index
    %c1_68 = arith.constant 1 : index
    %c0_69 = arith.constant 0 : index
    %c0_70 = arith.constant 0 : index
    %63 = vector.load %arg4[%c1_67, %c1_68, %c0_69, %c0_70] : memref<2x4x32x4xf32, #tpu.memory_space<vmem>>, vector<1x1x32x4xf32>
    %64 = vector.shape_cast %63 : vector<1x1x32x4xf32> to vector<32x4xf32>
    %65 = arith.addf %59, %64 : vector<32x4xf32>
    %c0_71 = arith.constant 0 : index
    %c1_72 = arith.constant 1 : index
    %c0_73 = arith.constant 0 : index
    %c0_74 = arith.constant 0 : index
    %66 = vector.load %arg5[%c0_71, %c1_72, %c0_73, %c0_74] : memref<2x4x32x4xf32, #tpu.memory_space<vmem>>, vector<1x1x32x4xf32>
    %67 = vector.shape_cast %66 : vector<1x1x32x4xf32> to vector<32x4xf32>
    %68 = vector.shape_cast %62 : vector<32x4xf32> to vector<1x1x32x4xf32>
    tpu.vector_store %arg5[%c0_71, %c1_72, %c0_73, %c0_74], %68 {strides = array<i32>} : memref<2x4x32x4xf32, #tpu.memory_space<vmem>>, vector<1x1x32x4xf32>,
    %c1_75 = arith.constant 1 : index
    %c1_76 = arith.constant 1 : index
    %c0_77 = arith.constant 0 : index
    %c0_78 = arith.constant 0 : index
    %69 = vector.load %arg5[%c1_75, %c1_76, %c0_77, %c0_78] : memref<2x4x32x4xf32, #tpu.memory_space<vmem>>, vector<1x1x32x4xf32>
    %70 = vector.shape_cast %69 : vector<1x1x32x4xf32> to vector<32x4xf32>
    %71 = vector.shape_cast %65 : vector<32x4xf32> to vector<1x1x32x4xf32>
    tpu.vector_store %arg5[%c1_75, %c1_76, %c0_77, %c0_78], %71 {strides = array<i32>} : memref<2x4x32x4xf32, #tpu.memory_space<vmem>>, vector<1x1x32x4xf32>,
    %c0_79 = arith.constant 0 : index
    %c2 = arith.constant 2 : index
    %c0_80 = arith.constant 0 : index
    %c0_81 = arith.constant 0 : index
    %72 = vector.load %arg1[%c0_79, %c2, %c0_80, %c0_81] : memref<2x4x32x32xf32, #tpu.memory_space<vmem>>, vector<1x1x32x32xf32>
    %73 = vector.shape_cast %72 : vector<1x1x32x32xf32> to vector<32x32xf32>
    %c1_82 = arith.constant 1 : index
    %c2_83 = arith.constant 2 : index
    %c0_84 = arith.constant 0 : index
    %c0_85 = arith.constant 0 : index
    %74 = vector.load %arg1[%c1_82, %c2_83, %c0_84, %c0_85] : memref<2x4x32x32xf32, #tpu.memory_space<vmem>>, vector<1x1x32x32xf32>
    %75 = vector.shape_cast %74 : vector<1x1x32x32xf32> to vector<32x32xf32>
    %c0_86 = arith.constant 0 : index
    %c2_87 = arith.constant 2 : index
    %c0_88 = arith.constant 0 : index
    %c0_89 = arith.constant 0 : index
    %76 = vector.load %arg2[%c0_86, %c2_87, %c0_88, %c0_89] : memref<2x4x32x4xf32, #tpu.memory_space<vmem>>, vector<1x1x32x4xf32>
    %77 = vector.shape_cast %76 : vector<1x1x32x4xf32> to vector<32x4xf32>
    %c1_90 = arith.constant 1 : index
    %c2_91 = arith.constant 2 : index
    %c0_92 = arith.constant 0 : index
    %c0_93 = arith.constant 0 : index
    %78 = vector.load %arg2[%c1_90, %c2_91, %c0_92, %c0_93] : memref<2x4x32x4xf32, #tpu.memory_space<vmem>>, vector<1x1x32x4xf32>
    %79 = vector.shape_cast %78 : vector<1x1x32x4xf32> to vector<32x4xf32>
    %cst_94 = arith.constant dense<0.000000e+00> : vector<32x4xf32>
    %80 = tpu.matmul %73, %77, %cst_94 {dimension_numbers = #tpu.dot_dimension_numbers<[1], [0], [0], [1], [0, 0, 1, 1], [], []>} : vector<32x32xf32>, vector<32x4xf32>, vector<32x4xf32> -> vector<32x4xf32>
    %cst_95 = arith.constant dense<0.000000e+00> : vector<32x4xf32>
    %81 = tpu.matmul %75, %79, %cst_95 {dimension_numbers = #tpu.dot_dimension_numbers<[1], [0], [0], [1], [0, 0, 1, 1], [], []>} : vector<32x32xf32>, vector<32x4xf32>, vector<32x4xf32> -> vector<32x4xf32>
    %82 = arith.subf %80, %81 : vector<32x4xf32>
    %83 = vector.broadcast %1 : vector<1x4xf32> to vector<32x4xf32>
    %84 = arith.addf %82, %83 : vector<32x4xf32>
    %cst_96 = arith.constant dense<0.000000e+00> : vector<32x4xf32>
    %85 = tpu.matmul %75, %77, %cst_96 {dimension_numbers = #tpu.dot_dimension_numbers<[1], [0], [0], [1], [0, 0, 1, 1], [], []>} : vector<32x32xf32>, vector<32x4xf32>, vector<32x4xf32> -> vector<32x4xf32>
    %cst_97 = arith.constant dense<0.000000e+00> : vector<32x4xf32>
    %86 = tpu.matmul %73, %79, %cst_97 {dimension_numbers = #tpu.dot_dimension_numbers<[1], [0], [0], [1], [0, 0, 1, 1], [], []>} : vector<32x32xf32>, vector<32x4xf32>, vector<32x4xf32> -> vector<32x4xf32>
    %87 = arith.addf %85, %86 : vector<32x4xf32>
    %88 = vector.broadcast %3 : vector<1x4xf32> to vector<32x4xf32>
    %89 = arith.addf %87, %88 : vector<32x4xf32>
    %cst_98 = arith.constant 0.000000e+00 : f32
    %90 = vector.broadcast %cst_98 : f32 to vector<32x4xf32>
    %91 = arith.maximumf %84, %90 : vector<32x4xf32>
    %cst_99 = arith.constant 0.000000e+00 : f32
    %92 = vector.broadcast %cst_99 : f32 to vector<32x4xf32>
    %93 = arith.maximumf %89, %92 : vector<32x4xf32>
    %c0_100 = arith.constant 0 : index
    %c2_101 = arith.constant 2 : index
    %c0_102 = arith.constant 0 : index
    %c0_103 = arith.constant 0 : index
    %94 = vector.load %arg4[%c0_100, %c2_101, %c0_102, %c0_103] : memref<2x4x32x4xf32, #tpu.memory_space<vmem>>, vector<1x1x32x4xf32>
    %95 = vector.shape_cast %94 : vector<1x1x32x4xf32> to vector<32x4xf32>
    %96 = arith.addf %91, %95 : vector<32x4xf32>
    %c1_104 = arith.constant 1 : index
    %c2_105 = arith.constant 2 : index
    %c0_106 = arith.constant 0 : index
    %c0_107 = arith.constant 0 : index
    %97 = vector.load %arg4[%c1_104, %c2_105, %c0_106, %c0_107] : memref<2x4x32x4xf32, #tpu.memory_space<vmem>>, vector<1x1x32x4xf32>
    %98 = vector.shape_cast %97 : vector<1x1x32x4xf32> to vector<32x4xf32>
    %99 = arith.addf %93, %98 : vector<32x4xf32>
    %c0_108 = arith.constant 0 : index
    %c2_109 = arith.constant 2 : index
    %c0_110 = arith.constant 0 : index
    %c0_111 = arith.constant 0 : index
    %100 = vector.load %arg5[%c0_108, %c2_109, %c0_110, %c0_111] : memref<2x4x32x4xf32, #tpu.memory_space<vmem>>, vector<1x1x32x4xf32>
    %101 = vector.shape_cast %100 : vector<1x1x32x4xf32> to vector<32x4xf32>
    %102 = vector.shape_cast %96 : vector<32x4xf32> to vector<1x1x32x4xf32>
    tpu.vector_store %arg5[%c0_108, %c2_109, %c0_110, %c0_111], %102 {strides = array<i32>} : memref<2x4x32x4xf32, #tpu.memory_space<vmem>>, vector<1x1x32x4xf32>,
    %c1_112 = arith.constant 1 : index
    %c2_113 = arith.constant 2 : index
    %c0_114 = arith.constant 0 : index
    %c0_115 = arith.constant 0 : index
    %103 = vector.load %arg5[%c1_112, %c2_113, %c0_114, %c0_115] : memref<2x4x32x4xf32, #tpu.memory_space<vmem>>, vector<1x1x32x4xf32>
    %104 = vector.shape_cast %103 : vector<1x1x32x4xf32> to vector<32x4xf32>
    %105 = vector.shape_cast %99 : vector<32x4xf32> to vector<1x1x32x4xf32>
    tpu.vector_store %arg5[%c1_112, %c2_113, %c0_114, %c0_115], %105 {strides = array<i32>} : memref<2x4x32x4xf32, #tpu.memory_space<vmem>>, vector<1x1x32x4xf32>,
    %c0_116 = arith.constant 0 : index
    %c3 = arith.constant 3 : index
    %c0_117 = arith.constant 0 : index
    %c0_118 = arith.constant 0 : index
    %106 = vector.load %arg1[%c0_116, %c3, %c0_117, %c0_118] : memref<2x4x32x32xf32, #tpu.memory_space<vmem>>, vector<1x1x32x32xf32>
    %107 = vector.shape_cast %106 : vector<1x1x32x32xf32> to vector<32x32xf32>
    %c1_119 = arith.constant 1 : index
    %c3_120 = arith.constant 3 : index
    %c0_121 = arith.constant 0 : index
    %c0_122 = arith.constant 0 : index
    %108 = vector.load %arg1[%c1_119, %c3_120, %c0_121, %c0_122] : memref<2x4x32x32xf32, #tpu.memory_space<vmem>>, vector<1x1x32x32xf32>
    %109 = vector.shape_cast %108 : vector<1x1x32x32xf32> to vector<32x32xf32>
    %c0_123 = arith.constant 0 : index
    %c3_124 = arith.constant 3 : index
    %c0_125 = arith.constant 0 : index
    %c0_126 = arith.constant 0 : index
    %110 = vector.load %arg2[%c0_123, %c3_124, %c0_125, %c0_126] : memref<2x4x32x4xf32, #tpu.memory_space<vmem>>, vector<1x1x32x4xf32>
    %111 = vector.shape_cast %110 : vector<1x1x32x4xf32> to vector<32x4xf32>
    %c1_127 = arith.constant 1 : index
    %c3_128 = arith.constant 3 : index
    %c0_129 = arith.constant 0 : index
    %c0_130 = arith.constant 0 : index
    %112 = vector.load %arg2[%c1_127, %c3_128, %c0_129, %c0_130] : memref<2x4x32x4xf32, #tpu.memory_space<vmem>>, vector<1x1x32x4xf32>
    %113 = vector.shape_cast %112 : vector<1x1x32x4xf32> to vector<32x4xf32>
    %cst_131 = arith.constant dense<0.000000e+00> : vector<32x4xf32>
    %114 = tpu.matmul %107, %111, %cst_131 {dimension_numbers = #tpu.dot_dimension_numbers<[1], [0], [0], [1], [0, 0, 1, 1], [], []>} : vector<32x32xf32>, vector<32x4xf32>, vector<32x4xf32> -> vector<32x4xf32>
    %cst_132 = arith.constant dense<0.000000e+00> : vector<32x4xf32>
    %115 = tpu.matmul %109, %113, %cst_132 {dimension_numbers = #tpu.dot_dimension_numbers<[1], [0], [0], [1], [0, 0, 1, 1], [], []>} : vector<32x32xf32>, vector<32x4xf32>, vector<32x4xf32> -> vector<32x4xf32>
    %116 = arith.subf %114, %115 : vector<32x4xf32>
    %117 = vector.broadcast %1 : vector<1x4xf32> to vector<32x4xf32>
    %118 = arith.addf %116, %117 : vector<32x4xf32>
    %cst_133 = arith.constant dense<0.000000e+00> : vector<32x4xf32>
    %119 = tpu.matmul %109, %111, %cst_133 {dimension_numbers = #tpu.dot_dimension_numbers<[1], [0], [0], [1], [0, 0, 1, 1], [], []>} : vector<32x32xf32>, vector<32x4xf32>, vector<32x4xf32> -> vector<32x4xf32>
    %cst_134 = arith.constant dense<0.000000e+00> : vector<32x4xf32>
    %120 = tpu.matmul %107, %113, %cst_134 {dimension_numbers = #tpu.dot_dimension_numbers<[1], [0], [0], [1], [0, 0, 1, 1], [], []>} : vector<32x32xf32>, vector<32x4xf32>, vector<32x4xf32> -> vector<32x4xf32>
    %121 = arith.addf %119, %120 : vector<32x4xf32>
    %122 = vector.broadcast %3 : vector<1x4xf32> to vector<32x4xf32>
    %123 = arith.addf %121, %122 : vector<32x4xf32>
    %cst_135 = arith.constant 0.000000e+00 : f32
    %124 = vector.broadcast %cst_135 : f32 to vector<32x4xf32>
    %125 = arith.maximumf %118, %124 : vector<32x4xf32>
    %cst_136 = arith.constant 0.000000e+00 : f32
    %126 = vector.broadcast %cst_136 : f32 to vector<32x4xf32>
    %127 = arith.maximumf %123, %126 : vector<32x4xf32>
    %c0_137 = arith.constant 0 : index
    %c3_138 = arith.constant 3 : index
    %c0_139 = arith.constant 0 : index
    %c0_140 = arith.constant 0 : index
    %128 = vector.load %arg4[%c0_137, %c3_138, %c0_139, %c0_140] : memref<2x4x32x4xf32, #tpu.memory_space<vmem>>, vector<1x1x32x4xf32>
    %129 = vector.shape_cast %128 : vector<1x1x32x4xf32> to vector<32x4xf32>
    %130 = arith.addf %125, %129 : vector<32x4xf32>
    %c1_141 = arith.constant 1 : index
    %c3_142 = arith.constant 3 : index
    %c0_143 = arith.constant 0 : index
    %c0_144 = arith.constant 0 : index
    %131 = vector.load %arg4[%c1_141, %c3_142, %c0_143, %c0_144] : memref<2x4x32x4xf32, #tpu.memory_space<vmem>>, vector<1x1x32x4xf32>
    %132 = vector.shape_cast %131 : vector<1x1x32x4xf32> to vector<32x4xf32>
    %133 = arith.addf %127, %132 : vector<32x4xf32>
    %c0_145 = arith.constant 0 : index
    %c3_146 = arith.constant 3 : index
    %c0_147 = arith.constant 0 : index
    %c0_148 = arith.constant 0 : index
    %134 = vector.load %arg5[%c0_145, %c3_146, %c0_147, %c0_148] : memref<2x4x32x4xf32, #tpu.memory_space<vmem>>, vector<1x1x32x4xf32>
    %135 = vector.shape_cast %134 : vector<1x1x32x4xf32> to vector<32x4xf32>
    %136 = vector.shape_cast %130 : vector<32x4xf32> to vector<1x1x32x4xf32>
    tpu.vector_store %arg5[%c0_145, %c3_146, %c0_147, %c0_148], %136 {strides = array<i32>} : memref<2x4x32x4xf32, #tpu.memory_space<vmem>>, vector<1x1x32x4xf32>,
    %c1_149 = arith.constant 1 : index
    %c3_150 = arith.constant 3 : index
    %c0_151 = arith.constant 0 : index
    %c0_152 = arith.constant 0 : index
    %137 = vector.load %arg5[%c1_149, %c3_150, %c0_151, %c0_152] : memref<2x4x32x4xf32, #tpu.memory_space<vmem>>, vector<1x1x32x4xf32>
    %138 = vector.shape_cast %137 : vector<1x1x32x4xf32> to vector<32x4xf32>
    %139 = vector.shape_cast %133 : vector<32x4xf32> to vector<1x1x32x4xf32>
    tpu.vector_store %arg5[%c1_149, %c3_150, %c0_151, %c0_152], %139 {strides = array<i32>} : memref<2x4x32x4xf32, #tpu.memory_space<vmem>>, vector<1x1x32x4xf32>,
    return
  }
  func.func @transform_0(%arg0: i32) -> (i32, i32, i32, i32) {
    %c0_i32 = arith.constant 0 : i32
    %c0_i32_0 = arith.constant 0 : i32
    %c0_i32_1 = arith.constant 0 : i32
    %c0_i32_2 = arith.constant 0 : i32
    return %c0_i32, %c0_i32_0, %arg0, %c0_i32_1 : i32, i32, i32, i32
  }
  func.func @transform_1(%arg0: i32) -> (i32, i32, i32, i32) {
    %c0_i32 = arith.constant 0 : i32
    %c0_i32_0 = arith.constant 0 : i32
    %c0_i32_1 = arith.constant 0 : i32
    %c0_i32_2 = arith.constant 0 : i32
    %c0_i32_3 = arith.constant 0 : i32
    return %c0_i32, %c0_i32_0, %c0_i32_1, %c0_i32_2 : i32, i32, i32, i32
  }
  func.func @transform_2(%arg0: i32) -> (i32, i32, i32) {
    %c0_i32 = arith.constant 0 : i32
    %c0_i32_0 = arith.constant 0 : i32
    %c0_i32_1 = arith.constant 0 : i32
    %c0_i32_2 = arith.constant 0 : i32
    return %c0_i32, %c0_i32_0, %c0_i32_1 : i32, i32, i32
  }
  func.func @transform_3(%arg0: i32) -> (i32, i32, i32, i32) {
    %c0_i32 = arith.constant 0 : i32
    %c0_i32_0 = arith.constant 0 : i32
    %c0_i32_1 = arith.constant 0 : i32
    %c0_i32_2 = arith.constant 0 : i32
    return %c0_i32, %c0_i32_0, %arg0, %c0_i32_1 : i32, i32, i32, i32
  }
  func.func @transform_4(%arg0: i32) -> (i32, i32, i32, i32) {
    %c0_i32 = arith.constant 0 : i32
    %c0_i32_0 = arith.constant 0 : i32
    %c0_i32_1 = arith.constant 0 : i32
    %c0_i32_2 = arith.constant 0 : i32
    return %c0_i32, %c0_i32_0, %arg0, %c0_i32_1 : i32, i32, i32, i32
  }
}

module attributes {stable_mosaic.version = 11 : i64} {
  func.func @kernel(%arg0: i32, %arg1: memref<2x4x128x16xf32, #tpu.memory_space<vmem>>, %arg2: memref<2x4x16x1xf32, #tpu.memory_space<vmem>>, %arg3: memref<2x1x1xf32, #tpu.memory_space<vmem>>, %arg4: memref<2x4x128x1xf32, #tpu.memory_space<vmem>>) attributes {dimension_semantics = [#tpu.dimension_semantics<parallel>], iteration_bounds = array<i64: 1>, scalar_prefetch = 0 : i64, scratch_operands = 0 : i64, tpu.core_type = #tpu.core_type<tc>, window_params = [{transform_indices = @transform_0, window_bounds = array<i64: 2, 4, 128, 16>}, {pipeline_mode = #tpu.pipeline_mode<synchronous>, transform_indices = @transform_1, window_bounds = array<i64: 2, 4, 16, 1>}, {pipeline_mode = #tpu.pipeline_mode<synchronous>, transform_indices = @transform_2, window_bounds = array<i64: 2, 1, 1>}, {transform_indices = @transform_3, window_bounds = array<i64: 2, 4, 128, 1>}]} {
    %c0 = arith.constant 0 : index
    %c0_0 = arith.constant 0 : index
    %c0_1 = arith.constant 0 : index
    %0 = vector.load %arg3[%c0, %c0_0, %c0_1] : memref<2x1x1xf32, #tpu.memory_space<vmem>>, vector<1x1x1xf32>
    %1 = vector.shape_cast %0 : vector<1x1x1xf32> to vector<1x1xf32>
    %c1 = arith.constant 1 : index
    %c0_2 = arith.constant 0 : index
    %c0_3 = arith.constant 0 : index
    %2 = vector.load %arg3[%c1, %c0_2, %c0_3] : memref<2x1x1xf32, #tpu.memory_space<vmem>>, vector<1x1x1xf32>
    %3 = vector.shape_cast %2 : vector<1x1x1xf32> to vector<1x1xf32>
    %c0_4 = arith.constant 0 : index
    %c0_5 = arith.constant 0 : index
    %c0_6 = arith.constant 0 : index
    %c0_7 = arith.constant 0 : index
    %4 = vector.load %arg1[%c0_4, %c0_5, %c0_6, %c0_7] : memref<2x4x128x16xf32, #tpu.memory_space<vmem>>, vector<1x1x128x16xf32>
    %5 = vector.shape_cast %4 : vector<1x1x128x16xf32> to vector<128x16xf32>
    %c1_8 = arith.constant 1 : index
    %c0_9 = arith.constant 0 : index
    %c0_10 = arith.constant 0 : index
    %c0_11 = arith.constant 0 : index
    %6 = vector.load %arg1[%c1_8, %c0_9, %c0_10, %c0_11] : memref<2x4x128x16xf32, #tpu.memory_space<vmem>>, vector<1x1x128x16xf32>
    %7 = vector.shape_cast %6 : vector<1x1x128x16xf32> to vector<128x16xf32>
    %c0_12 = arith.constant 0 : index
    %c0_13 = arith.constant 0 : index
    %c0_14 = arith.constant 0 : index
    %c0_15 = arith.constant 0 : index
    %8 = vector.load %arg2[%c0_12, %c0_13, %c0_14, %c0_15] : memref<2x4x16x1xf32, #tpu.memory_space<vmem>>, vector<1x1x16x1xf32>
    %9 = vector.shape_cast %8 : vector<1x1x16x1xf32> to vector<16x1xf32>
    %c1_16 = arith.constant 1 : index
    %c0_17 = arith.constant 0 : index
    %c0_18 = arith.constant 0 : index
    %c0_19 = arith.constant 0 : index
    %10 = vector.load %arg2[%c1_16, %c0_17, %c0_18, %c0_19] : memref<2x4x16x1xf32, #tpu.memory_space<vmem>>, vector<1x1x16x1xf32>
    %11 = vector.shape_cast %10 : vector<1x1x16x1xf32> to vector<16x1xf32>
    %cst = arith.constant dense<0.000000e+00> : vector<128x1xf32>
    %12 = tpu.matmul %5, %9, %cst {dimension_numbers = #tpu.dot_dimension_numbers<[1], [0], [0], [1], [0, 0, 1, 1], [], []>} : vector<128x16xf32>, vector<16x1xf32>, vector<128x1xf32> -> vector<128x1xf32>
    %cst_20 = arith.constant dense<0.000000e+00> : vector<128x1xf32>
    %13 = tpu.matmul %7, %11, %cst_20 {dimension_numbers = #tpu.dot_dimension_numbers<[1], [0], [0], [1], [0, 0, 1, 1], [], []>} : vector<128x16xf32>, vector<16x1xf32>, vector<128x1xf32> -> vector<128x1xf32>
    %14 = arith.subf %12, %13 : vector<128x1xf32>
    %15 = vector.broadcast %1 : vector<1x1xf32> to vector<128x1xf32>
    %16 = arith.addf %14, %15 : vector<128x1xf32>
    %cst_21 = arith.constant dense<0.000000e+00> : vector<128x1xf32>
    %17 = tpu.matmul %7, %9, %cst_21 {dimension_numbers = #tpu.dot_dimension_numbers<[1], [0], [0], [1], [0, 0, 1, 1], [], []>} : vector<128x16xf32>, vector<16x1xf32>, vector<128x1xf32> -> vector<128x1xf32>
    %cst_22 = arith.constant dense<0.000000e+00> : vector<128x1xf32>
    %18 = tpu.matmul %5, %11, %cst_22 {dimension_numbers = #tpu.dot_dimension_numbers<[1], [0], [0], [1], [0, 0, 1, 1], [], []>} : vector<128x16xf32>, vector<16x1xf32>, vector<128x1xf32> -> vector<128x1xf32>
    %19 = arith.addf %17, %18 : vector<128x1xf32>
    %20 = vector.broadcast %3 : vector<1x1xf32> to vector<128x1xf32>
    %21 = arith.addf %19, %20 : vector<128x1xf32>
    %c0_23 = arith.constant 0 : index
    %c0_24 = arith.constant 0 : index
    %c0_25 = arith.constant 0 : index
    %c0_26 = arith.constant 0 : index
    %22 = vector.load %arg4[%c0_23, %c0_24, %c0_25, %c0_26] : memref<2x4x128x1xf32, #tpu.memory_space<vmem>>, vector<1x1x128x1xf32>
    %23 = vector.shape_cast %22 : vector<1x1x128x1xf32> to vector<128x1xf32>
    %24 = vector.shape_cast %16 : vector<128x1xf32> to vector<1x1x128x1xf32>
    tpu.vector_store %arg4[%c0_23, %c0_24, %c0_25, %c0_26], %24 {strides = array<i32>} : memref<2x4x128x1xf32, #tpu.memory_space<vmem>>, vector<1x1x128x1xf32>,
    %c1_27 = arith.constant 1 : index
    %c0_28 = arith.constant 0 : index
    %c0_29 = arith.constant 0 : index
    %c0_30 = arith.constant 0 : index
    %25 = vector.load %arg4[%c1_27, %c0_28, %c0_29, %c0_30] : memref<2x4x128x1xf32, #tpu.memory_space<vmem>>, vector<1x1x128x1xf32>
    %26 = vector.shape_cast %25 : vector<1x1x128x1xf32> to vector<128x1xf32>
    %27 = vector.shape_cast %21 : vector<128x1xf32> to vector<1x1x128x1xf32>
    tpu.vector_store %arg4[%c1_27, %c0_28, %c0_29, %c0_30], %27 {strides = array<i32>} : memref<2x4x128x1xf32, #tpu.memory_space<vmem>>, vector<1x1x128x1xf32>,
    %c0_31 = arith.constant 0 : index
    %c1_32 = arith.constant 1 : index
    %c0_33 = arith.constant 0 : index
    %c0_34 = arith.constant 0 : index
    %28 = vector.load %arg1[%c0_31, %c1_32, %c0_33, %c0_34] : memref<2x4x128x16xf32, #tpu.memory_space<vmem>>, vector<1x1x128x16xf32>
    %29 = vector.shape_cast %28 : vector<1x1x128x16xf32> to vector<128x16xf32>
    %c1_35 = arith.constant 1 : index
    %c1_36 = arith.constant 1 : index
    %c0_37 = arith.constant 0 : index
    %c0_38 = arith.constant 0 : index
    %30 = vector.load %arg1[%c1_35, %c1_36, %c0_37, %c0_38] : memref<2x4x128x16xf32, #tpu.memory_space<vmem>>, vector<1x1x128x16xf32>
    %31 = vector.shape_cast %30 : vector<1x1x128x16xf32> to vector<128x16xf32>
    %c0_39 = arith.constant 0 : index
    %c1_40 = arith.constant 1 : index
    %c0_41 = arith.constant 0 : index
    %c0_42 = arith.constant 0 : index
    %32 = vector.load %arg2[%c0_39, %c1_40, %c0_41, %c0_42] : memref<2x4x16x1xf32, #tpu.memory_space<vmem>>, vector<1x1x16x1xf32>
    %33 = vector.shape_cast %32 : vector<1x1x16x1xf32> to vector<16x1xf32>
    %c1_43 = arith.constant 1 : index
    %c1_44 = arith.constant 1 : index
    %c0_45 = arith.constant 0 : index
    %c0_46 = arith.constant 0 : index
    %34 = vector.load %arg2[%c1_43, %c1_44, %c0_45, %c0_46] : memref<2x4x16x1xf32, #tpu.memory_space<vmem>>, vector<1x1x16x1xf32>
    %35 = vector.shape_cast %34 : vector<1x1x16x1xf32> to vector<16x1xf32>
    %cst_47 = arith.constant dense<0.000000e+00> : vector<128x1xf32>
    %36 = tpu.matmul %29, %33, %cst_47 {dimension_numbers = #tpu.dot_dimension_numbers<[1], [0], [0], [1], [0, 0, 1, 1], [], []>} : vector<128x16xf32>, vector<16x1xf32>, vector<128x1xf32> -> vector<128x1xf32>
    %cst_48 = arith.constant dense<0.000000e+00> : vector<128x1xf32>
    %37 = tpu.matmul %31, %35, %cst_48 {dimension_numbers = #tpu.dot_dimension_numbers<[1], [0], [0], [1], [0, 0, 1, 1], [], []>} : vector<128x16xf32>, vector<16x1xf32>, vector<128x1xf32> -> vector<128x1xf32>
    %38 = arith.subf %36, %37 : vector<128x1xf32>
    %39 = vector.broadcast %1 : vector<1x1xf32> to vector<128x1xf32>
    %40 = arith.addf %38, %39 : vector<128x1xf32>
    %cst_49 = arith.constant dense<0.000000e+00> : vector<128x1xf32>
    %41 = tpu.matmul %31, %33, %cst_49 {dimension_numbers = #tpu.dot_dimension_numbers<[1], [0], [0], [1], [0, 0, 1, 1], [], []>} : vector<128x16xf32>, vector<16x1xf32>, vector<128x1xf32> -> vector<128x1xf32>
    %cst_50 = arith.constant dense<0.000000e+00> : vector<128x1xf32>
    %42 = tpu.matmul %29, %35, %cst_50 {dimension_numbers = #tpu.dot_dimension_numbers<[1], [0], [0], [1], [0, 0, 1, 1], [], []>} : vector<128x16xf32>, vector<16x1xf32>, vector<128x1xf32> -> vector<128x1xf32>
    %43 = arith.addf %41, %42 : vector<128x1xf32>
    %44 = vector.broadcast %3 : vector<1x1xf32> to vector<128x1xf32>
    %45 = arith.addf %43, %44 : vector<128x1xf32>
    %c0_51 = arith.constant 0 : index
    %c1_52 = arith.constant 1 : index
    %c0_53 = arith.constant 0 : index
    %c0_54 = arith.constant 0 : index
    %46 = vector.load %arg4[%c0_51, %c1_52, %c0_53, %c0_54] : memref<2x4x128x1xf32, #tpu.memory_space<vmem>>, vector<1x1x128x1xf32>
    %47 = vector.shape_cast %46 : vector<1x1x128x1xf32> to vector<128x1xf32>
    %48 = vector.shape_cast %40 : vector<128x1xf32> to vector<1x1x128x1xf32>
    tpu.vector_store %arg4[%c0_51, %c1_52, %c0_53, %c0_54], %48 {strides = array<i32>} : memref<2x4x128x1xf32, #tpu.memory_space<vmem>>, vector<1x1x128x1xf32>,
    %c1_55 = arith.constant 1 : index
    %c1_56 = arith.constant 1 : index
    %c0_57 = arith.constant 0 : index
    %c0_58 = arith.constant 0 : index
    %49 = vector.load %arg4[%c1_55, %c1_56, %c0_57, %c0_58] : memref<2x4x128x1xf32, #tpu.memory_space<vmem>>, vector<1x1x128x1xf32>
    %50 = vector.shape_cast %49 : vector<1x1x128x1xf32> to vector<128x1xf32>
    %51 = vector.shape_cast %45 : vector<128x1xf32> to vector<1x1x128x1xf32>
    tpu.vector_store %arg4[%c1_55, %c1_56, %c0_57, %c0_58], %51 {strides = array<i32>} : memref<2x4x128x1xf32, #tpu.memory_space<vmem>>, vector<1x1x128x1xf32>,
    %c0_59 = arith.constant 0 : index
    %c2 = arith.constant 2 : index
    %c0_60 = arith.constant 0 : index
    %c0_61 = arith.constant 0 : index
    %52 = vector.load %arg1[%c0_59, %c2, %c0_60, %c0_61] : memref<2x4x128x16xf32, #tpu.memory_space<vmem>>, vector<1x1x128x16xf32>
    %53 = vector.shape_cast %52 : vector<1x1x128x16xf32> to vector<128x16xf32>
    %c1_62 = arith.constant 1 : index
    %c2_63 = arith.constant 2 : index
    %c0_64 = arith.constant 0 : index
    %c0_65 = arith.constant 0 : index
    %54 = vector.load %arg1[%c1_62, %c2_63, %c0_64, %c0_65] : memref<2x4x128x16xf32, #tpu.memory_space<vmem>>, vector<1x1x128x16xf32>
    %55 = vector.shape_cast %54 : vector<1x1x128x16xf32> to vector<128x16xf32>
    %c0_66 = arith.constant 0 : index
    %c2_67 = arith.constant 2 : index
    %c0_68 = arith.constant 0 : index
    %c0_69 = arith.constant 0 : index
    %56 = vector.load %arg2[%c0_66, %c2_67, %c0_68, %c0_69] : memref<2x4x16x1xf32, #tpu.memory_space<vmem>>, vector<1x1x16x1xf32>
    %57 = vector.shape_cast %56 : vector<1x1x16x1xf32> to vector<16x1xf32>
    %c1_70 = arith.constant 1 : index
    %c2_71 = arith.constant 2 : index
    %c0_72 = arith.constant 0 : index
    %c0_73 = arith.constant 0 : index
    %58 = vector.load %arg2[%c1_70, %c2_71, %c0_72, %c0_73] : memref<2x4x16x1xf32, #tpu.memory_space<vmem>>, vector<1x1x16x1xf32>
    %59 = vector.shape_cast %58 : vector<1x1x16x1xf32> to vector<16x1xf32>
    %cst_74 = arith.constant dense<0.000000e+00> : vector<128x1xf32>
    %60 = tpu.matmul %53, %57, %cst_74 {dimension_numbers = #tpu.dot_dimension_numbers<[1], [0], [0], [1], [0, 0, 1, 1], [], []>} : vector<128x16xf32>, vector<16x1xf32>, vector<128x1xf32> -> vector<128x1xf32>
    %cst_75 = arith.constant dense<0.000000e+00> : vector<128x1xf32>
    %61 = tpu.matmul %55, %59, %cst_75 {dimension_numbers = #tpu.dot_dimension_numbers<[1], [0], [0], [1], [0, 0, 1, 1], [], []>} : vector<128x16xf32>, vector<16x1xf32>, vector<128x1xf32> -> vector<128x1xf32>
    %62 = arith.subf %60, %61 : vector<128x1xf32>
    %63 = vector.broadcast %1 : vector<1x1xf32> to vector<128x1xf32>
    %64 = arith.addf %62, %63 : vector<128x1xf32>
    %cst_76 = arith.constant dense<0.000000e+00> : vector<128x1xf32>
    %65 = tpu.matmul %55, %57, %cst_76 {dimension_numbers = #tpu.dot_dimension_numbers<[1], [0], [0], [1], [0, 0, 1, 1], [], []>} : vector<128x16xf32>, vector<16x1xf32>, vector<128x1xf32> -> vector<128x1xf32>
    %cst_77 = arith.constant dense<0.000000e+00> : vector<128x1xf32>
    %66 = tpu.matmul %53, %59, %cst_77 {dimension_numbers = #tpu.dot_dimension_numbers<[1], [0], [0], [1], [0, 0, 1, 1], [], []>} : vector<128x16xf32>, vector<16x1xf32>, vector<128x1xf32> -> vector<128x1xf32>
    %67 = arith.addf %65, %66 : vector<128x1xf32>
    %68 = vector.broadcast %3 : vector<1x1xf32> to vector<128x1xf32>
    %69 = arith.addf %67, %68 : vector<128x1xf32>
    %c0_78 = arith.constant 0 : index
    %c2_79 = arith.constant 2 : index
    %c0_80 = arith.constant 0 : index
    %c0_81 = arith.constant 0 : index
    %70 = vector.load %arg4[%c0_78, %c2_79, %c0_80, %c0_81] : memref<2x4x128x1xf32, #tpu.memory_space<vmem>>, vector<1x1x128x1xf32>
    %71 = vector.shape_cast %70 : vector<1x1x128x1xf32> to vector<128x1xf32>
    %72 = vector.shape_cast %64 : vector<128x1xf32> to vector<1x1x128x1xf32>
    tpu.vector_store %arg4[%c0_78, %c2_79, %c0_80, %c0_81], %72 {strides = array<i32>} : memref<2x4x128x1xf32, #tpu.memory_space<vmem>>, vector<1x1x128x1xf32>,
    %c1_82 = arith.constant 1 : index
    %c2_83 = arith.constant 2 : index
    %c0_84 = arith.constant 0 : index
    %c0_85 = arith.constant 0 : index
    %73 = vector.load %arg4[%c1_82, %c2_83, %c0_84, %c0_85] : memref<2x4x128x1xf32, #tpu.memory_space<vmem>>, vector<1x1x128x1xf32>
    %74 = vector.shape_cast %73 : vector<1x1x128x1xf32> to vector<128x1xf32>
    %75 = vector.shape_cast %69 : vector<128x1xf32> to vector<1x1x128x1xf32>
    tpu.vector_store %arg4[%c1_82, %c2_83, %c0_84, %c0_85], %75 {strides = array<i32>} : memref<2x4x128x1xf32, #tpu.memory_space<vmem>>, vector<1x1x128x1xf32>,
    %c0_86 = arith.constant 0 : index
    %c3 = arith.constant 3 : index
    %c0_87 = arith.constant 0 : index
    %c0_88 = arith.constant 0 : index
    %76 = vector.load %arg1[%c0_86, %c3, %c0_87, %c0_88] : memref<2x4x128x16xf32, #tpu.memory_space<vmem>>, vector<1x1x128x16xf32>
    %77 = vector.shape_cast %76 : vector<1x1x128x16xf32> to vector<128x16xf32>
    %c1_89 = arith.constant 1 : index
    %c3_90 = arith.constant 3 : index
    %c0_91 = arith.constant 0 : index
    %c0_92 = arith.constant 0 : index
    %78 = vector.load %arg1[%c1_89, %c3_90, %c0_91, %c0_92] : memref<2x4x128x16xf32, #tpu.memory_space<vmem>>, vector<1x1x128x16xf32>
    %79 = vector.shape_cast %78 : vector<1x1x128x16xf32> to vector<128x16xf32>
    %c0_93 = arith.constant 0 : index
    %c3_94 = arith.constant 3 : index
    %c0_95 = arith.constant 0 : index
    %c0_96 = arith.constant 0 : index
    %80 = vector.load %arg2[%c0_93, %c3_94, %c0_95, %c0_96] : memref<2x4x16x1xf32, #tpu.memory_space<vmem>>, vector<1x1x16x1xf32>
    %81 = vector.shape_cast %80 : vector<1x1x16x1xf32> to vector<16x1xf32>
    %c1_97 = arith.constant 1 : index
    %c3_98 = arith.constant 3 : index
    %c0_99 = arith.constant 0 : index
    %c0_100 = arith.constant 0 : index
    %82 = vector.load %arg2[%c1_97, %c3_98, %c0_99, %c0_100] : memref<2x4x16x1xf32, #tpu.memory_space<vmem>>, vector<1x1x16x1xf32>
    %83 = vector.shape_cast %82 : vector<1x1x16x1xf32> to vector<16x1xf32>
    %cst_101 = arith.constant dense<0.000000e+00> : vector<128x1xf32>
    %84 = tpu.matmul %77, %81, %cst_101 {dimension_numbers = #tpu.dot_dimension_numbers<[1], [0], [0], [1], [0, 0, 1, 1], [], []>} : vector<128x16xf32>, vector<16x1xf32>, vector<128x1xf32> -> vector<128x1xf32>
    %cst_102 = arith.constant dense<0.000000e+00> : vector<128x1xf32>
    %85 = tpu.matmul %79, %83, %cst_102 {dimension_numbers = #tpu.dot_dimension_numbers<[1], [0], [0], [1], [0, 0, 1, 1], [], []>} : vector<128x16xf32>, vector<16x1xf32>, vector<128x1xf32> -> vector<128x1xf32>
    %86 = arith.subf %84, %85 : vector<128x1xf32>
    %87 = vector.broadcast %1 : vector<1x1xf32> to vector<128x1xf32>
    %88 = arith.addf %86, %87 : vector<128x1xf32>
    %cst_103 = arith.constant dense<0.000000e+00> : vector<128x1xf32>
    %89 = tpu.matmul %79, %81, %cst_103 {dimension_numbers = #tpu.dot_dimension_numbers<[1], [0], [0], [1], [0, 0, 1, 1], [], []>} : vector<128x16xf32>, vector<16x1xf32>, vector<128x1xf32> -> vector<128x1xf32>
    %cst_104 = arith.constant dense<0.000000e+00> : vector<128x1xf32>
    %90 = tpu.matmul %77, %83, %cst_104 {dimension_numbers = #tpu.dot_dimension_numbers<[1], [0], [0], [1], [0, 0, 1, 1], [], []>} : vector<128x16xf32>, vector<16x1xf32>, vector<128x1xf32> -> vector<128x1xf32>
    %91 = arith.addf %89, %90 : vector<128x1xf32>
    %92 = vector.broadcast %3 : vector<1x1xf32> to vector<128x1xf32>
    %93 = arith.addf %91, %92 : vector<128x1xf32>
    %c0_105 = arith.constant 0 : index
    %c3_106 = arith.constant 3 : index
    %c0_107 = arith.constant 0 : index
    %c0_108 = arith.constant 0 : index
    %94 = vector.load %arg4[%c0_105, %c3_106, %c0_107, %c0_108] : memref<2x4x128x1xf32, #tpu.memory_space<vmem>>, vector<1x1x128x1xf32>
    %95 = vector.shape_cast %94 : vector<1x1x128x1xf32> to vector<128x1xf32>
    %96 = vector.shape_cast %88 : vector<128x1xf32> to vector<1x1x128x1xf32>
    tpu.vector_store %arg4[%c0_105, %c3_106, %c0_107, %c0_108], %96 {strides = array<i32>} : memref<2x4x128x1xf32, #tpu.memory_space<vmem>>, vector<1x1x128x1xf32>,
    %c1_109 = arith.constant 1 : index
    %c3_110 = arith.constant 3 : index
    %c0_111 = arith.constant 0 : index
    %c0_112 = arith.constant 0 : index
    %97 = vector.load %arg4[%c1_109, %c3_110, %c0_111, %c0_112] : memref<2x4x128x1xf32, #tpu.memory_space<vmem>>, vector<1x1x128x1xf32>
    %98 = vector.shape_cast %97 : vector<1x1x128x1xf32> to vector<128x1xf32>
    %99 = vector.shape_cast %93 : vector<128x1xf32> to vector<1x1x128x1xf32>
    tpu.vector_store %arg4[%c1_109, %c3_110, %c0_111, %c0_112], %99 {strides = array<i32>} : memref<2x4x128x1xf32, #tpu.memory_space<vmem>>, vector<1x1x128x1xf32>,
    return
  }
  func.func @transform_0(%arg0: i32) -> (i32, i32, i32, i32) {
    %c0_i32 = arith.constant 0 : i32
    %c0_i32_0 = arith.constant 0 : i32
    %c0_i32_1 = arith.constant 0 : i32
    %c0_i32_2 = arith.constant 0 : i32
    return %c0_i32, %c0_i32_0, %arg0, %c0_i32_1 : i32, i32, i32, i32
  }
  func.func @transform_1(%arg0: i32) -> (i32, i32, i32, i32) {
    %c0_i32 = arith.constant 0 : i32
    %c0_i32_0 = arith.constant 0 : i32
    %c0_i32_1 = arith.constant 0 : i32
    %c0_i32_2 = arith.constant 0 : i32
    %c0_i32_3 = arith.constant 0 : i32
    return %c0_i32, %c0_i32_0, %c0_i32_1, %c0_i32_2 : i32, i32, i32, i32
  }
  func.func @transform_2(%arg0: i32) -> (i32, i32, i32) {
    %c0_i32 = arith.constant 0 : i32
    %c0_i32_0 = arith.constant 0 : i32
    %c0_i32_1 = arith.constant 0 : i32
    %c0_i32_2 = arith.constant 0 : i32
    return %c0_i32, %c0_i32_0, %c0_i32_1 : i32, i32, i32
  }
  func.func @transform_3(%arg0: i32) -> (i32, i32, i32, i32) {
    %c0_i32 = arith.constant 0 : i32
    %c0_i32_0 = arith.constant 0 : i32
    %c0_i32_1 = arith.constant 0 : i32
    %c0_i32_2 = arith.constant 0 : i32
    return %c0_i32, %c0_i32_0, %arg0, %c0_i32_1 : i32, i32, i32, i32
  }
}

</mosaic_0001>

<bundles_post_ra>
// kernel: custom-call
= control target key start
LH: loop header
LB: loop body
LE: loop exit
PB: predicated region body
PF: predicated region fallthrough
CT: control target
= control target key end

     0   :  { %2 = vsyncpa [#allocation0], 0  ;;  %s61_s0 = inlined_call_operand.hbm [shape: c64[2,1,16,16], index: 0, kind: input, shape index: {}]   ;;  %s62_s1 = inlined_call_operand.vmem [shape: f32[2,1,16,16], index: 1, kind: output, shape index: {}]  }
   0x1   :  { %s3_s8 = sshll.u32 %s62_s1, 4  ;;  %s9_s11 = scalar_lea.hbm %s61_s0, 512  ;;  %s4_s8 = int_to_ptr.vmem [resolvable:$true] %s3_s8 }
   0x2   :  { %p10_p0 = scmp.ne.s32.totalorder %s61_s0, %s9_s11  ;;  %s11_s16 = scalar_lea.hbm %s61_s0, 1024 }
   0x3   :  { %p12_p1 = scmp.lt.u32.totalorder %s11_s16, %s9_s11  ;;  %p13_p2 = scmp.lt.u32.totalorder %s9_s11, %s61_s0 }
   0x5   :  { %p14_p3 = por %p13_p2, %p12_p1 }
   0x7   :  { %p15_p4 = pnand %p14_p3, %p10_p0 }
   0x9   :  { %18 = shalt.err (!%p15_p4)  }
   0xa   :  { %s19_s1 = scalar_lea.vmem %s4_s8, 512  ;;  %p24_p6 = scmp.lt.s32.totalorder %s4_s8, %s4_s8 }
   0xb   :  { %p20_p5 = scmp.ne.s32.totalorder %s4_s8, %s19_s1  ;;  %p25_p7 = scmp.lt.s32.totalorder %s19_s1, %s19_s1 }
   0xd   :  { %p26_p8 = por %p25_p7, %p24_p6 }
   0xf   :  { %p27_p9 = pnand %p26_p8, %p20_p5 }
  0x11   :  { %30 = shalt.err (!%p27_p9)  }
  0x12   :  { %6 = dma.hbm_to_vmem [thread:$0]  %s61_s0, 512, %s4_s8, [#allocation0] }
  0x13   :  { %31 = dma.done.wait [#allocation0], 512  }
  0x14   :  { %32 = vsyncadd [#allocation0], 4294966784 }
  0x15   :  { %8 = vsyncpa [#allocation0], 1 }

// kernel: custom-call.1
= control target key start
LH: loop header
LB: loop body
LE: loop exit
PB: predicated region body
PF: predicated region fallthrough
CT: control target
= control target key end

     0   :  { %s59_s0 = inlined_call_operand.hbm [shape: c64[2,1,16,16], index: 0, kind: input, shape index: {}]   ;;  %s60_s1 = inlined_call_operand.vmem [shape: f32[2,1,16,16], index: 1, kind: output, shape index: {}]  }
   0x1   :  { %s2_s8 = scalar_lea.hbm %s59_s0, 512 }
   0x2   :  { %3 = vsyncpa [#allocation0], 0  ;;  %s4_s11 = sshll.u32 %s60_s1, 4  ;;  %s34_s14 = scalar_lea.hbm %s59_s0, 1024  ;;  %s5_s11 = int_to_ptr.vmem [resolvable:$true] %s4_s11 }
   0x3   :  { %p11_p0 = scmp.ne.s32.totalorder %s2_s8, %s34_s14  ;;  %p13_p1 = scmp.lt.u32.totalorder %s2_s8, %s59_s0 }
   0x4   :  { %p14_p2 = scmp.lt.u32.totalorder %s34_s14, %s34_s14  ;;  %p16_p4 = scmp.lt.u32.totalorder %s34_s14, %s2_s8 }
   0x6   :  { %p15_p3 = por %p14_p2, %p13_p1 }
   0x8   :  { %p17_p5 = por %p16_p4, %p15_p3 }
   0xa   :  { %p18_p6 = pnand %p17_p5, %p11_p0 }
   0xc   :  { %21 = shalt.err (!%p18_p6)  }
   0xd   :  { %s22_s17 = scalar_lea.vmem %s5_s11, 512  ;;  %p27_p8 = scmp.lt.s32.totalorder %s5_s11, %s5_s11 }
   0xe   :  { %p23_p7 = scmp.ne.s32.totalorder %s5_s11, %s22_s17  ;;  %p28_p9 = scmp.lt.s32.totalorder %s22_s17, %s22_s17 }
  0x10   :  { %p29_p10 = por %p28_p9, %p27_p8 }
  0x12   :  { %p30_p11 = pnand %p29_p10, %p23_p7 }
  0x14   :  { %33 = shalt.err (!%p30_p11)  }
  0x15   :  { %7 = dma.hbm_to_vmem [thread:$0]  %s2_s8, 512, %s5_s11, [#allocation0] }
  0x16   :  { %35 = dma.done.wait [#allocation0], 512  }
  0x17   :  { %36 = vsyncadd [#allocation0], 4294966784 }
  0x18   :  { %9 = vsyncpa [#allocation0], 1 }

// kernel: ccnn2_forward.6
= control target key start
LH: loop header
LB: loop body
LE: loop exit
PB: predicated region body
PF: predicated region fallthrough
CT: control target
= control target key end

     0   :  { %vm104_vm0 = vcmask 1040384   ;;  %vm55_vm1 = vcmask 72704   ;;  %vm1199_vm2 = vmmov 1   ;;  %vm831_vm4 = vcmask 31744   ;;  %s1615_s1 = inlined_call_operand.vmem [shape: f32[2,1,9,4], index: 1, kind: input, shape index: {}]   ;;  %s1616_s0 = inlined_call_operand.vmem [shape: f32[2,1,128,9], index: 0, kind: input, shape index: {}]   ;;  %s1617_s2 = inlined_call_operand.vmem [shape: f32[2,1,4], index: 2, kind: input, shape index: {}]   ;;  %s1618_s3 = inlined_call_operand.vmem [shape: f32[2,1,128,4], index: 3, kind: output, shape index: {}]  }
   0x1   :  { %v50_v0 = vld [vmem:[%s1615_s1] sm:$0xff]  ;;  %v51_v1 = vld [vmem:[%s1615_s1 + $0x8] sm:$0x1]  ;;  %vm1226_vm3 = vmpackc.low %vm104_vm0, %vm1199_vm2 }
   0x2   :  { %v1158_v3 = vpack.c.bf16 %v51_v1, %v50_v0  ;;  %v886_v4 = vld [vmem:[%s1615_s1 + $0x10] sm:$0xff]  ;;  %v887_v5 = vld [vmem:[%s1615_s1 + $0x18] sm:$0x1]  ;;  %v17_v6 = vld [vmem:[%s1616_s0] sm:$0xff] }
   0x3   :  { %v1164_v7 = vpack.c.bf16 %v887_v5, %v886_v4  ;;  %1050 = vmatprep.mubr.msk.f32.mxu1 %vm55_vm1, %v17_v6  ;;  %1106 = vmatprep.mubr.msk.f32.mxu0 %vm55_vm1, %v17_v6  ;;  %v18_v8 = vld [vmem:[%s1616_s0 + $0x8] sm:$0xff]  ;;  %v19_v9 = vld [vmem:[%s1616_s0 + $0x10] sm:$0xff]  ;;  %v20_v10 = vld [vmem:[%s1616_s0 + $0x18] sm:$0xff] }
   0x4   :  { %1160 = vmatprep.subr.msk.bf16.mxu1 %vm1226_vm3, %v1158_v3  ;;  %v21_v11 = vld [vmem:[%s1616_s0 + $0x20] sm:$0xff]  ;;  %v22_v12 = vld [vmem:[%s1616_s0 + $0x28] sm:$0xff]  ;;  %v23_v13 = vld [vmem:[%s1616_s0 + $0x30] sm:$0xff] }
   0x5   :  { %1172 = vmatprep.subr.msk.bf16.mxu0 %vm1226_vm3, %v1164_v7  ;;  %1163 = vmatpush3.bf16.msk.msra.mxu1 %vm1226_vm3, %v1158_v3  ;;  %v24_v14 = vld [vmem:[%s1616_s0 + $0x38] sm:$0xff]  ;;  %v25_v15 = vld [vmem:[%s1616_s0 + $0x40] sm:$0xff]  ;;  %v26_v16 = vld [vmem:[%s1616_s0 + $0x48] sm:$0xff] }
   0x6   :  { %1175 = vmatpush3.bf16.msk.msra.mxu0 %vm1226_vm3, %v1164_v7  ;;  %1166 = vmatprep.subr.msk.bf16.mxu1 %vm1226_vm3, %v1164_v7  ;;  %v27_v17 = vld [vmem:[%s1616_s0 + $0x50] sm:$0xff]  ;;  %v28_v18 = vld [vmem:[%s1616_s0 + $0x58] sm:$0xff]  ;;  %v29_v19 = vld [vmem:[%s1616_s0 + $0x60] sm:$0xff] }
   0x7   :  { %1178 = vmatprep.subr.msk.bf16.mxu0 %vm1226_vm3, %v1158_v3  ;;  %v30_v20 = vld [vmem:[%s1616_s0 + $0x68] sm:$0xff]  ;;  %v31_v21 = vld [vmem:[%s1616_s0 + $0x70] sm:$0xff]  ;;  %v32_v22 = vld [vmem:[%s1616_s0 + $0x78] sm:$0xff] }
   0x8   :  { %1051 = vmatmul.mubr.msk.f32.vlgmr.msra.gmra.mrb[0].mxu1 %vm55_vm1, %v18_v8  ;;  %v870_v23 = vld [vmem:[%s1616_s0 + $0x80] sm:$0xff]  ;;  %v871_v24 = vld [vmem:[%s1616_s0 + $0x88] sm:$0xff]  ;;  %v872_v25 = vld [vmem:[%s1616_s0 + $0x90] sm:$0xff] }
   0x9   :  { %1107 = vmatmul.mubr.msk.f32.vlgmr.msra.gmra.mrb[0].mxu0 %vm55_vm1, %v18_v8  ;;  %1169 = vmatpush3.bf16.msk.msra.mxu1 %vm1226_vm3, %v1164_v7  ;;  %v873_v26 = vld [vmem:[%s1616_s0 + $0x98] sm:$0xff]  ;;  %v874_v27 = vld [vmem:[%s1616_s0 + $0xa0] sm:$0xff]  ;;  %v875_v28 = vld [vmem:[%s1616_s0 + $0xa8] sm:$0xff] }
   0xa   :  { %1053 = vmatprep.mubr.msk.f32.mxu1 %vm55_vm1, %v19_v9  ;;  %1109 = vmatprep.mubr.msk.f32.mxu0 %vm55_vm1, %v19_v9  ;;  %v876_v29 = vld [vmem:[%s1616_s0 + $0xb0] sm:$0xff]  ;;  %v877_v30 = vld [vmem:[%s1616_s0 + $0xb8] sm:$0xff]  ;;  %v878_v31 = vld [vmem:[%s1616_s0 + $0xc0] sm:$0xff] }
   0xb   :  { %1181 = vmatpush3.bf16.msk.msra.mxu0 %vm1226_vm3, %v1158_v3  ;;  %v879_v32 = vld [vmem:[%s1616_s0 + $0xc8] sm:$0xff]  ;;  %v880_v33 = vld [vmem:[%s1616_s0 + $0xd0] sm:$0xff]  ;;  %v881_v34 = vld [vmem:[%s1616_s0 + $0xd8] sm:$0xff] }
   0xc   :  { %1054 = vmatmul.mubr.msk.f32.gmra.mrb[2].mxu1 %vm55_vm1, %v20_v10  ;;  %v882_v35 = vld [vmem:[%s1616_s0 + $0xe0] sm:$0xff]  ;;  %v883_v36 = vld [vmem:[%s1616_s0 + $0xe8] sm:$0xff]  ;;  %v884_v37 = vld [vmem:[%s1616_s0 + $0xf0] sm:$0xff] }
   0xd   :  { %1110 = vmatmul.mubr.msk.f32.gmra.mrb[2].mxu0 %vm55_vm1, %v20_v10  ;;  %1056 = vmatprep.mubr.msk.f32.mxu1 %vm55_vm1, %v21_v11  ;;  %v885_v38 = vld [vmem:[%s1616_s0 + $0xf8] sm:$0xff]  ;;  %v1437_v55 = vld [vmem:[%s1617_s2 + $0x1] ss:$0 sm:$0xff]  ;;  %v1442_v56 = vld [vmem:[%s1617_s2] ss:$0 sm:$0xff] }
   0xe   :  { %1112 = vmatprep.mubr.msk.f32.mxu0 %vm55_vm1, %v21_v11 }
  0x10   :  { %1057 = vmatmul.mubr.msk.f32.gmra.mrb[4].mxu1 %vm55_vm1, %v22_v12 }
  0x11   :  { %1113 = vmatmul.mubr.msk.f32.gmra.mrb[4].mxu0 %vm55_vm1, %v22_v12  ;;  %1059 = vmatprep.mubr.msk.f32.mxu1 %vm55_vm1, %v23_v13 }
  0x12   :  { %1115 = vmatprep.mubr.msk.f32.mxu0 %vm55_vm1, %v23_v13 }
  0x14   :  { %1060 = vmatmul.mubr.msk.f32.gmra.mrb[6].mxu1 %vm55_vm1, %v24_v14 }
  0x15   :  { %1116 = vmatmul.mubr.msk.f32.gmra.mrb[6].mxu0 %vm55_vm1, %v24_v14  ;;  %1062 = vmatprep.mubr.msk.f32.mxu1 %vm55_vm1, %v25_v15 }
  0x16   :  { %1118 = vmatprep.mubr.msk.f32.mxu0 %vm55_vm1, %v25_v15 }
  0x18   :  { %1063 = vmatmul.mubr.msk.f32.gmra.mrb[8].mxu1 %vm55_vm1, %v26_v16 }
  0x19   :  { %1119 = vmatmul.mubr.msk.f32.gmra.mrb[8].mxu0 %vm55_vm1, %v26_v16  ;;  %1065 = vmatprep.mubr.msk.f32.mxu1 %vm55_vm1, %v27_v17 }
  0x1a   :  { %1121 = vmatprep.mubr.msk.f32.mxu0 %vm55_vm1, %v27_v17 }
  0x1c   :  { %1066 = vmatmul.mubr.msk.f32.gmra.mrb[10].mxu1 %vm55_vm1, %v28_v18 }
  0x1d   :  { %1122 = vmatmul.mubr.msk.f32.gmra.mrb[10].mxu0 %vm55_vm1, %v28_v18  ;;  %1068 = vmatprep.mubr.msk.f32.mxu1 %vm55_vm1, %v29_v19 }
  0x1e   :  { %1124 = vmatprep.mubr.msk.f32.mxu0 %vm55_vm1, %v29_v19 }
  0x20   :  { %1069 = vmatmul.mubr.msk.f32.gmra.mrb[12].mxu1 %vm55_vm1, %v30_v20 }
  0x21   :  { %1125 = vmatmul.mubr.msk.f32.gmra.mrb[12].mxu0 %vm55_vm1, %v30_v20  ;;  %1071 = vmatprep.mubr.msk.f32.mxu1 %vm55_vm1, %v31_v21 }
  0x22   :  { %1127 = vmatprep.mubr.msk.f32.mxu0 %vm55_vm1, %v31_v21 }
  0x24   :  { %1072 = vmatmul.mubr.msk.f32.gmra.mrb[14].mxu1 %vm55_vm1, %v32_v22 }
  0x25   :  { %1128 = vmatmul.mubr.msk.f32.gmra.mrb[14].mxu0 %vm55_vm1, %v32_v22  ;;  %1078 = vmatprep.mubr.msk.f32.mxu1 %vm55_vm1, %v870_v23 }
  0x26   :  { %1134 = vmatprep.mubr.msk.f32.mxu0 %vm55_vm1, %v870_v23 }
  0x28   :  { %1079 = vmatmul.mubr.msk.f32.vlgmr.msra.gmra.mrb[16].mxu1 %vm55_vm1, %v871_v24 }
  0x29   :  { %1135 = vmatmul.mubr.msk.f32.vlgmr.msra.gmra.mrb[0].mxu0 %vm55_vm1, %v871_v24  ;;  %1081 = vmatprep.mubr.msk.f32.mxu1 %vm55_vm1, %v872_v25 }
  0x2a   :  { %1137 = vmatprep.mubr.msk.f32.mxu0 %vm55_vm1, %v872_v25 }
  0x2c   :  { %1082 = vmatmul.mubr.msk.f32.gmra.mrb[18].mxu1 %vm55_vm1, %v873_v26 }
  0x2d   :  { %1138 = vmatmul.mubr.msk.f32.gmra.mrb[2].mxu0 %vm55_vm1, %v873_v26  ;;  %1084 = vmatprep.mubr.msk.f32.mxu1 %vm55_vm1, %v874_v27 }
  0x2e   :  { %1140 = vmatprep.mubr.msk.f32.mxu0 %vm55_vm1, %v874_v27 }
  0x30   :  { %1085 = vmatmul.mubr.msk.f32.gmra.mrb[20].mxu1 %vm55_vm1, %v875_v28 }
  0x31   :  { %1141 = vmatmul.mubr.msk.f32.gmra.mrb[4].mxu0 %vm55_vm1, %v875_v28  ;;  %1087 = vmatprep.mubr.msk.f32.mxu1 %vm55_vm1, %v876_v29 }
  0x32   :  { %1143 = vmatprep.mubr.msk.f32.mxu0 %vm55_vm1, %v876_v29 }
  0x34   :  { %1088 = vmatmul.mubr.msk.f32.gmra.mrb[22].mxu1 %vm55_vm1, %v877_v30 }
  0x35   :  { %1144 = vmatmul.mubr.msk.f32.gmra.mrb[6].mxu0 %vm55_vm1, %v877_v30  ;;  %1090 = vmatprep.mubr.msk.f32.mxu1 %vm55_vm1, %v878_v31 }
  0x36   :  { %1146 = vmatprep.mubr.msk.f32.mxu0 %vm55_vm1, %v878_v31 }
  0x38   :  { %1091 = vmatmul.mubr.msk.f32.gmra.mrb[24].mxu1 %vm55_vm1, %v879_v32 }
  0x39   :  { %1147 = vmatmul.mubr.msk.f32.gmra.mrb[8].mxu0 %vm55_vm1, %v879_v32  ;;  %1093 = vmatprep.mubr.msk.f32.mxu1 %vm55_vm1, %v880_v33 }
  0x3a   :  { %1149 = vmatprep.mubr.msk.f32.mxu0 %vm55_vm1, %v880_v33 }
  0x3c   :  { %1094 = vmatmul.mubr.msk.f32.gmra.mrb[26].mxu1 %vm55_vm1, %v881_v34 }
  0x3d   :  { %1150 = vmatmul.mubr.msk.f32.gmra.mrb[10].mxu0 %vm55_vm1, %v881_v34  ;;  %1096 = vmatprep.mubr.msk.f32.mxu1 %vm55_vm1, %v882_v35 }
  0x3e   :  { %1152 = vmatprep.mubr.msk.f32.mxu0 %vm55_vm1, %v882_v35 }
  0x40   :  { %1097 = vmatmul.mubr.msk.f32.gmra.mrb[28].mxu1 %vm55_vm1, %v883_v36 }
  0x41   :  { %1153 = vmatmul.mubr.msk.f32.gmra.mrb[12].mxu0 %vm55_vm1, %v883_v36  ;;  %1099 = vmatprep.mubr.msk.f32.mxu1 %vm55_vm1, %v884_v37 }
  0x42   :  { %1155 = vmatprep.mubr.msk.f32.mxu0 %vm55_vm1, %v884_v37 }
  0x44   :  { %1100 = vmatmul.mubr.msk.f32.gmra.mrb[30].mxu1 %vm55_vm1, %v885_v38 }
  0x45   :  { %1156 = vmatmul.mubr.msk.f32.gmra.mrb[14].mxu0 %vm55_vm1, %v885_v38 }
  0xdb   :  { %v1052_v39 = vpop.f32.mrb[0].mxu1 }
  0xdc   :  { %v174_v40 = vpop.f32.mrb[1].mxu1 }
  0xdf   :  { %v1055_v41 = vpop.f32.mrb[2].mxu1 }
  0xe0   :  { %v184_v42 = vpop.f32.mrb[3].mxu1 }
  0xe3   :  { %v1058_v43 = vpop.f32.mrb[4].mxu1 }
  0xe4   :  { %v1412_v44 = vpop.f32.mrb[5].mxu1 }
  0xe7   :  { %v1414_v45 = vpop.f32.mrb[6].mxu1 }
  0xe8   :  { %v1416_v46 = vpop.f32.mrb[7].mxu1 }
  0xeb   :  { %v1418_v47 = vpop.f32.mrb[8].mxu1 }
  0xec   :  { %v1420_v48 = vpop.f32.mrb[9].mxu1 }
  0xef   :  { %v1422_v49 = vpop.f32.mrb[10].mxu1 }
  0xf0   :  { %v1424_v50 = vpop.f32.mrb[11].mxu1 }
  0xf3   :  { %v1426_v51 = vpop.f32.mrb[12].mxu1 }
  0xf4   :  { %v1428_v52 = vpop.f32.mrb[13].mxu1 }
  0xf7   :  { %v1430_v53 = vpop.f32.mrb[14].mxu1 }
  0xf8   :  { %v1432_v54 = vpop.f32.mrb[15].mxu1 }
  0xfb   :  { %v1080_v57 = vpop.f32.mrb[16].mxu1 }
  0xfc   :  { %v450_v58 = vsub.f32 %v1052_v39, %v1080_v57  ;;  %v1136_v59 = vpop.f32.mrb[0].mxu0  ;;  %v370_v60 = vpop.f32.mrb[17].mxu1 }
  0xfd   :  { %v784_v61 = vadd.f32 %v1136_v59, %v1437_v55  ;;  %v449_v62 = vsub.f32 %v174_v40, %v370_v60  ;;  %v698_v63 = vpop.f32.mrb[1].mxu0 }
  0xfe   :  { %v472_v0 = vadd.f32 %v1442_v56, %v450_v58  ;;  %v783_v1 = vadd.f32 %v1437_v55, %v698_v63 }
  0xff   :  { %v816_v2 = vmax.f32 %v784_v61, 0.0  ;;  %v471_v3 = vadd.f32 %v1442_v56, %v449_v62  ;;  %v1083_v4 = vpop.f32.mrb[18].mxu1 }
 0x100   :  { %v800_v5 = vmax.f32 %v472_v0, 0.0  ;;  %v815_v6 = vmax.f32 %v783_v1, 0.0  ;;  %v452_v7 = vsub.f32 %v1055_v41, %v1083_v4  ;;  %v1139_v8 = vpop.f32.mrb[2].mxu0  ;;  %v380_v9 = vpop.f32.mrb[19].mxu1 }
 0x101   :  { %959 = vst.msk [vmem:[%s1618_s3 + $0x88] sm:$0xff] %vm831_vm4, %v816_v2  ;;  %v799_v10 = vmax.f32 %v471_v3, 0.0  ;;  %v786_v11 = vadd.f32 %v1139_v8, %v1437_v55  ;;  %v451_v12 = vsub.f32 %v184_v42, %v380_v9  ;;  %v708_v13 = vpop.f32.mrb[3].mxu0 }
 0x102   :  { %833 = vst.msk [vmem:[%s1618_s3 + $0x8] sm:$0xff] %vm831_vm4, %v800_v5  ;;  %958 = vst.msk [vmem:[%s1618_s3 + $0x80] sm:$0xff] %vm831_vm4, %v815_v6  ;;  %v474_v14 = vadd.f32 %v1442_v56, %v452_v7  ;;  %v785_v15 = vadd.f32 %v1437_v55, %v708_v13 }
 0x103   :  { %832 = vst.msk [vmem:[%s1618_s3] sm:$0xff] %vm831_vm4, %v799_v10  ;;  %v818_v16 = vmax.f32 %v786_v11, 0.0  ;;  %v473_v17 = vadd.f32 %v1442_v56, %v451_v12  ;;  %v1086_v18 = vpop.f32.mrb[20].mxu1 }
 0x104   :  { %v802_v19 = vmax.f32 %v474_v14, 0.0  ;;  %v817_v20 = vmax.f32 %v785_v15, 0.0  ;;  %v454_v21 = vsub.f32 %v1058_v43, %v1086_v18  ;;  %v1142_v22 = vpop.f32.mrb[4].mxu0  ;;  %v390_v23 = vpop.f32.mrb[21].mxu1 }
 0x105   :  { %961 = vst.msk [vmem:[%s1618_s3 + $0x98] sm:$0xff] %vm831_vm4, %v818_v16  ;;  %v801_v24 = vmax.f32 %v473_v17, 0.0  ;;  %v788_v25 = vadd.f32 %v1142_v22, %v1437_v55  ;;  %v453_v26 = vsub.f32 %v1412_v44, %v390_v23  ;;  %v718_v27 = vpop.f32.mrb[5].mxu0 }
 0x106   :  { %835 = vst.msk [vmem:[%s1618_s3 + $0x18] sm:$0xff] %vm831_vm4, %v802_v19  ;;  %960 = vst.msk [vmem:[%s1618_s3 + $0x90] sm:$0xff] %vm831_vm4, %v817_v20  ;;  %v476_v28 = vadd.f32 %v1442_v56, %v454_v21  ;;  %v787_v29 = vadd.f32 %v1437_v55, %v718_v27 }
 0x107   :  { %834 = vst.msk [vmem:[%s1618_s3 + $0x10] sm:$0xff] %vm831_vm4, %v801_v24  ;;  %v820_v30 = vmax.f32 %v788_v25, 0.0  ;;  %v475_v31 = vadd.f32 %v1442_v56, %v453_v26  ;;  %v1089_v32 = vpop.f32.mrb[22].mxu1 }
 0x108   :  { %v804_v33 = vmax.f32 %v476_v28, 0.0  ;;  %v819_v34 = vmax.f32 %v787_v29, 0.0  ;;  %v456_v35 = vsub.f32 %v1414_v45, %v1089_v32  ;;  %v1145_v36 = vpop.f32.mrb[6].mxu0  ;;  %v400_v37 = vpop.f32.mrb[23].mxu1 }
 0x109   :  { %963 = vst.msk [vmem:[%s1618_s3 + $0xa8] sm:$0xff] %vm831_vm4, %v820_v30  ;;  %v803_v38 = vmax.f32 %v475_v31, 0.0  ;;  %v790_v39 = vadd.f32 %v1145_v36, %v1437_v55  ;;  %v455_v40 = vsub.f32 %v1416_v46, %v400_v37  ;;  %v728_v41 = vpop.f32.mrb[7].mxu0 }
 0x10a   :  { %837 = vst.msk [vmem:[%s1618_s3 + $0x28] sm:$0xff] %vm831_vm4, %v804_v33  ;;  %962 = vst.msk [vmem:[%s1618_s3 + $0xa0] sm:$0xff] %vm831_vm4, %v819_v34  ;;  %v478_v42 = vadd.f32 %v1442_v56, %v456_v35  ;;  %v789_v43 = vadd.f32 %v1437_v55, %v728_v41 }
 0x10b   :  { %836 = vst.msk [vmem:[%s1618_s3 + $0x20] sm:$0xff] %vm831_vm4, %v803_v38  ;;  %v822_v44 = vmax.f32 %v790_v39, 0.0  ;;  %v477_v45 = vadd.f32 %v1442_v56, %v455_v40  ;;  %v1092_v46 = vpop.f32.mrb[24].mxu1 }
 0x10c   :  { %v806_v57 = vmax.f32 %v478_v42, 0.0  ;;  %v821_v58 = vmax.f32 %v789_v43, 0.0  ;;  %v458_v59 = vsub.f32 %v1418_v47, %v1092_v46  ;;  %v1148_v60 = vpop.f32.mrb[8].mxu0  ;;  %v410_v61 = vpop.f32.mrb[25].mxu1 }
 0x10d   :  { %965 = vst.msk [vmem:[%s1618_s3 + $0xb8] sm:$0xff] %vm831_vm4, %v822_v44  ;;  %v805_v62 = vmax.f32 %v477_v45, 0.0  ;;  %v792_v63 = vadd.f32 %v1148_v60, %v1437_v55  ;;  %v457_v0 = vsub.f32 %v1420_v48, %v410_v61  ;;  %v738_v1 = vpop.f32.mrb[9].mxu0 }
 0x10e   :  { %839 = vst.msk [vmem:[%s1618_s3 + $0x38] sm:$0xff] %vm831_vm4, %v806_v57  ;;  %964 = vst.msk [vmem:[%s1618_s3 + $0xb0] sm:$0xff] %vm831_vm4, %v821_v58  ;;  %v480_v47 = vadd.f32 %v1442_v56, %v458_v59  ;;  %v791_v2 = vadd.f32 %v1437_v55, %v738_v1 }
 0x10f   :  { %838 = vst.msk [vmem:[%s1618_s3 + $0x30] sm:$0xff] %vm831_vm4, %v805_v62  ;;  %v824_v48 = vmax.f32 %v792_v63, 0.0  ;;  %v479_v3 = vadd.f32 %v1442_v56, %v457_v0  ;;  %v1095_v4 = vpop.f32.mrb[26].mxu1 }
 0x110   :  { %v808_v5 = vmax.f32 %v480_v47, 0.0  ;;  %v823_v6 = vmax.f32 %v791_v2, 0.0  ;;  %v460_v7 = vsub.f32 %v1422_v49, %v1095_v4  ;;  %v1151_v8 = vpop.f32.mrb[10].mxu0  ;;  %v420_v9 = vpop.f32.mrb[27].mxu1 }
 0x111   :  { %967 = vst.msk [vmem:[%s1618_s3 + $0xc8] sm:$0xff] %vm831_vm4, %v824_v48  ;;  %v807_v10 = vmax.f32 %v479_v3, 0.0  ;;  %v794_v11 = vadd.f32 %v1151_v8, %v1437_v55  ;;  %v459_v12 = vsub.f32 %v1424_v50, %v420_v9  ;;  %v748_v13 = vpop.f32.mrb[11].mxu0 }
 0x112   :  { %841 = vst.msk [vmem:[%s1618_s3 + $0x48] sm:$0xff] %vm831_vm4, %v808_v5  ;;  %966 = vst.msk [vmem:[%s1618_s3 + $0xc0] sm:$0xff] %vm831_vm4, %v823_v6  ;;  %v482_v49 = vadd.f32 %v1442_v56, %v460_v7  ;;  %v793_v14 = vadd.f32 %v1437_v55, %v748_v13 }
 0x113   :  { %840 = vst.msk [vmem:[%s1618_s3 + $0x40] sm:$0xff] %vm831_vm4, %v807_v10  ;;  %v826_v50 = vmax.f32 %v794_v11, 0.0  ;;  %v481_v15 = vadd.f32 %v1442_v56, %v459_v12  ;;  %v1098_v16 = vpop.f32.mrb[28].mxu1 }
 0x114   :  { %v810_v17 = vmax.f32 %v482_v49, 0.0  ;;  %v825_v18 = vmax.f32 %v793_v14, 0.0  ;;  %v462_v19 = vsub.f32 %v1426_v51, %v1098_v16  ;;  %v1154_v20 = vpop.f32.mrb[12].mxu0  ;;  %v430_v21 = vpop.f32.mrb[29].mxu1 }
 0x115   :  { %969 = vst.msk [vmem:[%s1618_s3 + $0xd8] sm:$0xff] %vm831_vm4, %v826_v50  ;;  %v809_v22 = vmax.f32 %v481_v15, 0.0  ;;  %v796_v23 = vadd.f32 %v1154_v20, %v1437_v55  ;;  %v461_v24 = vsub.f32 %v1428_v52, %v430_v21  ;;  %v758_v25 = vpop.f32.mrb[13].mxu0 }
 0x116   :  { %843 = vst.msk [vmem:[%s1618_s3 + $0x58] sm:$0xff] %vm831_vm4, %v810_v17  ;;  %968 = vst.msk [vmem:[%s1618_s3 + $0xd0] sm:$0xff] %vm831_vm4, %v825_v18  ;;  %v484_v51 = vadd.f32 %v1442_v56, %v462_v19  ;;  %v795_v26 = vadd.f32 %v1437_v55, %v758_v25 }
 0x117   :  { %842 = vst.msk [vmem:[%s1618_s3 + $0x50] sm:$0xff] %vm831_vm4, %v809_v22  ;;  %v828_v52 = vmax.f32 %v796_v23, 0.0  ;;  %v483_v27 = vadd.f32 %v1442_v56, %v461_v24  ;;  %v1101_v28 = vpop.f32.mrb[30].mxu1 }
 0x118   :  { %v812_v29 = vmax.f32 %v484_v51, 0.0  ;;  %v827_v30 = vmax.f32 %v795_v26, 0.0  ;;  %v464_v31 = vsub.f32 %v1430_v53, %v1101_v28  ;;  %v1157_v32 = vpop.f32.mrb[14].mxu0  ;;  %v440_v33 = vpop.f32.mrb[31].mxu1 }
 0x119   :  { %971 = vst.msk [vmem:[%s1618_s3 + $0xe8] sm:$0xff] %vm831_vm4, %v828_v52  ;;  %v811_v34 = vmax.f32 %v483_v27, 0.0  ;;  %v798_v35 = vadd.f32 %v1157_v32, %v1437_v55  ;;  %v463_v36 = vsub.f32 %v1432_v54, %v440_v33  ;;  %v768_v37 = vpop.f32.mrb[15].mxu0 }
 0x11a   :  { %845 = vst.msk [vmem:[%s1618_s3 + $0x68] sm:$0xff] %vm831_vm4, %v812_v29  ;;  %970 = vst.msk [vmem:[%s1618_s3 + $0xe0] sm:$0xff] %vm831_vm4, %v827_v30  ;;  %v486_v53 = vadd.f32 %v1442_v56, %v464_v31  ;;  %v797_v38 = vadd.f32 %v1437_v55, %v768_v37 }
 0x11b   :  { %844 = vst.msk [vmem:[%s1618_s3 + $0x60] sm:$0xff] %vm831_vm4, %v811_v34  ;;  %v830_v54 = vmax.f32 %v798_v35, 0.0  ;;  %v485_v39 = vadd.f32 %v1442_v56, %v463_v36 }
 0x11c   :  { %v814_v40 = vmax.f32 %v486_v53, 0.0  ;;  %v829_v41 = vmax.f32 %v797_v38, 0.0 }
 0x11d   :  { %973 = vst.msk [vmem:[%s1618_s3 + $0xf8] sm:$0xff] %vm831_vm4, %v830_v54  ;;  %v813_v42 = vmax.f32 %v485_v39, 0.0 }
 0x11e   :  { %847 = vst.msk [vmem:[%s1618_s3 + $0x78] sm:$0xff] %vm831_vm4, %v814_v40  ;;  %972 = vst.msk [vmem:[%s1618_s3 + $0xf0] sm:$0xff] %vm831_vm4, %v829_v41 }
 0x11f   :  { %846 = vst.msk [vmem:[%s1618_s3 + $0x70] sm:$0xff] %vm831_vm4, %v813_v42 }

// kernel: ccnn2_forward.7
= control target key start
LH: loop header
LB: loop body
LE: loop exit
PB: predicated region body
PF: predicated region fallthrough
CT: control target
= control target key end

     0   :  { %vm37_vm0 = vcmask 293888   ;;  %vm50_vm1 = vcmask 1043456   ;;  %vm441_vm2 = vcmask 64512   ;;  %s763_s1 = inlined_call_operand.vmem [shape: f32[2,1,36,8], index: 1, kind: input, shape index: {}]   ;;  %s764_s0 = inlined_call_operand.vmem [shape: f32[2,1,32,36], index: 0, kind: input, shape index: {}]   ;;  %s765_s2 = inlined_call_operand.vmem [shape: f32[2,1,8], index: 2, kind: input, shape index: {}]   ;;  %s766_s3 = inlined_call_operand.vmem [shape: f32[2,1,32,8], index: 3, kind: output, shape index: {}]  }
   0x1   :  { %v26_v0 = vld [vmem:[%s763_s1] sm:$0xff]  ;;  %v27_v1 = vld [vmem:[%s763_s1 + $0x8] sm:$0xff]  ;;  %v461_v4 = vld [vmem:[%s763_s1 + $0x30] sm:$0xff] }
   0x2   :  { %v460_v2 = vld [vmem:[%s763_s1 + $0x28] sm:$0xff]  ;;  %v591_v3 = vpack.c.bf16 %v27_v1, %v26_v0  ;;  %v28_v5 = vld [vmem:[%s763_s1 + $0x10] sm:$0xff]  ;;  %v29_v6 = vld [vmem:[%s763_s1 + $0x18] sm:$0xff] }
   0x3   :  { %v599_v7 = vpack.c.bf16 %v461_v4, %v460_v2  ;;  %v595_v8 = vpack.c.bf16 %v29_v6, %v28_v5  ;;  %v462_v9 = vld [vmem:[%s763_s1 + $0x38] sm:$0xff]  ;;  %v463_v10 = vld [vmem:[%s763_s1 + $0x40] sm:$0xff]  ;;  %v464_v14 = vld [vmem:[%s763_s1 + $0x48] sm:$0xf] }
   0x4   :  { %592 = vmatprep.subr.bf16.mxu1 %v591_v3  ;;  %v603_v11 = vpack.c.bf16 %v463_v10, %v462_v9  ;;  %v17_v12 = vld [vmem:[%s764_s0] sm:$0xff]  ;;  %v18_v15 = vld [vmem:[%s764_s0 + $0x8] sm:$0xff]  ;;  %v19_v16 = vld [vmem:[%s764_s0 + $0x10] sm:$0xff] }
   0x5   :  { %608 = vmatprep.subr.bf16.mxu0 %v599_v7  ;;  %594 = vmatpush3.bf16.msra.mxu1 %v591_v3  ;;  %v30_v13 = vld [vmem:[%s763_s1 + $0x20] sm:$0xf]  ;;  %v20_v17 = vld [vmem:[%s764_s0 + $0x18] sm:$0xff]  ;;  %v457_v19 = vld [vmem:[%s764_s0 + $0x28] sm:$0xff] }
   0x6   :  { %610 = vmatpush3.bf16.msra.mxu0 %v599_v7  ;;  %596 = vmatprep.subr.bf16.mxu1 %v595_v8  ;;  %v456_v18 = vld [vmem:[%s764_s0 + $0x20] sm:$0xff]  ;;  %v458_v20 = vld [vmem:[%s764_s0 + $0x30] sm:$0xff]  ;;  %v459_v21 = vld [vmem:[%s764_s0 + $0x38] sm:$0xff] }
   0x7   :  { %612 = vmatprep.subr.bf16.mxu0 %v603_v11  ;;  %537 = vmatprep.mubr.msk.f32.mxu1 %vm37_vm0, %v17_v12  ;;  %v486_v26 = vld [vmem:[%s765_s2 + $0x1] ss:$0 sm:$0xff]  ;;  %v475_v27 = vld [vmem:[%s765_s2] ss:$0 sm:$0xff] }
   0x8   :  { %569 = vmatprep.mubr.msk.f32.mxu0 %vm37_vm0, %v17_v12 }
   0x9   :  { %598 = vmatpush3.bf16.msra.mxu1 %v595_v8 }
   0xa   :  { %614 = vmatpush3.bf16.msra.mxu0 %v603_v11  ;;  %535 = vmatprep.subr.msk.mxu1 %vm50_vm1, %v30_v13 }
   0xb   :  { %567 = vmatprep.subr.msk.mxu0 %vm50_vm1, %v464_v14 }
   0xd   :  { %536 = vmatpush3.msk.msra.mxu1 %vm50_vm1, %v30_v13 }
   0xe   :  { %568 = vmatpush3.msk.msra.mxu0 %vm50_vm1, %v464_v14  ;;  %538 = vmatmul.mubr.msk.f32.vlgmr.msra.gmra.mrb[0].mxu1 %vm37_vm0, %v18_v15 }
   0xf   :  { %600 = vmatprep.subr.bf16.mxu1 %v599_v7  ;;  %616 = vmatprep.subr.bf16.mxu0 %v591_v3 }
  0x10   :  { %602 = vmatpush3.bf16.msra.mxu1 %v599_v7  ;;  %570 = vmatmul.mubr.msk.f32.vlgmr.msra.gmra.mrb[0].mxu0 %vm37_vm0, %v18_v15 }
  0x11   :  { %618 = vmatpush3.bf16.msra.mxu0 %v591_v3  ;;  %604 = vmatprep.subr.bf16.mxu1 %v603_v11 }
  0x12   :  { %620 = vmatprep.subr.bf16.mxu0 %v595_v8  ;;  %540 = vmatprep.mubr.msk.f32.mxu1 %vm37_vm0, %v19_v16 }
  0x13   :  { %572 = vmatprep.mubr.msk.f32.mxu0 %vm37_vm0, %v19_v16  ;;  %541 = vmatmul.mubr.msk.f32.gmra.mrb[2].mxu1 %vm37_vm0, %v20_v17 }
  0x14   :  { %606 = vmatpush3.bf16.msra.mxu1 %v603_v11  ;;  %573 = vmatmul.mubr.msk.f32.gmra.mrb[2].mxu0 %vm37_vm0, %v20_v17 }
  0x15   :  { %622 = vmatpush3.bf16.msra.mxu0 %v595_v8  ;;  %551 = vmatprep.subr.msk.mxu1 %vm50_vm1, %v464_v14 }
  0x16   :  { %583 = vmatprep.subr.msk.mxu0 %vm50_vm1, %v30_v13  ;;  %553 = vmatprep.mubr.msk.f32.mxu1 %vm37_vm0, %v456_v18 }
  0x17   :  { %585 = vmatprep.mubr.msk.f32.mxu0 %vm37_vm0, %v456_v18 }
  0x18   :  { %552 = vmatpush3.msk.msra.mxu1 %vm50_vm1, %v464_v14 }
  0x19   :  { %584 = vmatpush3.msk.msra.mxu0 %vm50_vm1, %v30_v13  ;;  %554 = vmatmul.mubr.msk.f32.vlgmr.msra.gmra.mrb[4].mxu1 %vm37_vm0, %v457_v19 }
  0x1a   :  { %586 = vmatmul.mubr.msk.f32.vlgmr.msra.gmra.mrb[0].mxu0 %vm37_vm0, %v457_v19  ;;  %556 = vmatprep.mubr.msk.f32.mxu1 %vm37_vm0, %v458_v20 }
  0x1b   :  { %588 = vmatprep.mubr.msk.f32.mxu0 %vm37_vm0, %v458_v20 }
  0x1d   :  { %557 = vmatmul.mubr.msk.f32.gmra.mrb[6].mxu1 %vm37_vm0, %v459_v21 }
  0x1e   :  { %589 = vmatmul.mubr.msk.f32.gmra.mrb[2].mxu0 %vm37_vm0, %v459_v21 }
  0xe1   :  { %v539_v22 = vpop.f32.mrb[0].mxu1 }
  0xe2   :  { %v120_v23 = vpop.f32.mrb[1].mxu1 }
  0xe6   :  { %v542_v24 = vpop.f32.mrb[2].mxu1 }
  0xe7   :  { %v130_v25 = vpop.f32.mrb[3].mxu1 }
  0xec   :  { %v555_v28 = vpop.f32.mrb[4].mxu1 }
  0xed   :  { %v240_v29 = vsub.f32 %v539_v22, %v555_v28  ;;  %v587_v30 = vpop.f32.mrb[0].mxu0  ;;  %v220_v31 = vpop.f32.mrb[5].mxu1 }
  0xee   :  { %v430_v32 = vadd.f32 %v587_v30, %v486_v26  ;;  %v239_v33 = vsub.f32 %v120_v23, %v220_v31  ;;  %v404_v34 = vpop.f32.mrb[1].mxu0 }
  0xef   :  { %v250_v35 = vadd.f32 %v475_v27, %v240_v29  ;;  %v429_v36 = vadd.f32 %v486_v26, %v404_v34 }
  0xf0   :  { %v438_v37 = vmax.f32 %v430_v32, 0.0  ;;  %v249_v38 = vadd.f32 %v475_v27, %v239_v33  ;;  %v558_v39 = vpop.f32.mrb[6].mxu1 }
  0xf1   :  { %v434_v40 = vmax.f32 %v250_v35, 0.0  ;;  %v437_v41 = vmax.f32 %v429_v36, 0.0  ;;  %v242_v42 = vsub.f32 %v542_v24, %v558_v39  ;;  %v590_v43 = vpop.f32.mrb[2].mxu0  ;;  %v230_v44 = vpop.f32.mrb[7].mxu1 }
  0xf2   :  { %488 = vst.msk [vmem:[%s766_s3 + $0x28] sm:$0xff] %vm441_vm2, %v438_v37  ;;  %v433_v45 = vmax.f32 %v249_v38, 0.0  ;;  %v432_v46 = vadd.f32 %v590_v43, %v486_v26  ;;  %v241_v47 = vsub.f32 %v130_v25, %v230_v44  ;;  %v414_v48 = vpop.f32.mrb[3].mxu0 }
  0xf3   :  { %443 = vst.msk [vmem:[%s766_s3 + $0x8] sm:$0xff] %vm441_vm2, %v434_v40  ;;  %487 = vst.msk [vmem:[%s766_s3 + $0x20] sm:$0xff] %vm441_vm2, %v437_v41  ;;  %v252_v49 = vadd.f32 %v475_v27, %v242_v42  ;;  %v431_v50 = vadd.f32 %v486_v26, %v414_v48 }
  0xf4   :  { %442 = vst.msk [vmem:[%s766_s3] sm:$0xff] %vm441_vm2, %v433_v45  ;;  %v440_v51 = vmax.f32 %v432_v46, 0.0  ;;  %v251_v52 = vadd.f32 %v475_v27, %v241_v47 }
  0xf5   :  { %v436_v53 = vmax.f32 %v252_v49, 0.0  ;;  %v439_v54 = vmax.f32 %v431_v50, 0.0 }
  0xf6   :  { %490 = vst.msk [vmem:[%s766_s3 + $0x38] sm:$0xff] %vm441_vm2, %v440_v51  ;;  %v435_v55 = vmax.f32 %v251_v52, 0.0 }
  0xf7   :  { %445 = vst.msk [vmem:[%s766_s3 + $0x18] sm:$0xff] %vm441_vm2, %v436_v53  ;;  %489 = vst.msk [vmem:[%s766_s3 + $0x30] sm:$0xff] %vm441_vm2, %v439_v54 }
  0xf8   :  { %444 = vst.msk [vmem:[%s766_s3 + $0x10] sm:$0xff] %vm441_vm2, %v435_v55 }

// kernel: ccnn2_forward.8
= control target key start
LH: loop header
LB: loop body
LE: loop exit
PB: predicated region body
PF: predicated region fallthrough
CT: control target
= control target key end

     0   :  { %v544_v0 = vmov 0.0|0.0   ;;  %vm545_vm0 = vmmov 0   ;;  %v546_v8 = vmov 0.0   ;;  %vm39_vm1 = vcmask 588800   ;;  %s671_s1 = inlined_call_operand.vmem [shape: f32[2,1,72,16], index: 1, kind: input, shape index: {}]   ;;  %s672_s0 = inlined_call_operand.vmem [shape: f32[2,1,8,72], index: 0, kind: input, shape index: {}]   ;;  %s673_s2 = inlined_call_operand.vmem [shape: f32[2,1,16], index: 2, kind: input, shape index: {}]   ;;  %s674_s3 = inlined_call_operand.vmem [shape: f32[2,1,8,16], index: 3, kind: output, shape index: {}]  }
   0x1   :  { %493 = vmatprep.subr.bf16.mxu0 %v544_v0  ;;  %505 = vmatprep.subr.bf16.mxu1 %v544_v0  ;;  %v20_v1 = vld [vmem:[%s671_s1] sm:$0xff]  ;;  %v21_v2 = vld [vmem:[%s671_s1 + $0x8] sm:$0xff]  ;;  %v354_v5 = vld [vmem:[%s671_s1 + $0x50] sm:$0xff]  ;;  %vm343_vm2 = vcmask 130048  }
   0x2   :  { %v353_v3 = vld [vmem:[%s671_s1 + $0x48] sm:$0xff]  ;;  %v494_v4 = vpack.c.bf16 %v21_v2, %v20_v1  ;;  %v22_v6 = vld [vmem:[%s671_s1 + $0x10] sm:$0xff]  ;;  %v23_v7 = vld [vmem:[%s671_s1 + $0x18] sm:$0xff]  ;;  %427 = vmatprep.mubr.msk.f32.mxu0 %vm545_vm0, %v546_v8  ;;  %448 = vmatprep.mubr.msk.f32.mxu1 %vm545_vm0, %v546_v8 }
   0x3   :  { %v506_v9 = vpack.c.bf16 %v354_v5, %v353_v3  ;;  %v355_v10 = vld [vmem:[%s671_s1 + $0x58] sm:$0xff]  ;;  %v356_v11 = vld [vmem:[%s671_s1 + $0x60] sm:$0xff]  ;;  %v497_v12 = vpack.c.bf16 %v23_v7, %v22_v6  ;;  %v25_v15 = vld [vmem:[%s671_s1 + $0x28] sm:$0xff] }
   0x4   :  { %495 = vmatpush3.bf16.msra.mxu0 %v494_v4  ;;  %v509_v13 = vpack.c.bf16 %v356_v11, %v355_v10  ;;  %v24_v14 = vld [vmem:[%s671_s1 + $0x20] sm:$0xff]  ;;  %v357_v16 = vld [vmem:[%s671_s1 + $0x68] sm:$0xff]  ;;  %v358_v17 = vld [vmem:[%s671_s1 + $0x70] sm:$0xff] }
   0x5   :  { %507 = vmatpush3.bf16.msra.mxu1 %v506_v9  ;;  %496 = vmatprep.subr.bf16.mxu0 %v544_v0  ;;  %v500_v18 = vpack.c.bf16 %v25_v15, %v24_v14  ;;  %v512_v19 = vpack.c.bf16 %v358_v17, %v357_v16  ;;  %v26_v20 = vld [vmem:[%s671_s1 + $0x30] sm:$0xff]  ;;  %v27_v21 = vld [vmem:[%s671_s1 + $0x38] sm:$0xff]  ;;  %v360_v23 = vld [vmem:[%s671_s1 + $0x80] sm:$0xff] }
   0x6   :  { %508 = vmatprep.subr.bf16.mxu1 %v544_v0  ;;  %v359_v22 = vld [vmem:[%s671_s1 + $0x78] sm:$0xff]  ;;  %v503_v24 = vpack.c.bf16 %v27_v21, %v26_v20  ;;  %v28_v26 = vld [vmem:[%s671_s1 + $0x40] sm:$0xff]  ;;  %v361_v27 = vld [vmem:[%s671_s1 + $0x88] sm:$0xff] }
   0x7   :  { %v515_v25 = vpack.c.bf16 %v360_v23, %v359_v22  ;;  %v17_v28 = vld [vmem:[%s672_s0] sm:$0xff]  ;;  %v352_v29 = vld [vmem:[%s672_s0 + $0x8] sm:$0xff] }
   0x8   :  { %498 = vmatpush3.bf16.msra.mxu0 %v497_v12  ;;  %v364_v31 = vld [vmem:[%s673_s2] ss:$0 sm:$0xff]  ;;  %v367_v39 = vld [vmem:[%s673_s2 + $0x1] ss:$0 sm:$0xff] }
   0x9   :  { %510 = vmatpush3.bf16.msra.mxu1 %v509_v13  ;;  %499 = vmatprep.subr.bf16.mxu0 %v544_v0 }
   0xa   :  { %511 = vmatprep.subr.bf16.mxu1 %v544_v0 }
   0xc   :  { %501 = vmatpush3.bf16.msra.mxu0 %v500_v18 }
   0xd   :  { %513 = vmatpush3.bf16.msra.mxu1 %v512_v19  ;;  %502 = vmatprep.subr.bf16.mxu0 %v544_v0 }
   0xe   :  { %514 = vmatprep.subr.bf16.mxu1 %v544_v0 }
  0x10   :  { %504 = vmatpush3.bf16.msra.mxu0 %v503_v24 }
  0x11   :  { %516 = vmatpush3.bf16.msra.mxu1 %v515_v25  ;;  %425 = vmatprep.subr.mxu0 %v546_v8 }
  0x12   :  { %446 = vmatprep.subr.mxu1 %v546_v8 }
  0x14   :  { %426 = vmatpush3.msra.mxu0 %v28_v26 }
  0x15   :  { %447 = vmatpush3.msra.mxu1 %v361_v27  ;;  %428 = vmatmul.mubr.msk.f32.vlgmr.msra.gmra.mrb[0].mxu0 %vm39_vm1, %v17_v28 }
  0x16   :  { %449 = vmatmul.mubr.msk.f32.vlgmr.msra.gmra.mrb[0].mxu1 %vm39_vm1, %v352_v29  ;;  %517 = vmatprep.subr.bf16.mxu0 %v544_v0 }
  0x17   :  { %529 = vmatprep.subr.bf16.mxu1 %v544_v0  ;;  %519 = vmatpush3.bf16.msra.mxu0 %v506_v9 }
  0x18   :  { %531 = vmatpush3.bf16.msra.mxu1 %v494_v4  ;;  %520 = vmatprep.subr.bf16.mxu0 %v544_v0 }
  0x19   :  { %532 = vmatprep.subr.bf16.mxu1 %v544_v0  ;;  %469 = vmatprep.mubr.msk.f32.mxu0 %vm545_vm0, %v546_v8 }
  0x1a   :  { %490 = vmatprep.mubr.msk.f32.mxu1 %vm545_vm0, %v546_v8 }
  0x1b   :  { %522 = vmatpush3.bf16.msra.mxu0 %v509_v13 }
  0x1c   :  { %534 = vmatpush3.bf16.msra.mxu1 %v497_v12  ;;  %523 = vmatprep.subr.bf16.mxu0 %v544_v0 }
  0x1d   :  { %535 = vmatprep.subr.bf16.mxu1 %v544_v0 }
  0x1f   :  { %525 = vmatpush3.bf16.msra.mxu0 %v512_v19 }
  0x20   :  { %537 = vmatpush3.bf16.msra.mxu1 %v500_v18  ;;  %526 = vmatprep.subr.bf16.mxu0 %v544_v0 }
  0x21   :  { %538 = vmatprep.subr.bf16.mxu1 %v544_v0 }
  0x23   :  { %528 = vmatpush3.bf16.msra.mxu0 %v515_v25 }
  0x24   :  { %540 = vmatpush3.bf16.msra.mxu1 %v503_v24  ;;  %467 = vmatprep.subr.mxu0 %v546_v8 }
  0x25   :  { %488 = vmatprep.subr.mxu1 %v546_v8 }
  0x27   :  { %468 = vmatpush3.msra.mxu0 %v361_v27 }
  0x28   :  { %489 = vmatpush3.msra.mxu1 %v28_v26  ;;  %470 = vmatmul.mubr.msk.f32.vlgmr.msra.gmra.mrb[2].mxu0 %vm39_vm1, %v17_v28 }
  0x29   :  { %491 = vmatmul.mubr.msk.f32.vlgmr.msra.gmra.mrb[2].mxu1 %vm39_vm1, %v352_v29 }
  0xe8   :  { %v109_v30 = vpop.f32.mrb[0].mxu0 }
  0xe9   :  { %v182_v32 = vpop.f32.mrb[0].mxu1  ;;  %v429_v33 = vpop.f32.mrb[1].mxu0 }
  0xea   :  { %v186_v34 = vsub.f32 %v109_v30, %v182_v32  ;;  %v450_v35 = vpop.f32.mrb[1].mxu1 }
  0xec   :  { %v193_v36 = vadd.f32 %v364_v31, %v186_v34 }
  0xee   :  { %v341_v37 = vmax.f32 %v193_v36, 0.0 }
  0xf0   :  { %344 = vst.msk [vmem:[%s674_s3] sm:$0xff] %vm343_vm2, %v341_v37 }
  0xfb   :  { %v260_v38 = vpop.f32.mrb[2].mxu0 }
  0xfc   :  { %v330_v40 = vpop.f32.mrb[2].mxu1  ;;  %v471_v41 = vpop.f32.mrb[3].mxu0 }
  0xfd   :  { %v331_v42 = vadd.f32 %v330_v40, %v260_v38  ;;  %v492_v43 = vpop.f32.mrb[3].mxu1 }
  0xff   :  { %v340_v44 = vadd.f32 %v367_v39, %v331_v42 }
 0x101   :  { %v342_v45 = vmax.f32 %v340_v44, 0.0 }
 0x103   :  { %368 = vst.msk [vmem:[%s674_s3 + $0x8] sm:$0xff] %vm343_vm2, %v342_v45 }

// kernel: ccnn2_forward.9
= control target key start
LH: loop header
LB: loop body
LE: loop exit
PB: predicated region body
PF: predicated region fallthrough
CT: control target
= control target key end

     0   :  { %v2065_v0 = vmov 0.0|0.0   ;;  %vm2066_vm0 = vmmov 0   ;;  %v2067_v8 = vmov 0.0   ;;  %vm40_vm1 = vcmask 523264   ;;  %s2495_s1 = inlined_call_operand.vmem [shape: f32[2,4,64,8], index: 1, kind: input, shape index: {}]   ;;  %s2496_s0 = inlined_call_operand.vmem [shape: f32[2,4,8,64], index: 0, kind: input, shape index: {}]   ;;  %s2497_s2 = inlined_call_operand.vmem [shape: f32[2,1,8], index: 2, kind: input, shape index: {}]   ;;  %s2498_s3 = inlined_call_operand.vmem [shape: f32[2,4,8,8], index: 3, kind: input, shape index: {}]   ;;  %s2499_s4 = inlined_call_operand.vmem [shape: f32[2,4,8,8], index: 4, kind: output, shape index: {}]  }
   0x1   :  { %1870 = vmatprep.subr.bf16.mxu0 %v2065_v0  ;;  %1882 = vmatprep.subr.bf16.mxu1 %v2065_v0  ;;  %v23_v1 = vld [vmem:[%s2495_s1] sm:$0xff]  ;;  %v24_v2 = vld [vmem:[%s2495_s1 + $0x8] sm:$0xff]  ;;  %v25_v6 = vld [vmem:[%s2495_s1 + $0x10] sm:$0xff]  ;;  %vm349_vm2 = vcmask 64512  }
   0x2   :  { %v1328_v3 = vld [vmem:[%s2495_s1 + $0x100] sm:$0xff]  ;;  %v1871_v4 = vpack.c.bf16 %v24_v2, %v23_v1  ;;  %v1329_v5 = vld [vmem:[%s2495_s1 + $0x108] sm:$0xff]  ;;  %v26_v7 = vld [vmem:[%s2495_s1 + $0x18] sm:$0xff]  ;;  %1582 = vmatprep.mubr.msk.f32.mxu0 %vm2066_vm0, %v2067_v8  ;;  %1601 = vmatprep.mubr.msk.f32.mxu1 %vm2066_vm0, %v2067_v8 }
   0x3   :  { %v1883_v9 = vpack.c.bf16 %v1329_v5, %v1328_v3  ;;  %v1330_v10 = vld [vmem:[%s2495_s1 + $0x110] sm:$0xff]  ;;  %v1331_v11 = vld [vmem:[%s2495_s1 + $0x118] sm:$0xff]  ;;  %v1874_v12 = vpack.c.bf16 %v26_v7, %v25_v6  ;;  %v27_v14 = vld [vmem:[%s2495_s1 + $0x20] sm:$0xff] }
   0x4   :  { %1872 = vmatpush3.bf16.msra.mxu0 %v1871_v4  ;;  %v1886_v13 = vpack.c.bf16 %v1331_v11, %v1330_v10  ;;  %v28_v15 = vld [vmem:[%s2495_s1 + $0x28] sm:$0xff]  ;;  %v1332_v16 = vld [vmem:[%s2495_s1 + $0x120] sm:$0xff]  ;;  %v29_v20 = vld [vmem:[%s2495_s1 + $0x30] sm:$0xff] }
   0x5   :  { %1884 = vmatpush3.bf16.msra.mxu1 %v1883_v9  ;;  %1873 = vmatprep.subr.bf16.mxu0 %v2065_v0  ;;  %v1333_v17 = vld [vmem:[%s2495_s1 + $0x128] sm:$0xff]  ;;  %v1877_v18 = vpack.c.bf16 %v28_v15, %v27_v14  ;;  %v30_v21 = vld [vmem:[%s2495_s1 + $0x38] sm:$0xff]  ;;  %v1334_v22 = vld [vmem:[%s2495_s1 + $0x130] sm:$0xff] }
   0x6   :  { %1885 = vmatprep.subr.bf16.mxu1 %v2065_v0  ;;  %v1889_v19 = vpack.c.bf16 %v1333_v17, %v1332_v16  ;;  %v1335_v23 = vld [vmem:[%s2495_s1 + $0x138] sm:$0xff]  ;;  %v1880_v24 = vpack.c.bf16 %v30_v21, %v29_v20  ;;  %v20_v26 = vld [vmem:[%s2496_s0] sm:$0xff]  ;;  %v1347_v29 = vld [vmem:[%s2495_s1 + $0x48] sm:$0xff] }
   0x7   :  { %v1892_v25 = vpack.c.bf16 %v1335_v23, %v1334_v22  ;;  %v1327_v27 = vld [vmem:[%s2496_s0 + $0x20] sm:$0xff]  ;;  %v1355_v31 = vld [vmem:[%s2495_s1 + $0x148] sm:$0xff]  ;;  %v1348_v34 = vld [vmem:[%s2495_s1 + $0x50] sm:$0xff] }
   0x8   :  { %1875 = vmatpush3.bf16.msra.mxu0 %v1874_v12  ;;  %v1346_v28 = vld [vmem:[%s2495_s1 + $0x40] sm:$0xff]  ;;  %v1349_v35 = vld [vmem:[%s2495_s1 + $0x58] sm:$0xff]  ;;  %v1356_v36 = vld [vmem:[%s2495_s1 + $0x150] sm:$0xff] }
   0x9   :  { %1887 = vmatpush3.bf16.msra.mxu1 %v1886_v13  ;;  %1876 = vmatprep.subr.bf16.mxu0 %v2065_v0  ;;  %v1354_v30 = vld [vmem:[%s2495_s1 + $0x140] sm:$0xff]  ;;  %v1919_v32 = vpack.c.bf16 %v1347_v29, %v1346_v28  ;;  %v1357_v37 = vld [vmem:[%s2495_s1 + $0x158] sm:$0xff]  ;;  %v1922_v38 = vpack.c.bf16 %v1349_v35, %v1348_v34  ;;  %v1351_v41 = vld [vmem:[%s2495_s1 + $0x68] sm:$0xff] }
   0xa   :  { %1888 = vmatprep.subr.bf16.mxu1 %v2065_v0  ;;  %v1931_v33 = vpack.c.bf16 %v1355_v31, %v1354_v30  ;;  %v1934_v39 = vpack.c.bf16 %v1357_v37, %v1356_v36  ;;  %v1350_v40 = vld [vmem:[%s2495_s1 + $0x60] sm:$0xff]  ;;  %v1359_v43 = vld [vmem:[%s2495_s1 + $0x168] sm:$0xff]  ;;  %v1352_v46 = vld [vmem:[%s2495_s1 + $0x70] sm:$0xff] }
   0xb   :  { %v1358_v42 = vld [vmem:[%s2495_s1 + $0x160] sm:$0xff]  ;;  %v1925_v44 = vpack.c.bf16 %v1351_v41, %v1350_v40  ;;  %v1353_v47 = vld [vmem:[%s2495_s1 + $0x78] sm:$0xff]  ;;  %v1360_v48 = vld [vmem:[%s2495_s1 + $0x170] sm:$0xff] }
   0xc   :  { %1878 = vmatpush3.bf16.msra.mxu0 %v1877_v18  ;;  %v1937_v45 = vpack.c.bf16 %v1359_v43, %v1358_v42  ;;  %v1361_v49 = vld [vmem:[%s2495_s1 + $0x178] sm:$0xff]  ;;  %v1928_v50 = vpack.c.bf16 %v1353_v47, %v1352_v46  ;;  %v1344_v52 = vld [vmem:[%s2496_s0 + $0x8] sm:$0xff]  ;;  %v1372_v54 = vld [vmem:[%s2495_s1 + $0x80] sm:$0xff] }
   0xd   :  { %1890 = vmatpush3.bf16.msra.mxu1 %v1889_v19  ;;  %1879 = vmatprep.subr.bf16.mxu0 %v2065_v0  ;;  %v1940_v51 = vpack.c.bf16 %v1361_v49, %v1360_v48  ;;  %v1345_v53 = vld [vmem:[%s2496_s0 + $0x28] sm:$0xff]  ;;  %v1380_v56 = vld [vmem:[%s2495_s1 + $0x180] sm:$0xff]  ;;  %v1374_v60 = vld [vmem:[%s2495_s1 + $0x90] sm:$0xff] }
   0xe   :  { %1891 = vmatprep.subr.bf16.mxu1 %v2065_v0  ;;  %v1373_v55 = vld [vmem:[%s2495_s1 + $0x88] sm:$0xff]  ;;  %v1375_v61 = vld [vmem:[%s2495_s1 + $0x98] sm:$0xff]  ;;  %v1382_v62 = vld [vmem:[%s2495_s1 + $0x190] sm:$0xff] }
   0xf   :  { %v1381_v57 = vld [vmem:[%s2495_s1 + $0x188] sm:$0xff]  ;;  %v1967_v58 = vpack.c.bf16 %v1373_v55, %v1372_v54  ;;  %v1383_v63 = vld [vmem:[%s2495_s1 + $0x198] sm:$0xff]  ;;  %v1970_v1 = vpack.c.bf16 %v1375_v61, %v1374_v60  ;;  %v1376_v3 = vld [vmem:[%s2495_s1 + $0xa0] sm:$0xff] }
  0x10   :  { %1881 = vmatpush3.bf16.msra.mxu0 %v1880_v24  ;;  %v1979_v59 = vpack.c.bf16 %v1381_v57, %v1380_v56  ;;  %v1982_v2 = vpack.c.bf16 %v1383_v63, %v1382_v62  ;;  %v1384_v5 = vld [vmem:[%s2495_s1 + $0x1a0] sm:$0xff]  ;;  %v1385_v6 = vld [vmem:[%s2495_s1 + $0x1a8] sm:$0xff]  ;;  %v1378_v10 = vld [vmem:[%s2495_s1 + $0xb0] sm:$0xff] }
  0x11   :  { %1893 = vmatpush3.bf16.msra.mxu1 %v1892_v25  ;;  %1894 = vmatprep.subr.bf16.mxu0 %v2065_v0  ;;  %v1379_v11 = vld [vmem:[%s2495_s1 + $0xb8] sm:$0xff]  ;;  %v1370_v16 = vld [vmem:[%s2496_s0 + $0x10] sm:$0xff]  ;;  %v1406_v20 = vld [vmem:[%s2495_s1 + $0x1c0] sm:$0xff] }
  0x12   :  { %1906 = vmatprep.subr.bf16.mxu1 %v2065_v0  ;;  %v1976_v14 = vpack.c.bf16 %v1379_v11, %v1378_v10  ;;  %v1371_v17 = vld [vmem:[%s2496_s0 + $0x30] sm:$0xff]  ;;  %v1407_v21 = vld [vmem:[%s2495_s1 + $0x1c8] sm:$0xff]  ;;  %v1402_v30 = vld [vmem:[%s2495_s1 + $0xe0] sm:$0xff] }
  0x13   :  { %1583 = vmatmul.mubr.msk.f32.vlgmr.msra.gmra.mrb[0].mxu0 %vm40_vm1, %v20_v26  ;;  %v2027_v23 = vpack.c.bf16 %v1407_v21, %v1406_v20  ;;  %v1403_v31 = vld [vmem:[%s2495_s1 + $0xe8] sm:$0xff]  ;;  %v1404_v36 = vld [vmem:[%s2495_s1 + $0xf0] sm:$0xff]  ;;  %v1405_v37 = vld [vmem:[%s2495_s1 + $0xf8] sm:$0xff] }
  0x14   :  { %1602 = vmatmul.mubr.msk.f32.vlgmr.msra.gmra.mrb[0].mxu1 %vm40_vm1, %v1327_v27  ;;  %1896 = vmatpush3.bf16.msra.mxu0 %v1883_v9  ;;  %v1985_v9 = vpack.c.bf16 %v1385_v6, %v1384_v5  ;;  %v2021_v34 = vpack.c.bf16 %v1403_v31, %v1402_v30  ;;  %v2024_v40 = vpack.c.bf16 %v1405_v37, %v1404_v36  ;;  %v1396_v42 = vld [vmem:[%s2496_s0 + $0x18] sm:$0xff]  ;;  %v1366_v5 = vld [vmem:[%s2498_s3 + $0x8] sm:$0xff] }
  0x15   :  { %1908 = vmatpush3.bf16.msra.mxu1 %v1871_v4  ;;  %1897 = vmatprep.subr.bf16.mxu0 %v2065_v0  ;;  %v1377_v4 = vld [vmem:[%s2495_s1 + $0xa8] sm:$0xff]  ;;  %v1397_v43 = vld [vmem:[%s2496_s0 + $0x38] sm:$0xff] }
  0x16   :  { %1909 = vmatprep.subr.bf16.mxu1 %v2065_v0  ;;  %1620 = vmatprep.mubr.msk.f32.mxu0 %vm2066_vm0, %v2067_v8  ;;  %v1973_v7 = vpack.c.bf16 %v1377_v4, %v1376_v3 }
  0x17   :  { %1639 = vmatprep.mubr.msk.f32.mxu1 %vm2066_vm0, %v2067_v8 }
  0x18   :  { %1899 = vmatpush3.bf16.msra.mxu0 %v1886_v13  ;;  %v1387_v13 = vld [vmem:[%s2495_s1 + $0x1b8] sm:$0xff] }
  0x19   :  { %1911 = vmatpush3.bf16.msra.mxu1 %v1874_v12  ;;  %1900 = vmatprep.subr.bf16.mxu0 %v2065_v0  ;;  %v1386_v12 = vld [vmem:[%s2495_s1 + $0x1b0] sm:$0xff] }
  0x1a   :  { %1912 = vmatprep.subr.bf16.mxu1 %v2065_v0  ;;  %v1988_v15 = vpack.c.bf16 %v1387_v13, %v1386_v12 }
  0x1c   :  { %1902 = vmatpush3.bf16.msra.mxu0 %v1889_v19  ;;  %v1399_v19 = vld [vmem:[%s2495_s1 + $0xc8] sm:$0xff] }
  0x1d   :  { %1914 = vmatpush3.bf16.msra.mxu1 %v1877_v18  ;;  %1903 = vmatprep.subr.bf16.mxu0 %v2065_v0  ;;  %v1398_v18 = vld [vmem:[%s2495_s1 + $0xc0] sm:$0xff] }
  0x1e   :  { %1915 = vmatprep.subr.bf16.mxu1 %v2065_v0  ;;  %v2015_v22 = vpack.c.bf16 %v1399_v19, %v1398_v18 }
  0x20   :  { %1905 = vmatpush3.bf16.msra.mxu0 %v1892_v25  ;;  %v1401_v25 = vld [vmem:[%s2495_s1 + $0xd8] sm:$0xff] }
  0x21   :  { %1917 = vmatpush3.bf16.msra.mxu1 %v1880_v24  ;;  %1918 = vmatprep.subr.bf16.mxu0 %v2065_v0  ;;  %v1400_v24 = vld [vmem:[%s2495_s1 + $0xd0] sm:$0xff] }
  0x22   :  { %1930 = vmatprep.subr.bf16.mxu1 %v2065_v0  ;;  %v2018_v28 = vpack.c.bf16 %v1401_v25, %v1400_v24  ;;  %v1392_v24 = vld [vmem:[%s2498_s3 + $0x10] sm:$0xff] }
  0x23   :  { %1621 = vmatmul.mubr.msk.f32.vlgmr.msra.gmra.mrb[2].mxu0 %vm40_vm1, %v20_v26  ;;  %v1408_v26 = vld [vmem:[%s2495_s1 + $0x1d0] sm:$0xff] }
  0x24   :  { %1640 = vmatmul.mubr.msk.f32.vlgmr.msra.gmra.mrb[2].mxu1 %vm40_vm1, %v1327_v27  ;;  %1920 = vmatpush3.bf16.msra.mxu0 %v1919_v32  ;;  %v1409_v27 = vld [vmem:[%s2495_s1 + $0x1d8] sm:$0xff] }
  0x25   :  { %1932 = vmatpush3.bf16.msra.mxu1 %v1931_v33  ;;  %1921 = vmatprep.subr.bf16.mxu0 %v2065_v0  ;;  %v2030_v29 = vpack.c.bf16 %v1409_v27, %v1408_v26 }
  0x26   :  { %1933 = vmatprep.subr.bf16.mxu1 %v2065_v0  ;;  %1658 = vmatprep.mubr.msk.f32.mxu0 %vm2066_vm0, %v2067_v8 }
  0x27   :  { %1677 = vmatprep.mubr.msk.f32.mxu1 %vm2066_vm0, %v2067_v8 }
  0x28   :  { %1923 = vmatpush3.bf16.msra.mxu0 %v1922_v38 }
  0x29   :  { %1935 = vmatpush3.bf16.msra.mxu1 %v1934_v39  ;;  %1924 = vmatprep.subr.bf16.mxu0 %v2065_v0 }
  0x2a   :  { %1936 = vmatprep.subr.bf16.mxu1 %v2065_v0 }
  0x2c   :  { %1926 = vmatpush3.bf16.msra.mxu0 %v1925_v44 }
  0x2d   :  { %1938 = vmatpush3.bf16.msra.mxu1 %v1937_v45  ;;  %1927 = vmatprep.subr.bf16.mxu0 %v2065_v0 }
  0x2e   :  { %1939 = vmatprep.subr.bf16.mxu1 %v2065_v0 }
  0x30   :  { %1929 = vmatpush3.bf16.msra.mxu0 %v1928_v50 }
  0x31   :  { %1941 = vmatpush3.bf16.msra.mxu1 %v1940_v51  ;;  %1942 = vmatprep.subr.bf16.mxu0 %v2065_v0 }
  0x32   :  { %1954 = vmatprep.subr.bf16.mxu1 %v2065_v0 }
  0x33   :  { %1659 = vmatmul.mubr.msk.f32.vlgmr.msra.gmra.mrb[4].mxu0 %vm40_vm1, %v1344_v52 }
  0x34   :  { %1678 = vmatmul.mubr.msk.f32.vlgmr.msra.gmra.mrb[4].mxu1 %vm40_vm1, %v1345_v53  ;;  %1944 = vmatpush3.bf16.msra.mxu0 %v1931_v33  ;;  %v1411_v33 = vld [vmem:[%s2495_s1 + $0x1e8] sm:$0xff] }
  0x35   :  { %1956 = vmatpush3.bf16.msra.mxu1 %v1919_v32  ;;  %1945 = vmatprep.subr.bf16.mxu0 %v2065_v0  ;;  %v1410_v32 = vld [vmem:[%s2495_s1 + $0x1e0] sm:$0xff] }
  0x36   :  { %1957 = vmatprep.subr.bf16.mxu1 %v2065_v0  ;;  %1696 = vmatprep.mubr.msk.f32.mxu0 %vm2066_vm0, %v2067_v8  ;;  %v2033_v35 = vpack.c.bf16 %v1411_v33, %v1410_v32  ;;  %v1393_v33 = vld [vmem:[%s2498_s3 + $0x30] sm:$0xff] }
  0x37   :  { %1715 = vmatprep.mubr.msk.f32.mxu1 %vm2066_vm0, %v2067_v8 }
  0x38   :  { %1947 = vmatpush3.bf16.msra.mxu0 %v1934_v39  ;;  %v1413_v39 = vld [vmem:[%s2495_s1 + $0x1f8] sm:$0xff] }
  0x39   :  { %1959 = vmatpush3.bf16.msra.mxu1 %v1922_v38  ;;  %1948 = vmatprep.subr.bf16.mxu0 %v2065_v0  ;;  %v1412_v38 = vld [vmem:[%s2495_s1 + $0x1f0] sm:$0xff] }
  0x3a   :  { %1960 = vmatprep.subr.bf16.mxu1 %v2065_v0  ;;  %v2036_v41 = vpack.c.bf16 %v1413_v39, %v1412_v38 }
  0x3c   :  { %1950 = vmatpush3.bf16.msra.mxu0 %v1937_v45 }
  0x3d   :  { %1962 = vmatpush3.bf16.msra.mxu1 %v1925_v44  ;;  %1951 = vmatprep.subr.bf16.mxu0 %v2065_v0 }
  0x3e   :  { %1963 = vmatprep.subr.bf16.mxu1 %v2065_v0 }
  0x40   :  { %1953 = vmatpush3.bf16.msra.mxu0 %v1940_v51 }
  0x41   :  { %1965 = vmatpush3.bf16.msra.mxu1 %v1928_v50  ;;  %1966 = vmatprep.subr.bf16.mxu0 %v2065_v0 }
  0x42   :  { %1978 = vmatprep.subr.bf16.mxu1 %v2065_v0 }
  0x43   :  { %1697 = vmatmul.mubr.msk.f32.vlgmr.msra.gmra.mrb[6].mxu0 %vm40_vm1, %v1344_v52 }
  0x44   :  { %1716 = vmatmul.mubr.msk.f32.vlgmr.msra.gmra.mrb[6].mxu1 %vm40_vm1, %v1345_v53  ;;  %1968 = vmatpush3.bf16.msra.mxu0 %v1967_v58  ;;  %v2437_v53 = vld [vmem:[%s2497_s2 + $0x1] ss:$0 sm:$0xff] }
  0x45   :  { %1980 = vmatpush3.bf16.msra.mxu1 %v1979_v59  ;;  %1969 = vmatprep.subr.bf16.mxu0 %v2065_v0 }
  0x46   :  { %1981 = vmatprep.subr.bf16.mxu1 %v2065_v0  ;;  %1734 = vmatprep.mubr.msk.f32.mxu0 %vm2066_vm0, %v2067_v8 }
  0x47   :  { %1753 = vmatprep.mubr.msk.f32.mxu1 %vm2066_vm0, %v2067_v8 }
  0x48   :  { %1971 = vmatpush3.bf16.msra.mxu0 %v1970_v1 }
  0x49   :  { %1983 = vmatpush3.bf16.msra.mxu1 %v1982_v2  ;;  %1972 = vmatprep.subr.bf16.mxu0 %v2065_v0 }
  0x4a   :  { %1984 = vmatprep.subr.bf16.mxu1 %v2065_v0 }
  0x4c   :  { %1974 = vmatpush3.bf16.msra.mxu0 %v1973_v7 }
  0x4d   :  { %1986 = vmatpush3.bf16.msra.mxu1 %v1985_v9  ;;  %1975 = vmatprep.subr.bf16.mxu0 %v2065_v0 }
  0x4e   :  { %1987 = vmatprep.subr.bf16.mxu1 %v2065_v0 }
  0x50   :  { %1977 = vmatpush3.bf16.msra.mxu0 %v1976_v14 }
  0x51   :  { %1989 = vmatpush3.bf16.msra.mxu1 %v1988_v15  ;;  %1990 = vmatprep.subr.bf16.mxu0 %v2065_v0 }
  0x52   :  { %2002 = vmatprep.subr.bf16.mxu1 %v2065_v0 }
  0x53   :  { %1735 = vmatmul.mubr.msk.f32.vlgmr.msra.gmra.mrb[8].mxu0 %vm40_vm1, %v1370_v16 }
  0x54   :  { %1754 = vmatmul.mubr.msk.f32.vlgmr.msra.gmra.mrb[8].mxu1 %vm40_vm1, %v1371_v17  ;;  %1992 = vmatpush3.bf16.msra.mxu0 %v1979_v59  ;;  %v1342_v59 = vld [vmem:[%s2498_s3 + $0x20] sm:$0xff] }
  0x55   :  { %2004 = vmatpush3.bf16.msra.mxu1 %v1967_v58  ;;  %1993 = vmatprep.subr.bf16.mxu0 %v2065_v0 }
  0x56   :  { %2005 = vmatprep.subr.bf16.mxu1 %v2065_v0  ;;  %1772 = vmatprep.mubr.msk.f32.mxu0 %vm2066_vm0, %v2067_v8 }
  0x57   :  { %1791 = vmatprep.mubr.msk.f32.mxu1 %vm2066_vm0, %v2067_v8 }
  0x58   :  { %1995 = vmatpush3.bf16.msra.mxu0 %v1982_v2 }
  0x59   :  { %2007 = vmatpush3.bf16.msra.mxu1 %v1970_v1  ;;  %1996 = vmatprep.subr.bf16.mxu0 %v2065_v0 }
  0x5a   :  { %2008 = vmatprep.subr.bf16.mxu1 %v2065_v0 }
  0x5c   :  { %1998 = vmatpush3.bf16.msra.mxu0 %v1985_v9 }
  0x5d   :  { %2010 = vmatpush3.bf16.msra.mxu1 %v1973_v7  ;;  %1999 = vmatprep.subr.bf16.mxu0 %v2065_v0 }
  0x5e   :  { %2011 = vmatprep.subr.bf16.mxu1 %v2065_v0 }
  0x60   :  { %2001 = vmatpush3.bf16.msra.mxu0 %v1988_v15  ;;  %v1367_v15 = vld [vmem:[%s2498_s3 + $0x28] sm:$0xff] }
  0x61   :  { %2013 = vmatpush3.bf16.msra.mxu1 %v1976_v14  ;;  %2014 = vmatprep.subr.bf16.mxu0 %v2065_v0 }
  0x62   :  { %2026 = vmatprep.subr.bf16.mxu1 %v2065_v0 }
  0x63   :  { %1773 = vmatmul.mubr.msk.f32.vlgmr.msra.gmra.mrb[10].mxu0 %vm40_vm1, %v1370_v16 }
  0x64   :  { %1792 = vmatmul.mubr.msk.f32.vlgmr.msra.gmra.mrb[10].mxu1 %vm40_vm1, %v1371_v17  ;;  %2016 = vmatpush3.bf16.msra.mxu0 %v2015_v22 }
  0x65   :  { %2028 = vmatpush3.bf16.msra.mxu1 %v2027_v23  ;;  %2017 = vmatprep.subr.bf16.mxu0 %v2065_v0 }
  0x66   :  { %2029 = vmatprep.subr.bf16.mxu1 %v2065_v0  ;;  %1810 = vmatprep.mubr.msk.f32.mxu0 %vm2066_vm0, %v2067_v8 }
  0x67   :  { %1829 = vmatprep.mubr.msk.f32.mxu1 %vm2066_vm0, %v2067_v8 }
  0x68   :  { %2019 = vmatpush3.bf16.msra.mxu0 %v2018_v28 }
  0x69   :  { %2031 = vmatpush3.bf16.msra.mxu1 %v2030_v29  ;;  %2020 = vmatprep.subr.bf16.mxu0 %v2065_v0 }
  0x6a   :  { %2032 = vmatprep.subr.bf16.mxu1 %v2065_v0 }
  0x6c   :  { %2022 = vmatpush3.bf16.msra.mxu0 %v2021_v34 }
  0x6d   :  { %2034 = vmatpush3.bf16.msra.mxu1 %v2033_v35  ;;  %2023 = vmatprep.subr.bf16.mxu0 %v2065_v0 }
  0x6e   :  { %2035 = vmatprep.subr.bf16.mxu1 %v2065_v0 }
  0x70   :  { %2025 = vmatpush3.bf16.msra.mxu0 %v2024_v40 }
  0x71   :  { %2037 = vmatpush3.bf16.msra.mxu1 %v2036_v41  ;;  %2038 = vmatprep.subr.bf16.mxu0 %v2065_v0 }
  0x72   :  { %2050 = vmatprep.subr.bf16.mxu1 %v2065_v0 }
  0x73   :  { %1811 = vmatmul.mubr.msk.f32.vlgmr.msra.gmra.mrb[12].mxu0 %vm40_vm1, %v1396_v42 }
  0x74   :  { %1830 = vmatmul.mubr.msk.f32.vlgmr.msra.gmra.mrb[12].mxu1 %vm40_vm1, %v1397_v43  ;;  %2040 = vmatpush3.bf16.msra.mxu0 %v2027_v23 }
  0x75   :  { %2052 = vmatpush3.bf16.msra.mxu1 %v2015_v22  ;;  %2041 = vmatprep.subr.bf16.mxu0 %v2065_v0 }
  0x76   :  { %2053 = vmatprep.subr.bf16.mxu1 %v2065_v0  ;;  %1848 = vmatprep.mubr.msk.f32.mxu0 %vm2066_vm0, %v2067_v8 }
  0x77   :  { %1867 = vmatprep.mubr.msk.f32.mxu1 %vm2066_vm0, %v2067_v8  ;;  %v2424_v8 = vld [vmem:[%s2497_s2] ss:$0 sm:$0xff] }
  0x78   :  { %2043 = vmatpush3.bf16.msra.mxu0 %v2030_v29 }
  0x79   :  { %2055 = vmatpush3.bf16.msra.mxu1 %v2018_v28  ;;  %2044 = vmatprep.subr.bf16.mxu0 %v2065_v0 }
  0x7a   :  { %2056 = vmatprep.subr.bf16.mxu1 %v2065_v0 }
  0x7c   :  { %2046 = vmatpush3.bf16.msra.mxu0 %v2033_v35 }
  0x7d   :  { %2058 = vmatpush3.bf16.msra.mxu1 %v2021_v34  ;;  %2047 = vmatprep.subr.bf16.mxu0 %v2065_v0 }
  0x7e   :  { %2059 = vmatprep.subr.bf16.mxu1 %v2065_v0  ;;  %v344_v0 = vld [vmem:[%s2498_s3] sm:$0xff] }
  0x80   :  { %2049 = vmatpush3.bf16.msra.mxu0 %v2036_v41 }
  0x81   :  { %2061 = vmatpush3.bf16.msra.mxu1 %v2024_v40 }
  0x83   :  { %1849 = vmatmul.mubr.msk.f32.vlgmr.msra.gmra.mrb[14].mxu0 %vm40_vm1, %v1396_v42  ;;  %v1418_v42 = vld [vmem:[%s2498_s3 + $0x18] sm:$0xff] }
  0x84   :  { %1868 = vmatmul.mubr.msk.f32.vlgmr.msra.gmra.mrb[14].mxu1 %vm40_vm1, %v1397_v43 }
  0xe6   :  { %v110_v44 = vpop.f32.mrb[0].mxu0 }
  0xe7   :  { %v183_v45 = vpop.f32.mrb[0].mxu1  ;;  %v1584_v46 = vpop.f32.mrb[1].mxu0 }
  0xe8   :  { %v187_v47 = vsub.f32 %v110_v44, %v183_v45  ;;  %v1603_v48 = vpop.f32.mrb[1].mxu1 }
  0xea   :  { %v194_v49 = vadd.f32 %v2424_v8, %v187_v47 }
  0xec   :  { %v342_v50 = vmax.f32 %v194_v49, 0.0 }
  0xee   :  { %v345_v51 = vadd.f32 %v344_v0, %v342_v50 }
  0xf0   :  { %350 = vst.msk [vmem:[%s2499_s4] sm:$0xff] %vm349_vm2, %v345_v51 }
  0xf6   :  { %v261_v52 = vpop.f32.mrb[2].mxu0 }
  0xf7   :  { %v331_v54 = vpop.f32.mrb[2].mxu1  ;;  %v1622_v55 = vpop.f32.mrb[3].mxu0 }
  0xf8   :  { %v332_v56 = vadd.f32 %v331_v54, %v261_v52  ;;  %v1641_v57 = vpop.f32.mrb[3].mxu1 }
  0xfa   :  { %v341_v58 = vadd.f32 %v2437_v53, %v332_v56 }
  0xfc   :  { %v343_v60 = vmax.f32 %v341_v58, 0.0 }
  0xfe   :  { %v348_v61 = vadd.f32 %v1342_v59, %v343_v60 }
 0x100   :  { %1343 = vst.msk [vmem:[%s2499_s4 + $0x20] sm:$0xff] %vm349_vm2, %v348_v61 }
 0x106   :  { %v444_v62 = vpop.f32.mrb[4].mxu0 }
 0x107   :  { %v517_v63 = vpop.f32.mrb[4].mxu1  ;;  %v1660_v1 = vpop.f32.mrb[5].mxu0 }
 0x108   :  { %v521_v2 = vsub.f32 %v444_v62, %v517_v63  ;;  %v1679_v3 = vpop.f32.mrb[5].mxu1 }
 0x10a   :  { %v522_v4 = vadd.f32 %v2424_v8, %v521_v2 }
 0x10c   :  { %v664_v6 = vmax.f32 %v522_v4, 0.0 }
 0x10e   :  { %v668_v7 = vadd.f32 %v1366_v5, %v664_v6 }
 0x110   :  { %1368 = vst.msk [vmem:[%s2499_s4 + $0x8] sm:$0xff] %vm349_vm2, %v668_v7 }
 0x116   :  { %v589_v9 = vpop.f32.mrb[6].mxu0 }
 0x117   :  { %v659_v10 = vpop.f32.mrb[6].mxu1  ;;  %v1698_v11 = vpop.f32.mrb[7].mxu0 }
 0x118   :  { %v660_v12 = vadd.f32 %v659_v10, %v589_v9  ;;  %v1717_v13 = vpop.f32.mrb[7].mxu1 }
 0x11a   :  { %v663_v14 = vadd.f32 %v2437_v53, %v660_v12 }
 0x11c   :  { %v665_v16 = vmax.f32 %v663_v14, 0.0 }
 0x11e   :  { %v671_v17 = vadd.f32 %v1367_v15, %v665_v16 }
 0x120   :  { %1369 = vst.msk [vmem:[%s2499_s4 + $0x28] sm:$0xff] %vm349_vm2, %v671_v17 }
 0x126   :  { %v767_v18 = vpop.f32.mrb[8].mxu0 }
 0x127   :  { %v840_v19 = vpop.f32.mrb[8].mxu1  ;;  %v1736_v20 = vpop.f32.mrb[9].mxu0 }
 0x128   :  { %v844_v21 = vsub.f32 %v767_v18, %v840_v19  ;;  %v1755_v22 = vpop.f32.mrb[9].mxu1 }
 0x12a   :  { %v845_v23 = vadd.f32 %v2424_v8, %v844_v21 }
 0x12c   :  { %v987_v25 = vmax.f32 %v845_v23, 0.0 }
 0x12e   :  { %v991_v26 = vadd.f32 %v1392_v24, %v987_v25 }
 0x130   :  { %1394 = vst.msk [vmem:[%s2499_s4 + $0x10] sm:$0xff] %vm349_vm2, %v991_v26 }
 0x136   :  { %v912_v27 = vpop.f32.mrb[10].mxu0 }
 0x137   :  { %v982_v28 = vpop.f32.mrb[10].mxu1  ;;  %v1774_v29 = vpop.f32.mrb[11].mxu0 }
 0x138   :  { %v983_v30 = vadd.f32 %v982_v28, %v912_v27  ;;  %v1793_v31 = vpop.f32.mrb[11].mxu1 }
 0x13a   :  { %v986_v32 = vadd.f32 %v2437_v53, %v983_v30 }
 0x13c   :  { %v988_v34 = vmax.f32 %v986_v32, 0.0 }
 0x13e   :  { %v994_v35 = vadd.f32 %v1393_v33, %v988_v34 }
 0x140   :  { %1395 = vst.msk [vmem:[%s2499_s4 + $0x30] sm:$0xff] %vm349_vm2, %v994_v35 }
 0x146   :  { %v1090_v36 = vpop.f32.mrb[12].mxu0 }
 0x147   :  { %v1163_v37 = vpop.f32.mrb[12].mxu1  ;;  %v1812_v38 = vpop.f32.mrb[13].mxu0 }
 0x148   :  { %v1167_v39 = vsub.f32 %v1090_v36, %v1163_v37  ;;  %v1831_v40 = vpop.f32.mrb[13].mxu1 }
 0x14a   :  { %v1168_v41 = vadd.f32 %v2424_v8, %v1167_v39  ;;  %v1419_v8 = vld [vmem:[%s2498_s3 + $0x38] sm:$0xff] }
 0x14c   :  { %v1310_v43 = vmax.f32 %v1168_v41, 0.0 }
 0x14e   :  { %v1314_v44 = vadd.f32 %v1418_v42, %v1310_v43 }
 0x150   :  { %1420 = vst.msk [vmem:[%s2499_s4 + $0x18] sm:$0xff] %vm349_vm2, %v1314_v44 }
 0x156   :  { %v1235_v45 = vpop.f32.mrb[14].mxu0 }
 0x157   :  { %v1305_v46 = vpop.f32.mrb[14].mxu1  ;;  %v1850_v47 = vpop.f32.mrb[15].mxu0 }
 0x158   :  { %v1306_v48 = vadd.f32 %v1305_v46, %v1235_v45  ;;  %v1869_v49 = vpop.f32.mrb[15].mxu1 }
 0x15a   :  { %v1309_v0 = vadd.f32 %v2437_v53, %v1306_v48 }
 0x15c   :  { %v1311_v50 = vmax.f32 %v1309_v0, 0.0 }
 0x15e   :  { %v1317_v51 = vadd.f32 %v1419_v8, %v1311_v50 }
 0x160   :  { %1421 = vst.msk [vmem:[%s2499_s4 + $0x38] sm:$0xff] %vm349_vm2, %v1317_v51 }

// kernel: ccnn2_forward.10
= control target key start
LH: loop header
LB: loop body
LE: loop exit
PB: predicated region body
PF: predicated region fallthrough
CT: control target
= control target key end

     0   :  { %vm38_vm0 = vcmask 261120   ;;  %vm452_vm1 = vcmask 31744   ;;  %s2984_s1 = inlined_call_operand.vmem [shape: f32[2,4,32,4], index: 1, kind: input, shape index: {}]   ;;  %s2985_s0 = inlined_call_operand.vmem [shape: f32[2,4,32,32], index: 0, kind: input, shape index: {}]   ;;  %s2986_s2 = inlined_call_operand.vmem [shape: f32[2,1,4], index: 2, kind: input, shape index: {}]   ;;  %s2987_s3 = inlined_call_operand.vmem [shape: f32[2,4,32,4], index: 3, kind: input, shape index: {}]   ;;  %s2988_s4 = inlined_call_operand.vmem [shape: f32[2,4,32,4], index: 4, kind: output, shape index: {}]  }
   0x1   :  { %v29_v0 = vld [vmem:[%s2984_s1] sm:$0xff]  ;;  %v30_v1 = vld [vmem:[%s2984_s1 + $0x8] sm:$0xff]  ;;  %v31_v5 = vld [vmem:[%s2984_s1 + $0x10] sm:$0xff] }
   0x2   :  { %v1767_v2 = vld [vmem:[%s2984_s1 + $0x80] sm:$0xff]  ;;  %v2293_v3 = vpack.c.bf16 %v30_v1, %v29_v0  ;;  %v1768_v4 = vld [vmem:[%s2984_s1 + $0x88] sm:$0xff]  ;;  %v32_v6 = vld [vmem:[%s2984_s1 + $0x18] sm:$0xff] }
   0x3   :  { %v2301_v7 = vpack.c.bf16 %v1768_v4, %v1767_v2  ;;  %v2297_v8 = vpack.c.bf16 %v32_v6, %v31_v5  ;;  %v1769_v9 = vld [vmem:[%s2984_s1 + $0x90] sm:$0xff]  ;;  %v1770_v10 = vld [vmem:[%s2984_s1 + $0x98] sm:$0xff]  ;;  %v20_v11 = vld [vmem:[%s2985_s0] sm:$0xff] }
   0x4   :  { %2294 = vmatprep.subr.bf16.mxu1 %v2293_v3  ;;  %v2305_v12 = vpack.c.bf16 %v1770_v10, %v1769_v9  ;;  %2077 = vmatprep.mubr.msk.f32.mxu1 %vm38_vm0, %v20_v11  ;;  %v21_v13 = vld [vmem:[%s2985_s0 + $0x8] sm:$0xff]  ;;  %v22_v14 = vld [vmem:[%s2985_s0 + $0x10] sm:$0xff]  ;;  %v1805_v15 = vld [vmem:[%s2984_s1 + $0x20] sm:$0xff] }
   0x5   :  { %2310 = vmatprep.subr.bf16.mxu0 %v2301_v7  ;;  %2296 = vmatpush3.bf16.msra.mxu1 %v2293_v3  ;;  %v1806_v16 = vld [vmem:[%s2984_s1 + $0x28] sm:$0xff]  ;;  %v23_v17 = vld [vmem:[%s2985_s0 + $0x18] sm:$0xff]  ;;  %v1809_v18 = vld [vmem:[%s2984_s1 + $0xa0] sm:$0xff] }
   0x6   :  { %2312 = vmatpush3.bf16.msra.mxu0 %v2301_v7  ;;  %2298 = vmatprep.subr.bf16.mxu1 %v2297_v8  ;;  %v1810_v19 = vld [vmem:[%s2984_s1 + $0xa8] sm:$0xff]  ;;  %v1763_v20 = vld [vmem:[%s2985_s0 + $0x80] sm:$0xff]  ;;  %v2325_v21 = vpack.c.bf16 %v1806_v16, %v1805_v15  ;;  %v1807_v23 = vld [vmem:[%s2984_s1 + $0x30] sm:$0xff] }
   0x7   :  { %2314 = vmatprep.subr.bf16.mxu0 %v2305_v12  ;;  %2105 = vmatprep.mubr.msk.f32.mxu0 %vm38_vm0, %v20_v11  ;;  %v2333_v22 = vpack.c.bf16 %v1810_v19, %v1809_v18  ;;  %v1808_v24 = vld [vmem:[%s2984_s1 + $0x38] sm:$0xff]  ;;  %v1764_v25 = vld [vmem:[%s2985_s0 + $0x88] sm:$0xff]  ;;  %v1811_v26 = vld [vmem:[%s2984_s1 + $0xb0] sm:$0xff] }
   0x8   :  { %v1812_v27 = vld [vmem:[%s2984_s1 + $0xb8] sm:$0xff]  ;;  %v1765_v28 = vld [vmem:[%s2985_s0 + $0x90] sm:$0xff]  ;;  %v2329_v29 = vpack.c.bf16 %v1808_v24, %v1807_v23  ;;  %v1797_v32 = vld [vmem:[%s2985_s0 + $0x20] sm:$0xff] }
   0x9   :  { %2300 = vmatpush3.bf16.msra.mxu1 %v2297_v8  ;;  %v2337_v30 = vpack.c.bf16 %v1812_v27, %v1811_v26  ;;  %v1766_v31 = vld [vmem:[%s2985_s0 + $0x98] sm:$0xff]  ;;  %v1798_v33 = vld [vmem:[%s2985_s0 + $0x28] sm:$0xff]  ;;  %v1799_v34 = vld [vmem:[%s2985_s0 + $0x30] sm:$0xff] }
   0xa   :  { %2316 = vmatpush3.bf16.msra.mxu0 %v2305_v12  ;;  %2302 = vmatprep.subr.bf16.mxu1 %v2301_v7  ;;  %v1853_v35 = vld [vmem:[%s2984_s1 + $0x40] sm:$0xff]  ;;  %v1854_v36 = vld [vmem:[%s2984_s1 + $0x48] sm:$0xff]  ;;  %v1800_v37 = vld [vmem:[%s2985_s0 + $0x38] sm:$0xff] }
   0xb   :  { %2318 = vmatprep.subr.bf16.mxu0 %v2293_v3  ;;  %v1857_v38 = vld [vmem:[%s2984_s1 + $0xc0] sm:$0xff]  ;;  %v1858_v39 = vld [vmem:[%s2984_s1 + $0xc8] sm:$0xff]  ;;  %v2357_v41 = vpack.c.bf16 %v1854_v36, %v1853_v35  ;;  %v1855_v43 = vld [vmem:[%s2984_s1 + $0x50] sm:$0xff] }
   0xc   :  { %2078 = vmatmul.mubr.msk.f32.vlgmr.msra.gmra.mrb[0].mxu1 %vm38_vm0, %v21_v13  ;;  %v1801_v40 = vld [vmem:[%s2985_s0 + $0xa0] sm:$0xff]  ;;  %v2365_v42 = vpack.c.bf16 %v1858_v39, %v1857_v38  ;;  %v1856_v44 = vld [vmem:[%s2984_s1 + $0x58] sm:$0xff]  ;;  %v1802_v45 = vld [vmem:[%s2985_s0 + $0xa8] sm:$0xff] }
   0xd   :  { %2106 = vmatmul.mubr.msk.f32.vlgmr.msra.gmra.mrb[0].mxu0 %vm38_vm0, %v21_v13  ;;  %2304 = vmatpush3.bf16.msra.mxu1 %v2301_v7  ;;  %v1859_v46 = vld [vmem:[%s2984_s1 + $0xd0] sm:$0xff]  ;;  %v1860_v47 = vld [vmem:[%s2984_s1 + $0xd8] sm:$0xff]  ;;  %v2361_v49 = vpack.c.bf16 %v1856_v44, %v1855_v43  ;;  %v1845_v52 = vld [vmem:[%s2985_s0 + $0x40] sm:$0xff] }
   0xe   :  { %2320 = vmatpush3.bf16.msra.mxu0 %v2293_v3  ;;  %2080 = vmatprep.mubr.msk.f32.mxu1 %vm38_vm0, %v22_v14  ;;  %v1803_v48 = vld [vmem:[%s2985_s0 + $0xb0] sm:$0xff]  ;;  %v2369_v50 = vpack.c.bf16 %v1860_v47, %v1859_v46  ;;  %v1804_v51 = vld [vmem:[%s2985_s0 + $0xb8] sm:$0xff]  ;;  %v1846_v53 = vld [vmem:[%s2985_s0 + $0x48] sm:$0xff] }
   0xf   :  { %2108 = vmatprep.mubr.msk.f32.mxu0 %vm38_vm0, %v22_v14  ;;  %2306 = vmatprep.subr.bf16.mxu1 %v2305_v12  ;;  %v1847_v54 = vld [vmem:[%s2985_s0 + $0x50] sm:$0xff]  ;;  %v1901_v55 = vld [vmem:[%s2984_s1 + $0x60] sm:$0xff]  ;;  %v1902_v56 = vld [vmem:[%s2984_s1 + $0x68] sm:$0xff] }
  0x10   :  { %2081 = vmatmul.mubr.msk.f32.gmra.mrb[2].mxu1 %vm38_vm0, %v23_v17  ;;  %2322 = vmatprep.subr.bf16.mxu0 %v2297_v8  ;;  %v1848_v57 = vld [vmem:[%s2985_s0 + $0x58] sm:$0xff]  ;;  %v1905_v58 = vld [vmem:[%s2984_s1 + $0xe0] sm:$0xff]  ;;  %v1906_v59 = vld [vmem:[%s2984_s1 + $0xe8] sm:$0xff]  ;;  %v2389_v61 = vpack.c.bf16 %v1902_v56, %v1901_v55 }
  0x11   :  { %2109 = vmatmul.mubr.msk.f32.gmra.mrb[2].mxu0 %vm38_vm0, %v23_v17  ;;  %2308 = vmatpush3.bf16.msra.mxu1 %v2305_v12  ;;  %v1849_v60 = vld [vmem:[%s2985_s0 + $0xc0] sm:$0xff]  ;;  %v2397_v62 = vpack.c.bf16 %v1906_v59, %v1905_v58  ;;  %v1903_v63 = vld [vmem:[%s2984_s1 + $0x70] sm:$0xff]  ;;  %v1904_v0 = vld [vmem:[%s2984_s1 + $0x78] sm:$0xff] }
  0x12   :  { %2324 = vmatpush3.bf16.msra.mxu0 %v2297_v8  ;;  %2091 = vmatprep.mubr.msk.f32.mxu1 %vm38_vm0, %v1763_v20  ;;  %v1850_v1 = vld [vmem:[%s2985_s0 + $0xc8] sm:$0xff]  ;;  %v1907_v2 = vld [vmem:[%s2984_s1 + $0xf0] sm:$0xff]  ;;  %v1908_v3 = vld [vmem:[%s2984_s1 + $0xf8] sm:$0xff]  ;;  %v2393_v5 = vpack.c.bf16 %v1904_v0, %v1903_v63 }
  0x13   :  { %2119 = vmatprep.mubr.msk.f32.mxu0 %vm38_vm0, %v1763_v20  ;;  %2326 = vmatprep.subr.bf16.mxu1 %v2325_v21  ;;  %v1851_v4 = vld [vmem:[%s2985_s0 + $0xd0] sm:$0xff]  ;;  %v2401_v6 = vpack.c.bf16 %v1908_v3, %v1907_v2  ;;  %v1852_v7 = vld [vmem:[%s2985_s0 + $0xd8] sm:$0xff]  ;;  %v1893_v8 = vld [vmem:[%s2985_s0 + $0x60] sm:$0xff] }
  0x14   :  { %2092 = vmatmul.mubr.msk.f32.vlgmr.msra.gmra.mrb[4].mxu1 %vm38_vm0, %v1764_v25  ;;  %2342 = vmatprep.subr.bf16.mxu0 %v2333_v22  ;;  %v1894_v9 = vld [vmem:[%s2985_s0 + $0x68] sm:$0xff]  ;;  %v1895_v10 = vld [vmem:[%s2985_s0 + $0x70] sm:$0xff]  ;;  %v1896_v11 = vld [vmem:[%s2985_s0 + $0x78] sm:$0xff] }
  0x15   :  { %2120 = vmatmul.mubr.msk.f32.vlgmr.msra.gmra.mrb[0].mxu0 %vm38_vm0, %v1764_v25  ;;  %2328 = vmatpush3.bf16.msra.mxu1 %v2325_v21  ;;  %v1897_v12 = vld [vmem:[%s2985_s0 + $0xe0] sm:$0xff]  ;;  %v1898_v13 = vld [vmem:[%s2985_s0 + $0xe8] sm:$0xff]  ;;  %v1899_v14 = vld [vmem:[%s2985_s0 + $0xf0] sm:$0xff] }
  0x16   :  { %2344 = vmatpush3.bf16.msra.mxu0 %v2333_v22  ;;  %2094 = vmatprep.mubr.msk.f32.mxu1 %vm38_vm0, %v1765_v28  ;;  %v1900_v15 = vld [vmem:[%s2985_s0 + $0xf8] sm:$0xff]  ;;  %v2721_v20 = vld [vmem:[%s2986_s2 + $0x1] ss:$0 sm:$0xff] }
  0x17   :  { %2122 = vmatprep.mubr.msk.f32.mxu0 %vm38_vm0, %v1765_v28  ;;  %2330 = vmatprep.subr.bf16.mxu1 %v2329_v29  ;;  %v1789_v35 = vld [vmem:[%s2987_s3 + $0x80] sm:$0xff] }
  0x18   :  { %2095 = vmatmul.mubr.msk.f32.gmra.mrb[6].mxu1 %vm38_vm0, %v1766_v31  ;;  %2346 = vmatprep.subr.bf16.mxu0 %v2337_v30  ;;  %v435_v38 = vld [vmem:[%s2987_s3] sm:$0xff] }
  0x19   :  { %2123 = vmatmul.mubr.msk.f32.gmra.mrb[2].mxu0 %vm38_vm0, %v1766_v31  ;;  %2332 = vmatpush3.bf16.msra.mxu1 %v2329_v29 }
  0x1a   :  { %2348 = vmatpush3.bf16.msra.mxu0 %v2337_v30  ;;  %2133 = vmatprep.mubr.msk.f32.mxu1 %vm38_vm0, %v1797_v32 }
  0x1b   :  { %2161 = vmatprep.mubr.msk.f32.mxu0 %vm38_vm0, %v1797_v32  ;;  %2334 = vmatprep.subr.bf16.mxu1 %v2333_v22  ;;  %v436_v32 = vld [vmem:[%s2987_s3 + $0x8] sm:$0xff] }
  0x1c   :  { %2134 = vmatmul.mubr.msk.f32.vlgmr.msra.gmra.mrb[8].mxu1 %vm38_vm0, %v1798_v33  ;;  %2350 = vmatprep.subr.bf16.mxu0 %v2325_v21 }
  0x1d   :  { %2162 = vmatmul.mubr.msk.f32.vlgmr.msra.gmra.mrb[4].mxu0 %vm38_vm0, %v1798_v33  ;;  %2336 = vmatpush3.bf16.msra.mxu1 %v2333_v22 }
  0x1e   :  { %2352 = vmatpush3.bf16.msra.mxu0 %v2325_v21  ;;  %2136 = vmatprep.mubr.msk.f32.mxu1 %vm38_vm0, %v1799_v34  ;;  %v2726_v21 = vld [vmem:[%s2986_s2] ss:$0 sm:$0xff] }
  0x1f   :  { %2164 = vmatprep.mubr.msk.f32.mxu0 %vm38_vm0, %v1799_v34  ;;  %2338 = vmatprep.subr.bf16.mxu1 %v2337_v30 }
  0x20   :  { %2137 = vmatmul.mubr.msk.f32.gmra.mrb[10].mxu1 %vm38_vm0, %v1800_v37  ;;  %2354 = vmatprep.subr.bf16.mxu0 %v2329_v29 }
  0x21   :  { %2165 = vmatmul.mubr.msk.f32.gmra.mrb[6].mxu0 %vm38_vm0, %v1800_v37  ;;  %2340 = vmatpush3.bf16.msra.mxu1 %v2337_v30  ;;  %v1790_v30 = vld [vmem:[%s2987_s3 + $0x88] sm:$0xff] }
  0x22   :  { %2356 = vmatpush3.bf16.msra.mxu0 %v2329_v29  ;;  %2147 = vmatprep.mubr.msk.f32.mxu1 %vm38_vm0, %v1801_v40 }
  0x23   :  { %2175 = vmatprep.mubr.msk.f32.mxu0 %vm38_vm0, %v1801_v40  ;;  %2358 = vmatprep.subr.bf16.mxu1 %v2357_v41 }
  0x24   :  { %2148 = vmatmul.mubr.msk.f32.vlgmr.msra.gmra.mrb[12].mxu1 %vm38_vm0, %v1802_v45  ;;  %2374 = vmatprep.subr.bf16.mxu0 %v2365_v42 }
  0x25   :  { %2176 = vmatmul.mubr.msk.f32.vlgmr.msra.gmra.mrb[4].mxu0 %vm38_vm0, %v1802_v45  ;;  %2360 = vmatpush3.bf16.msra.mxu1 %v2357_v41 }
  0x26   :  { %2376 = vmatpush3.bf16.msra.mxu0 %v2365_v42  ;;  %2150 = vmatprep.mubr.msk.f32.mxu1 %vm38_vm0, %v1803_v48 }
  0x27   :  { %2178 = vmatprep.mubr.msk.f32.mxu0 %vm38_vm0, %v1803_v48  ;;  %2362 = vmatprep.subr.bf16.mxu1 %v2361_v49 }
  0x28   :  { %2151 = vmatmul.mubr.msk.f32.gmra.mrb[14].mxu1 %vm38_vm0, %v1804_v51  ;;  %2378 = vmatprep.subr.bf16.mxu0 %v2369_v50 }
  0x29   :  { %2179 = vmatmul.mubr.msk.f32.gmra.mrb[6].mxu0 %vm38_vm0, %v1804_v51  ;;  %2364 = vmatpush3.bf16.msra.mxu1 %v2361_v49  ;;  %v1792_v51 = vld [vmem:[%s2987_s3 + $0x98] sm:$0xff] }
  0x2a   :  { %2380 = vmatpush3.bf16.msra.mxu0 %v2369_v50  ;;  %2189 = vmatprep.mubr.msk.f32.mxu1 %vm38_vm0, %v1845_v52 }
  0x2b   :  { %2217 = vmatprep.mubr.msk.f32.mxu0 %vm38_vm0, %v1845_v52  ;;  %2366 = vmatprep.subr.bf16.mxu1 %v2365_v42 }
  0x2c   :  { %2190 = vmatmul.mubr.msk.f32.vlgmr.msra.gmra.mrb[16].mxu1 %vm38_vm0, %v1846_v53  ;;  %2382 = vmatprep.subr.bf16.mxu0 %v2357_v41 }
  0x2d   :  { %2218 = vmatmul.mubr.msk.f32.vlgmr.msra.gmra.mrb[8].mxu0 %vm38_vm0, %v1846_v53  ;;  %2368 = vmatpush3.bf16.msra.mxu1 %v2365_v42 }
  0x2e   :  { %2384 = vmatpush3.bf16.msra.mxu0 %v2357_v41  ;;  %2192 = vmatprep.mubr.msk.f32.mxu1 %vm38_vm0, %v1847_v54 }
  0x2f   :  { %2220 = vmatprep.mubr.msk.f32.mxu0 %vm38_vm0, %v1847_v54  ;;  %2370 = vmatprep.subr.bf16.mxu1 %v2369_v50  ;;  %v438_v54 = vld [vmem:[%s2987_s3 + $0x18] sm:$0xff] }
  0x30   :  { %2193 = vmatmul.mubr.msk.f32.gmra.mrb[18].mxu1 %vm38_vm0, %v1848_v57  ;;  %2386 = vmatprep.subr.bf16.mxu0 %v2361_v49 }
  0x31   :  { %2221 = vmatmul.mubr.msk.f32.gmra.mrb[10].mxu0 %vm38_vm0, %v1848_v57  ;;  %2372 = vmatpush3.bf16.msra.mxu1 %v2369_v50  ;;  %v1791_v57 = vld [vmem:[%s2987_s3 + $0x90] sm:$0xff] }
  0x32   :  { %2388 = vmatpush3.bf16.msra.mxu0 %v2361_v49  ;;  %2203 = vmatprep.mubr.msk.f32.mxu1 %vm38_vm0, %v1849_v60 }
  0x33   :  { %2231 = vmatprep.mubr.msk.f32.mxu0 %vm38_vm0, %v1849_v60  ;;  %2390 = vmatprep.subr.bf16.mxu1 %v2389_v61  ;;  %v437_v60 = vld [vmem:[%s2987_s3 + $0x10] sm:$0xff] }
  0x34   :  { %2204 = vmatmul.mubr.msk.f32.vlgmr.msra.gmra.mrb[20].mxu1 %vm38_vm0, %v1850_v1  ;;  %2406 = vmatprep.subr.bf16.mxu0 %v2397_v62 }
  0x35   :  { %2232 = vmatmul.mubr.msk.f32.vlgmr.msra.gmra.mrb[8].mxu0 %vm38_vm0, %v1850_v1  ;;  %2392 = vmatpush3.bf16.msra.mxu1 %v2389_v61 }
  0x36   :  { %2408 = vmatpush3.bf16.msra.mxu0 %v2397_v62  ;;  %2206 = vmatprep.mubr.msk.f32.mxu1 %vm38_vm0, %v1851_v4 }
  0x37   :  { %2234 = vmatprep.mubr.msk.f32.mxu0 %vm38_vm0, %v1851_v4  ;;  %2394 = vmatprep.subr.bf16.mxu1 %v2393_v5 }
  0x38   :  { %2207 = vmatmul.mubr.msk.f32.gmra.mrb[22].mxu1 %vm38_vm0, %v1852_v7  ;;  %2410 = vmatprep.subr.bf16.mxu0 %v2401_v6 }
  0x39   :  { %2235 = vmatmul.mubr.msk.f32.gmra.mrb[10].mxu0 %vm38_vm0, %v1852_v7  ;;  %2396 = vmatpush3.bf16.msra.mxu1 %v2393_v5 }
  0x3a   :  { %2412 = vmatpush3.bf16.msra.mxu0 %v2401_v6  ;;  %2245 = vmatprep.mubr.msk.f32.mxu1 %vm38_vm0, %v1893_v8 }
  0x3b   :  { %2273 = vmatprep.mubr.msk.f32.mxu0 %vm38_vm0, %v1893_v8  ;;  %2398 = vmatprep.subr.bf16.mxu1 %v2397_v62 }
  0x3c   :  { %2246 = vmatmul.mubr.msk.f32.vlgmr.msra.gmra.mrb[24].mxu1 %vm38_vm0, %v1894_v9  ;;  %2414 = vmatprep.subr.bf16.mxu0 %v2389_v61 }
  0x3d   :  { %2274 = vmatmul.mubr.msk.f32.vlgmr.msra.gmra.mrb[12].mxu0 %vm38_vm0, %v1894_v9  ;;  %2400 = vmatpush3.bf16.msra.mxu1 %v2397_v62 }
  0x3e   :  { %2416 = vmatpush3.bf16.msra.mxu0 %v2389_v61  ;;  %2248 = vmatprep.mubr.msk.f32.mxu1 %vm38_vm0, %v1895_v10 }
  0x3f   :  { %2276 = vmatprep.mubr.msk.f32.mxu0 %vm38_vm0, %v1895_v10  ;;  %2402 = vmatprep.subr.bf16.mxu1 %v2401_v6 }
  0x40   :  { %2249 = vmatmul.mubr.msk.f32.gmra.mrb[26].mxu1 %vm38_vm0, %v1896_v11  ;;  %2418 = vmatprep.subr.bf16.mxu0 %v2393_v5 }
  0x41   :  { %2277 = vmatmul.mubr.msk.f32.gmra.mrb[14].mxu0 %vm38_vm0, %v1896_v11  ;;  %2404 = vmatpush3.bf16.msra.mxu1 %v2401_v6 }
  0x42   :  { %2420 = vmatpush3.bf16.msra.mxu0 %v2393_v5  ;;  %2259 = vmatprep.mubr.msk.f32.mxu1 %vm38_vm0, %v1897_v12 }
  0x43   :  { %2287 = vmatprep.mubr.msk.f32.mxu0 %vm38_vm0, %v1897_v12 }
  0x44   :  { %2260 = vmatmul.mubr.msk.f32.vlgmr.msra.gmra.mrb[28].mxu1 %vm38_vm0, %v1898_v13 }
  0x45   :  { %2288 = vmatmul.mubr.msk.f32.vlgmr.msra.gmra.mrb[12].mxu0 %vm38_vm0, %v1898_v13  ;;  %2262 = vmatprep.mubr.msk.f32.mxu1 %vm38_vm0, %v1899_v14 }
  0x46   :  { %2290 = vmatprep.mubr.msk.f32.mxu0 %vm38_vm0, %v1899_v14  ;;  %v1834_v14 = vld [vmem:[%s2987_s3 + $0xa8] sm:$0xff] }
  0x48   :  { %2263 = vmatmul.mubr.msk.f32.gmra.mrb[30].mxu1 %vm38_vm0, %v1900_v15 }
  0x49   :  { %2291 = vmatmul.mubr.msk.f32.gmra.mrb[14].mxu0 %vm38_vm0, %v1900_v15 }
  0xdf   :  { %v2079_v16 = vpop.f32.mrb[0].mxu1 }
  0xe0   :  { %v117_v17 = vpop.f32.mrb[1].mxu1 }
  0xe3   :  { %v2082_v18 = vpop.f32.mrb[2].mxu1 }
  0xe4   :  { %v127_v19 = vpop.f32.mrb[3].mxu1 }
  0xe7   :  { %v2093_v22 = vpop.f32.mrb[4].mxu1 }
  0xe8   :  { %v234_v23 = vsub.f32 %v2079_v16, %v2093_v22  ;;  %v2121_v24 = vpop.f32.mrb[0].mxu0  ;;  %v214_v25 = vpop.f32.mrb[5].mxu1  ;;  %v1830_v16 = vld [vmem:[%s2987_s3 + $0x28] sm:$0xff] }
  0xe9   :  { %v424_v26 = vadd.f32 %v2121_v24, %v2721_v20  ;;  %v233_v27 = vsub.f32 %v117_v17, %v214_v25  ;;  %v398_v28 = vpop.f32.mrb[1].mxu0  ;;  %v1829_v24 = vld [vmem:[%s2987_s3 + $0x20] sm:$0xff] }
  0xea   :  { %v244_v29 = vadd.f32 %v2726_v21, %v234_v23  ;;  %v423_v31 = vadd.f32 %v2721_v20, %v398_v28 }
  0xeb   :  { %v432_v33 = vmax.f32 %v424_v26, 0.0  ;;  %v243_v34 = vadd.f32 %v2726_v21, %v233_v27  ;;  %v2096_v36 = vpop.f32.mrb[6].mxu1 }
  0xec   :  { %v428_v37 = vmax.f32 %v244_v29, 0.0  ;;  %v431_v39 = vmax.f32 %v423_v31, 0.0  ;;  %v236_v40 = vsub.f32 %v2082_v18, %v2096_v36  ;;  %v2124_v41 = vpop.f32.mrb[2].mxu0  ;;  %v224_v42 = vpop.f32.mrb[7].mxu1 }
  0xed   :  { %v449_v43 = vadd.f32 %v1790_v30, %v432_v33  ;;  %v427_v44 = vmax.f32 %v243_v34, 0.0  ;;  %v426_v45 = vadd.f32 %v2124_v41, %v2721_v20  ;;  %v235_v46 = vsub.f32 %v127_v19, %v224_v42  ;;  %v408_v47 = vpop.f32.mrb[3].mxu0  ;;  %v1833_v19 = vld [vmem:[%s2987_s3 + $0xa0] sm:$0xff] }
  0xee   :  { %v440_v48 = vadd.f32 %v436_v32, %v428_v37  ;;  %v448_v49 = vadd.f32 %v1789_v35, %v431_v39  ;;  %v246_v50 = vadd.f32 %v2726_v21, %v236_v40  ;;  %v425_v52 = vadd.f32 %v2721_v20, %v408_v47  ;;  %v1836_v37 = vld [vmem:[%s2987_s3 + $0xb8] sm:$0xff] }
  0xef   :  { %1794 = vst.msk [vmem:[%s2988_s4 + $0x88] sm:$0xff] %vm452_vm1, %v449_v43  ;;  %v439_v53 = vadd.f32 %v435_v38, %v427_v44  ;;  %v434_v55 = vmax.f32 %v426_v45, 0.0  ;;  %v245_v56 = vadd.f32 %v2726_v21, %v235_v46  ;;  %v2135_v58 = vpop.f32.mrb[8].mxu1  ;;  %v1832_v40 = vld [vmem:[%s2987_s3 + $0x38] sm:$0xff]  ;;  %v1835_v43 = vld [vmem:[%s2987_s3 + $0xb0] sm:$0xff] }
  0xf0   :  { %454 = vst.msk [vmem:[%s2988_s4 + $0x8] sm:$0xff] %vm452_vm1, %v440_v48  ;;  %1793 = vst.msk [vmem:[%s2988_s4 + $0x80] sm:$0xff] %vm452_vm1, %v448_v49  ;;  %v430_v59 = vmax.f32 %v246_v50, 0.0  ;;  %v433_v61 = vmax.f32 %v425_v52, 0.0  ;;  %v560_v62 = vpop.f32.mrb[9].mxu1  ;;  %v1831_v46 = vld [vmem:[%s2987_s3 + $0x30] sm:$0xff] }
  0xf1   :  { %453 = vst.msk [vmem:[%s2988_s4] sm:$0xff] %vm452_vm1, %v439_v53  ;;  %v451_v63 = vadd.f32 %v1792_v51, %v434_v55  ;;  %v429_v0 = vmax.f32 %v245_v56, 0.0 }
  0xf2   :  { %v442_v1 = vadd.f32 %v438_v54, %v430_v59  ;;  %v450_v2 = vadd.f32 %v1791_v57, %v433_v61 }
  0xf3   :  { %1796 = vst.msk [vmem:[%s2988_s4 + $0x98] sm:$0xff] %vm452_vm1, %v451_v63  ;;  %v441_v3 = vadd.f32 %v437_v60, %v429_v0  ;;  %v2138_v4 = vpop.f32.mrb[10].mxu1  ;;  %v1882_v0 = vld [vmem:[%s2987_s3 + $0xc8] sm:$0xff] }
  0xf4   :  { %456 = vst.msk [vmem:[%s2988_s4 + $0x18] sm:$0xff] %vm452_vm1, %v442_v1  ;;  %1795 = vst.msk [vmem:[%s2988_s4 + $0x90] sm:$0xff] %vm452_vm1, %v450_v2  ;;  %v570_v5 = vpop.f32.mrb[11].mxu1  ;;  %v1878_v2 = vld [vmem:[%s2987_s3 + $0x48] sm:$0xff] }
  0xf5   :  { %455 = vst.msk [vmem:[%s2988_s4 + $0x10] sm:$0xff] %vm452_vm1, %v441_v3 }
  0xf7   :  { %v2149_v6 = vpop.f32.mrb[12].mxu1 }
  0xf8   :  { %v677_v7 = vsub.f32 %v2135_v58, %v2149_v6  ;;  %v2177_v8 = vpop.f32.mrb[4].mxu0  ;;  %v657_v9 = vpop.f32.mrb[13].mxu1 }
  0xf9   :  { %v855_v10 = vadd.f32 %v2177_v8, %v2721_v20  ;;  %v676_v11 = vsub.f32 %v560_v62, %v657_v9  ;;  %v835_v12 = vpop.f32.mrb[5].mxu0  ;;  %v1877_v8 = vld [vmem:[%s2987_s3 + $0x40] sm:$0xff] }
  0xfa   :  { %v681_v13 = vadd.f32 %v2726_v21, %v677_v7  ;;  %v854_v15 = vadd.f32 %v2721_v20, %v835_v12 }
  0xfb   :  { %v863_v17 = vmax.f32 %v855_v10, 0.0  ;;  %v680_v18 = vadd.f32 %v2726_v21, %v676_v11  ;;  %v2152_v22 = vpop.f32.mrb[14].mxu1 }
  0xfc   :  { %v859_v23 = vmax.f32 %v681_v13, 0.0  ;;  %v862_v25 = vmax.f32 %v854_v15, 0.0  ;;  %v679_v26 = vsub.f32 %v2138_v4, %v2152_v22  ;;  %v2180_v27 = vpop.f32.mrb[6].mxu0  ;;  %v667_v28 = vpop.f32.mrb[15].mxu1 }
  0xfd   :  { %v881_v29 = vadd.f32 %v1834_v14, %v863_v17  ;;  %v858_v30 = vmax.f32 %v680_v18, 0.0  ;;  %v857_v31 = vadd.f32 %v2180_v27, %v2721_v20  ;;  %v678_v32 = vsub.f32 %v570_v5, %v667_v28  ;;  %v845_v33 = vpop.f32.mrb[7].mxu0  ;;  %v1881_v5 = vld [vmem:[%s2987_s3 + $0xc0] sm:$0xff] }
  0xfe   :  { %v872_v34 = vadd.f32 %v1830_v16, %v859_v23  ;;  %v880_v35 = vadd.f32 %v1833_v19, %v862_v25  ;;  %v683_v36 = vadd.f32 %v2726_v21, %v679_v26  ;;  %v856_v38 = vadd.f32 %v2721_v20, %v845_v33  ;;  %v1884_v23 = vld [vmem:[%s2987_s3 + $0xd8] sm:$0xff] }
  0xff   :  { %1842 = vst.msk [vmem:[%s2988_s4 + $0xa8] sm:$0xff] %vm452_vm1, %v881_v29  ;;  %v871_v39 = vadd.f32 %v1829_v24, %v858_v30  ;;  %v865_v41 = vmax.f32 %v857_v31, 0.0  ;;  %v682_v42 = vadd.f32 %v2726_v21, %v678_v32  ;;  %v2191_v44 = vpop.f32.mrb[16].mxu1  ;;  %v1880_v26 = vld [vmem:[%s2987_s3 + $0x58] sm:$0xff]  ;;  %v1883_v29 = vld [vmem:[%s2987_s3 + $0xd0] sm:$0xff] }
 0x100   :  { %1838 = vst.msk [vmem:[%s2988_s4 + $0x28] sm:$0xff] %vm452_vm1, %v872_v34  ;;  %1841 = vst.msk [vmem:[%s2988_s4 + $0xa0] sm:$0xff] %vm452_vm1, %v880_v35  ;;  %v861_v45 = vmax.f32 %v683_v36, 0.0  ;;  %v864_v47 = vmax.f32 %v856_v38, 0.0  ;;  %v992_v48 = vpop.f32.mrb[17].mxu1  ;;  %v1879_v32 = vld [vmem:[%s2987_s3 + $0x50] sm:$0xff] }
 0x101   :  { %1837 = vst.msk [vmem:[%s2988_s4 + $0x20] sm:$0xff] %vm452_vm1, %v871_v39  ;;  %v883_v49 = vadd.f32 %v1836_v37, %v865_v41  ;;  %v860_v50 = vmax.f32 %v682_v42, 0.0 }
 0x102   :  { %v874_v51 = vadd.f32 %v1832_v40, %v861_v45  ;;  %v882_v52 = vadd.f32 %v1835_v43, %v864_v47 }
 0x103   :  { %1844 = vst.msk [vmem:[%s2988_s4 + $0xb8] sm:$0xff] %vm452_vm1, %v883_v49  ;;  %v873_v53 = vadd.f32 %v1831_v46, %v860_v50  ;;  %v2194_v54 = vpop.f32.mrb[18].mxu1  ;;  %v1930_v50 = vld [vmem:[%s2987_s3 + $0xe8] sm:$0xff] }
 0x104   :  { %1840 = vst.msk [vmem:[%s2988_s4 + $0x38] sm:$0xff] %vm452_vm1, %v874_v51  ;;  %1843 = vst.msk [vmem:[%s2988_s4 + $0xb0] sm:$0xff] %vm452_vm1, %v882_v52  ;;  %v1002_v55 = vpop.f32.mrb[19].mxu1  ;;  %v1926_v52 = vld [vmem:[%s2987_s3 + $0x68] sm:$0xff] }
 0x105   :  { %1839 = vst.msk [vmem:[%s2988_s4 + $0x30] sm:$0xff] %vm452_vm1, %v873_v53 }
 0x107   :  { %v2205_v56 = vpop.f32.mrb[20].mxu1 }
 0x108   :  { %v1109_v57 = vsub.f32 %v2191_v44, %v2205_v56  ;;  %v2233_v58 = vpop.f32.mrb[8].mxu0  ;;  %v1089_v59 = vpop.f32.mrb[21].mxu1 }
 0x109   :  { %v1287_v60 = vadd.f32 %v2233_v58, %v2721_v20  ;;  %v1108_v61 = vsub.f32 %v992_v48, %v1089_v59  ;;  %v1267_v62 = vpop.f32.mrb[9].mxu0  ;;  %v1925_v58 = vld [vmem:[%s2987_s3 + $0x60] sm:$0xff] }
 0x10a   :  { %v1113_v63 = vadd.f32 %v2726_v21, %v1109_v57  ;;  %v1286_v1 = vadd.f32 %v2721_v20, %v1267_v62 }
 0x10b   :  { %v1295_v3 = vmax.f32 %v1287_v60, 0.0  ;;  %v1112_v4 = vadd.f32 %v2726_v21, %v1108_v61  ;;  %v2208_v6 = vpop.f32.mrb[22].mxu1 }
 0x10c   :  { %v1291_v7 = vmax.f32 %v1113_v63, 0.0  ;;  %v1294_v9 = vmax.f32 %v1286_v1, 0.0  ;;  %v1111_v10 = vsub.f32 %v2194_v54, %v2208_v6  ;;  %v2236_v11 = vpop.f32.mrb[10].mxu0  ;;  %v1099_v12 = vpop.f32.mrb[23].mxu1 }
 0x10d   :  { %v1313_v13 = vadd.f32 %v1882_v0, %v1295_v3  ;;  %v1290_v14 = vmax.f32 %v1112_v4, 0.0  ;;  %v1289_v15 = vadd.f32 %v2236_v11, %v2721_v20  ;;  %v1110_v16 = vsub.f32 %v1002_v55, %v1099_v12  ;;  %v1277_v17 = vpop.f32.mrb[11].mxu0  ;;  %v1929_v55 = vld [vmem:[%s2987_s3 + $0xe0] sm:$0xff] }
 0x10e   :  { %v1304_v18 = vadd.f32 %v1878_v2, %v1291_v7  ;;  %v1312_v19 = vadd.f32 %v1881_v5, %v1294_v9  ;;  %v1115_v22 = vadd.f32 %v2726_v21, %v1111_v10  ;;  %v1288_v24 = vadd.f32 %v2721_v20, %v1277_v17  ;;  %v1932_v7 = vld [vmem:[%s2987_s3 + $0xf8] sm:$0xff] }
 0x10f   :  { %1890 = vst.msk [vmem:[%s2988_s4 + $0xc8] sm:$0xff] %vm452_vm1, %v1313_v13  ;;  %v1303_v25 = vadd.f32 %v1877_v8, %v1290_v14  ;;  %v1297_v27 = vmax.f32 %v1289_v15, 0.0  ;;  %v1114_v28 = vadd.f32 %v2726_v21, %v1110_v16  ;;  %v2247_v30 = vpop.f32.mrb[24].mxu1  ;;  %v1928_v10 = vld [vmem:[%s2987_s3 + $0x78] sm:$0xff]  ;;  %v1931_v13 = vld [vmem:[%s2987_s3 + $0xf0] sm:$0xff] }
 0x110   :  { %1886 = vst.msk [vmem:[%s2988_s4 + $0x48] sm:$0xff] %vm452_vm1, %v1304_v18  ;;  %1889 = vst.msk [vmem:[%s2988_s4 + $0xc0] sm:$0xff] %vm452_vm1, %v1312_v19  ;;  %v1293_v31 = vmax.f32 %v1115_v22, 0.0  ;;  %v1296_v33 = vmax.f32 %v1288_v24, 0.0  ;;  %v1424_v34 = vpop.f32.mrb[25].mxu1  ;;  %v1927_v14 = vld [vmem:[%s2987_s3 + $0x70] sm:$0xff] }
 0x111   :  { %1885 = vst.msk [vmem:[%s2988_s4 + $0x40] sm:$0xff] %vm452_vm1, %v1303_v25  ;;  %v1315_v35 = vadd.f32 %v1884_v23, %v1297_v27  ;;  %v1292_v36 = vmax.f32 %v1114_v28, 0.0 }
 0x112   :  { %v1306_v37 = vadd.f32 %v1880_v26, %v1293_v31  ;;  %v1314_v38 = vadd.f32 %v1883_v29, %v1296_v33 }
 0x113   :  { %1892 = vst.msk [vmem:[%s2988_s4 + $0xd8] sm:$0xff] %vm452_vm1, %v1315_v35  ;;  %v1305_v39 = vadd.f32 %v1879_v32, %v1292_v36  ;;  %v2250_v40 = vpop.f32.mrb[26].mxu1 }
 0x114   :  { %1888 = vst.msk [vmem:[%s2988_s4 + $0x58] sm:$0xff] %vm452_vm1, %v1306_v37  ;;  %1891 = vst.msk [vmem:[%s2988_s4 + $0xd0] sm:$0xff] %vm452_vm1, %v1314_v38  ;;  %v1434_v41 = vpop.f32.mrb[27].mxu1 }
 0x115   :  { %1887 = vst.msk [vmem:[%s2988_s4 + $0x50] sm:$0xff] %vm452_vm1, %v1305_v39 }
 0x117   :  { %v2261_v42 = vpop.f32.mrb[28].mxu1 }
 0x118   :  { %v1541_v43 = vsub.f32 %v2247_v30, %v2261_v42  ;;  %v2289_v44 = vpop.f32.mrb[12].mxu0  ;;  %v1521_v45 = vpop.f32.mrb[29].mxu1 }
 0x119   :  { %v1719_v46 = vadd.f32 %v2289_v44, %v2721_v20  ;;  %v1540_v47 = vsub.f32 %v1424_v34, %v1521_v45  ;;  %v1699_v48 = vpop.f32.mrb[13].mxu0 }
 0x11a   :  { %v1545_v49 = vadd.f32 %v2726_v21, %v1541_v43  ;;  %v1718_v51 = vadd.f32 %v2721_v20, %v1699_v48 }
 0x11b   :  { %v1727_v53 = vmax.f32 %v1719_v46, 0.0  ;;  %v1544_v54 = vadd.f32 %v2726_v21, %v1540_v47  ;;  %v2264_v56 = vpop.f32.mrb[30].mxu1 }
 0x11c   :  { %v1723_v57 = vmax.f32 %v1545_v49, 0.0  ;;  %v1726_v59 = vmax.f32 %v1718_v51, 0.0  ;;  %v1543_v60 = vsub.f32 %v2250_v40, %v2264_v56  ;;  %v2292_v61 = vpop.f32.mrb[14].mxu0  ;;  %v1531_v62 = vpop.f32.mrb[31].mxu1 }
 0x11d   :  { %v1745_v63 = vadd.f32 %v1930_v50, %v1727_v53  ;;  %v1722_v0 = vmax.f32 %v1544_v54, 0.0  ;;  %v1721_v1 = vadd.f32 %v2292_v61, %v2721_v20  ;;  %v1542_v2 = vsub.f32 %v1434_v41, %v1531_v62  ;;  %v1709_v3 = vpop.f32.mrb[15].mxu0 }
 0x11e   :  { %v1736_v4 = vadd.f32 %v1926_v52, %v1723_v57  ;;  %v1744_v5 = vadd.f32 %v1929_v55, %v1726_v59  ;;  %v1547_v6 = vadd.f32 %v2726_v21, %v1543_v60  ;;  %v1720_v8 = vadd.f32 %v2721_v20, %v1709_v3 }
 0x11f   :  { %1938 = vst.msk [vmem:[%s2988_s4 + $0xe8] sm:$0xff] %vm452_vm1, %v1745_v63  ;;  %v1735_v9 = vadd.f32 %v1925_v58, %v1722_v0  ;;  %v1729_v11 = vmax.f32 %v1721_v1, 0.0  ;;  %v1546_v12 = vadd.f32 %v2726_v21, %v1542_v2 }
 0x120   :  { %1934 = vst.msk [vmem:[%s2988_s4 + $0x68] sm:$0xff] %vm452_vm1, %v1736_v4  ;;  %1937 = vst.msk [vmem:[%s2988_s4 + $0xe0] sm:$0xff] %vm452_vm1, %v1744_v5  ;;  %v1725_v20 = vmax.f32 %v1547_v6, 0.0  ;;  %v1728_v21 = vmax.f32 %v1720_v8, 0.0 }
 0x121   :  { %1933 = vst.msk [vmem:[%s2988_s4 + $0x60] sm:$0xff] %vm452_vm1, %v1735_v9  ;;  %v1747_v15 = vadd.f32 %v1932_v7, %v1729_v11  ;;  %v1724_v16 = vmax.f32 %v1546_v12, 0.0 }
 0x122   :  { %v1738_v17 = vadd.f32 %v1928_v10, %v1725_v20  ;;  %v1746_v18 = vadd.f32 %v1931_v13, %v1728_v21 }
 0x123   :  { %1940 = vst.msk [vmem:[%s2988_s4 + $0xf8] sm:$0xff] %vm452_vm1, %v1747_v15  ;;  %v1737_v19 = vadd.f32 %v1927_v14, %v1724_v16 }
 0x124   :  { %1936 = vst.msk [vmem:[%s2988_s4 + $0x78] sm:$0xff] %vm452_vm1, %v1738_v17  ;;  %1939 = vst.msk [vmem:[%s2988_s4 + $0xf0] sm:$0xff] %vm452_vm1, %v1746_v18 }
 0x125   :  { %1935 = vst.msk [vmem:[%s2988_s4 + $0x70] sm:$0xff] %vm452_vm1, %v1737_v19 }

// kernel: ccnn2_forward.11
= control target key start
LH: loop header
LB: loop body
LE: loop exit
PB: predicated region body
PF: predicated region fallthrough
CT: control target
= control target key end

     0   :  { %vm55_vm0 = vcmask 130048   ;;  %vm792_vm1 = vcmask 7168   ;;  %s6099_s1 = inlined_call_operand.vmem [shape: f32[2,4,16,1], index: 1, kind: input, shape index: {}]   ;;  %s6100_s0 = inlined_call_operand.vmem [shape: f32[2,4,128,16], index: 0, kind: input, shape index: {}]   ;;  %s6101_s2 = inlined_call_operand.vmem [shape: f32[2,1,1], index: 2, kind: input, shape index: {}]   ;;  %s6102_s3 = inlined_call_operand.vmem [shape: f32[2,4,128,1], index: 3, kind: output, shape index: {}]  }
   0x1   :  { %v50_v0 = vld [vmem:[%s6099_s1] sm:$0xff]  ;;  %v51_v1 = vld [vmem:[%s6099_s1 + $0x8] sm:$0xff]  ;;  %v19_v8 = vld [vmem:[%s6100_s0 + $0x10] sm:$0xff] }
   0x2   :  { %v3241_v2 = vld [vmem:[%s6099_s1 + $0x40] sm:$0xff]  ;;  %v4457_v3 = vpack.c.bf16 %v51_v1, %v50_v0  ;;  %v3242_v4 = vld [vmem:[%s6099_s1 + $0x48] sm:$0xff]  ;;  %v3357_v9 = vld [vmem:[%s6099_s1 + $0x10] sm:$0xff] }
   0x3   :  { %v17_v5 = vld [vmem:[%s6100_s0] sm:$0xff]  ;;  %v4461_v6 = vpack.c.bf16 %v3242_v4, %v3241_v2  ;;  %v18_v7 = vld [vmem:[%s6100_s0 + $0x8] sm:$0xff]  ;;  %v3358_v10 = vld [vmem:[%s6099_s1 + $0x18] sm:$0xff] }
   0x4   :  { %4013 = vmatprep.mubr.msk.f32.mxu1 %vm55_vm0, %v17_v5  ;;  %4069 = vmatprep.mubr.msk.f32.mxu0 %vm55_vm0, %v17_v5  ;;  %v20_v11 = vld [vmem:[%s6100_s0 + $0x18] sm:$0xff]  ;;  %v4639_v12 = vpack.c.bf16 %v3358_v10, %v3357_v9  ;;  %v3359_v13 = vld [vmem:[%s6099_s1 + $0x50] sm:$0xff]  ;;  %v21_v15 = vld [vmem:[%s6100_s0 + $0x20] sm:$0xff] }
   0x5   :  { %4458 = vmatprep.subr.bf16.mxu1 %v4457_v3  ;;  %4466 = vmatprep.subr.bf16.mxu0 %v4461_v6  ;;  %v3360_v14 = vld [vmem:[%s6099_s1 + $0x58] sm:$0xff]  ;;  %v22_v17 = vld [vmem:[%s6100_s0 + $0x28] sm:$0xff]  ;;  %v23_v18 = vld [vmem:[%s6100_s0 + $0x30] sm:$0xff] }
   0x6   :  { %4460 = vmatpush3.bf16.msra.mxu1 %v4457_v3  ;;  %4468 = vmatpush3.bf16.msra.mxu0 %v4461_v6  ;;  %v4652_v16 = vpack.c.bf16 %v3360_v14, %v3359_v13  ;;  %v24_v19 = vld [vmem:[%s6100_s0 + $0x38] sm:$0xff]  ;;  %v25_v20 = vld [vmem:[%s6100_s0 + $0x40] sm:$0xff]  ;;  %v26_v21 = vld [vmem:[%s6100_s0 + $0x48] sm:$0xff] }
   0x7   :  { %4462 = vmatprep.subr.bf16.mxu1 %v4461_v6  ;;  %4470 = vmatprep.subr.bf16.mxu0 %v4457_v3  ;;  %v27_v22 = vld [vmem:[%s6100_s0 + $0x50] sm:$0xff]  ;;  %v28_v23 = vld [vmem:[%s6100_s0 + $0x58] sm:$0xff]  ;;  %v29_v24 = vld [vmem:[%s6100_s0 + $0x60] sm:$0xff] }
   0x8   :  { %v30_v25 = vld [vmem:[%s6100_s0 + $0x68] sm:$0xff]  ;;  %v31_v26 = vld [vmem:[%s6100_s0 + $0x70] sm:$0xff]  ;;  %v32_v27 = vld [vmem:[%s6100_s0 + $0x78] sm:$0xff] }
   0x9   :  { %4014 = vmatmul.mubr.msk.f32.vlgmr.msra.gmra.mrb[0].mxu1 %vm55_vm0, %v18_v7  ;;  %4070 = vmatmul.mubr.msk.f32.vlgmr.msra.gmra.mrb[0].mxu0 %vm55_vm0, %v18_v7  ;;  %v3225_v28 = vld [vmem:[%s6100_s0 + $0x200] sm:$0xff]  ;;  %v3226_v29 = vld [vmem:[%s6100_s0 + $0x208] sm:$0xff]  ;;  %v3227_v30 = vld [vmem:[%s6100_s0 + $0x210] sm:$0xff] }
   0xa   :  { %4464 = vmatpush3.bf16.msra.mxu1 %v4461_v6  ;;  %4016 = vmatprep.mubr.msk.f32.mxu1 %vm55_vm0, %v19_v8  ;;  %v3228_v31 = vld [vmem:[%s6100_s0 + $0x218] sm:$0xff]  ;;  %v3229_v32 = vld [vmem:[%s6100_s0 + $0x220] sm:$0xff]  ;;  %v3230_v33 = vld [vmem:[%s6100_s0 + $0x228] sm:$0xff] }
   0xb   :  { %4072 = vmatprep.mubr.msk.f32.mxu0 %vm55_vm0, %v19_v8  ;;  %4472 = vmatpush3.bf16.msra.mxu0 %v4457_v3  ;;  %v3231_v34 = vld [vmem:[%s6100_s0 + $0x230] sm:$0xff]  ;;  %v3232_v35 = vld [vmem:[%s6100_s0 + $0x238] sm:$0xff]  ;;  %v3233_v36 = vld [vmem:[%s6100_s0 + $0x240] sm:$0xff] }
   0xc   :  { %4474 = vmatprep.subr.bf16.mxu1 %v4639_v12  ;;  %4482 = vmatprep.subr.bf16.mxu0 %v4652_v16  ;;  %v3234_v37 = vld [vmem:[%s6100_s0 + $0x248] sm:$0xff]  ;;  %v3235_v38 = vld [vmem:[%s6100_s0 + $0x250] sm:$0xff]  ;;  %v3236_v39 = vld [vmem:[%s6100_s0 + $0x258] sm:$0xff] }
   0xd   :  { %4017 = vmatmul.mubr.msk.f32.gmra.mrb[2].mxu1 %vm55_vm0, %v20_v11  ;;  %4073 = vmatmul.mubr.msk.f32.gmra.mrb[2].mxu0 %vm55_vm0, %v20_v11  ;;  %v3237_v40 = vld [vmem:[%s6100_s0 + $0x260] sm:$0xff]  ;;  %v3238_v41 = vld [vmem:[%s6100_s0 + $0x268] sm:$0xff]  ;;  %v3239_v42 = vld [vmem:[%s6100_s0 + $0x270] sm:$0xff] }
   0xe   :  { %4019 = vmatprep.mubr.msk.f32.mxu1 %vm55_vm0, %v21_v15  ;;  %4075 = vmatprep.mubr.msk.f32.mxu0 %vm55_vm0, %v21_v15  ;;  %v3240_v43 = vld [vmem:[%s6100_s0 + $0x278] sm:$0xff]  ;;  %v3325_v44 = vld [vmem:[%s6100_s0 + $0x80] sm:$0xff]  ;;  %v3490_v46 = vld [vmem:[%s6099_s1 + $0x28] sm:$0xff] }
   0xf   :  { %v3489_v45 = vld [vmem:[%s6099_s1 + $0x20] sm:$0xff]  ;;  %v3326_v47 = vld [vmem:[%s6100_s0 + $0x88] sm:$0xff]  ;;  %v3327_v50 = vld [vmem:[%s6100_s0 + $0x90] sm:$0xff] }
  0x10   :  { %v3491_v48 = vld [vmem:[%s6099_s1 + $0x60] sm:$0xff]  ;;  %v3492_v49 = vld [vmem:[%s6099_s1 + $0x68] sm:$0xff]  ;;  %v4822_v51 = vpack.c.bf16 %v3490_v46, %v3489_v45  ;;  %v3328_v53 = vld [vmem:[%s6100_s0 + $0x98] sm:$0xff] }
  0x11   :  { %4020 = vmatmul.mubr.msk.f32.gmra.mrb[4].mxu1 %vm55_vm0, %v22_v17  ;;  %4076 = vmatmul.mubr.msk.f32.gmra.mrb[4].mxu0 %vm55_vm0, %v22_v17  ;;  %v4825_v52 = vpack.c.bf16 %v3492_v49, %v3491_v48  ;;  %v3329_v54 = vld [vmem:[%s6100_s0 + $0xa0] sm:$0xff]  ;;  %v3330_v55 = vld [vmem:[%s6100_s0 + $0xa8] sm:$0xff]  ;;  %v3331_v56 = vld [vmem:[%s6100_s0 + $0xb0] sm:$0xff] }
  0x12   :  { %4022 = vmatprep.mubr.msk.f32.mxu1 %vm55_vm0, %v23_v18  ;;  %4078 = vmatprep.mubr.msk.f32.mxu0 %vm55_vm0, %v23_v18  ;;  %v3332_v57 = vld [vmem:[%s6100_s0 + $0xb8] sm:$0xff]  ;;  %v3333_v58 = vld [vmem:[%s6100_s0 + $0xc0] sm:$0xff]  ;;  %v3334_v59 = vld [vmem:[%s6100_s0 + $0xc8] sm:$0xff] }
  0x13   :  { %v3335_v60 = vld [vmem:[%s6100_s0 + $0xd0] sm:$0xff]  ;;  %v3336_v61 = vld [vmem:[%s6100_s0 + $0xd8] sm:$0xff]  ;;  %v3337_v62 = vld [vmem:[%s6100_s0 + $0xe0] sm:$0xff] }
  0x14   :  { %v3338_v63 = vld [vmem:[%s6100_s0 + $0xe8] sm:$0xff]  ;;  %v3339_v0 = vld [vmem:[%s6100_s0 + $0xf0] sm:$0xff]  ;;  %v3340_v1 = vld [vmem:[%s6100_s0 + $0xf8] sm:$0xff] }
  0x15   :  { %4023 = vmatmul.mubr.msk.f32.gmra.mrb[6].mxu1 %vm55_vm0, %v24_v19  ;;  %4079 = vmatmul.mubr.msk.f32.gmra.mrb[6].mxu0 %vm55_vm0, %v24_v19  ;;  %v3341_v2 = vld [vmem:[%s6100_s0 + $0x280] sm:$0xff]  ;;  %v3342_v3 = vld [vmem:[%s6100_s0 + $0x288] sm:$0xff]  ;;  %v3343_v4 = vld [vmem:[%s6100_s0 + $0x290] sm:$0xff] }
  0x16   :  { %4025 = vmatprep.mubr.msk.f32.mxu1 %vm55_vm0, %v25_v20  ;;  %4081 = vmatprep.mubr.msk.f32.mxu0 %vm55_vm0, %v25_v20  ;;  %v3344_v5 = vld [vmem:[%s6100_s0 + $0x298] sm:$0xff]  ;;  %v3345_v6 = vld [vmem:[%s6100_s0 + $0x2a0] sm:$0xff]  ;;  %v3346_v7 = vld [vmem:[%s6100_s0 + $0x2a8] sm:$0xff] }
  0x17   :  { %v3347_v8 = vld [vmem:[%s6100_s0 + $0x2b0] sm:$0xff]  ;;  %v3348_v9 = vld [vmem:[%s6100_s0 + $0x2b8] sm:$0xff]  ;;  %v3349_v10 = vld [vmem:[%s6100_s0 + $0x2c0] sm:$0xff] }
  0x18   :  { %v3350_v11 = vld [vmem:[%s6100_s0 + $0x2c8] sm:$0xff]  ;;  %v3352_v13 = vld [vmem:[%s6100_s0 + $0x2d8] sm:$0xff]  ;;  %v3353_v14 = vld [vmem:[%s6100_s0 + $0x2e0] sm:$0xff] }
  0x19   :  { %4026 = vmatmul.mubr.msk.f32.gmra.mrb[8].mxu1 %vm55_vm0, %v26_v21  ;;  %4082 = vmatmul.mubr.msk.f32.gmra.mrb[8].mxu0 %vm55_vm0, %v26_v21  ;;  %v3354_v15 = vld [vmem:[%s6100_s0 + $0x2e8] sm:$0xff]  ;;  %v3356_v17 = vld [vmem:[%s6100_s0 + $0x2f8] sm:$0xff]  ;;  %v3457_v18 = vld [vmem:[%s6100_s0 + $0x100] sm:$0xff] }
  0x1a   :  { %4028 = vmatprep.mubr.msk.f32.mxu1 %vm55_vm0, %v27_v22  ;;  %4084 = vmatprep.mubr.msk.f32.mxu0 %vm55_vm0, %v27_v22  ;;  %v3621_v19 = vld [vmem:[%s6099_s1 + $0x30] sm:$0xff]  ;;  %v3622_v20 = vld [vmem:[%s6099_s1 + $0x38] sm:$0xff]  ;;  %v3458_v21 = vld [vmem:[%s6100_s0 + $0x108] sm:$0xff] }
  0x1b   :  { %v3623_v22 = vld [vmem:[%s6099_s1 + $0x70] sm:$0xff]  ;;  %v3478_v45 = vld [vmem:[%s6100_s0 + $0x328] sm:$0xff]  ;;  %v3481_v48 = vld [vmem:[%s6100_s0 + $0x340] sm:$0xff] }
  0x1c   :  { %v3479_v46 = vld [vmem:[%s6100_s0 + $0x330] sm:$0xff]  ;;  %v3482_v49 = vld [vmem:[%s6100_s0 + $0x348] sm:$0xff] }
  0x1d   :  { %4029 = vmatmul.mubr.msk.f32.gmra.mrb[10].mxu1 %vm55_vm0, %v28_v23  ;;  %4085 = vmatmul.mubr.msk.f32.gmra.mrb[10].mxu0 %vm55_vm0, %v28_v23  ;;  %v3624_v23 = vld [vmem:[%s6099_s1 + $0x78] sm:$0xff] }
  0x1e   :  { %4031 = vmatprep.mubr.msk.f32.mxu1 %vm55_vm0, %v29_v24  ;;  %4087 = vmatprep.mubr.msk.f32.mxu0 %vm55_vm0, %v29_v24  ;;  %v3459_v24 = vld [vmem:[%s6100_s0 + $0x110] sm:$0xff] }
  0x21   :  { %4032 = vmatmul.mubr.msk.f32.gmra.mrb[12].mxu1 %vm55_vm0, %v30_v25  ;;  %4088 = vmatmul.mubr.msk.f32.gmra.mrb[12].mxu0 %vm55_vm0, %v30_v25  ;;  %v5006_v25 = vpack.c.bf16 %v3622_v20, %v3621_v19  ;;  %v3608_v19 = vld [vmem:[%s6100_s0 + $0x398] sm:$0xff]  ;;  %v3609_v20 = vld [vmem:[%s6100_s0 + $0x3a0] sm:$0xff] }
  0x22   :  { %4034 = vmatprep.mubr.msk.f32.mxu1 %vm55_vm0, %v31_v26  ;;  %4090 = vmatprep.mubr.msk.f32.mxu0 %vm55_vm0, %v31_v26  ;;  %v5009_v26 = vpack.c.bf16 %v3624_v23, %v3623_v22  ;;  %v3610_v23 = vld [vmem:[%s6100_s0 + $0x3a8] sm:$0xff] }
  0x25   :  { %4035 = vmatmul.mubr.msk.f32.gmra.mrb[14].mxu1 %vm55_vm0, %v32_v27  ;;  %4091 = vmatmul.mubr.msk.f32.gmra.mrb[14].mxu0 %vm55_vm0, %v32_v27  ;;  %v3460_v27 = vld [vmem:[%s6100_s0 + $0x118] sm:$0xff] }
  0x26   :  { %4041 = vmatprep.mubr.msk.f32.mxu1 %vm55_vm0, %v3225_v28  ;;  %4097 = vmatprep.mubr.msk.f32.mxu0 %vm55_vm0, %v3225_v28  ;;  %v3461_v28 = vld [vmem:[%s6100_s0 + $0x120] sm:$0xff] }
  0x29   :  { %4042 = vmatmul.mubr.msk.f32.vlgmr.msra.gmra.mrb[16].mxu1 %vm55_vm0, %v3226_v29  ;;  %4098 = vmatmul.mubr.msk.f32.vlgmr.msra.gmra.mrb[0].mxu0 %vm55_vm0, %v3226_v29  ;;  %v3462_v29 = vld [vmem:[%s6100_s0 + $0x128] sm:$0xff] }
  0x2a   :  { %4476 = vmatpush3.bf16.msra.mxu1 %v4639_v12  ;;  %4044 = vmatprep.mubr.msk.f32.mxu1 %vm55_vm0, %v3227_v30 }
  0x2b   :  { %4100 = vmatprep.mubr.msk.f32.mxu0 %vm55_vm0, %v3227_v30  ;;  %4484 = vmatpush3.bf16.msra.mxu0 %v4652_v16  ;;  %v3463_v30 = vld [vmem:[%s6100_s0 + $0x130] sm:$0xff] }
  0x2c   :  { %4478 = vmatprep.subr.bf16.mxu1 %v4652_v16  ;;  %4486 = vmatprep.subr.bf16.mxu0 %v4639_v12 }
  0x2d   :  { %4045 = vmatmul.mubr.msk.f32.gmra.mrb[18].mxu1 %vm55_vm0, %v3228_v31  ;;  %4101 = vmatmul.mubr.msk.f32.gmra.mrb[2].mxu0 %vm55_vm0, %v3228_v31  ;;  %v3464_v31 = vld [vmem:[%s6100_s0 + $0x138] sm:$0xff] }
  0x2e   :  { %4047 = vmatprep.mubr.msk.f32.mxu1 %vm55_vm0, %v3229_v32  ;;  %4103 = vmatprep.mubr.msk.f32.mxu0 %vm55_vm0, %v3229_v32  ;;  %v3465_v32 = vld [vmem:[%s6100_s0 + $0x140] sm:$0xff] }
  0x31   :  { %4048 = vmatmul.mubr.msk.f32.gmra.mrb[20].mxu1 %vm55_vm0, %v3230_v33  ;;  %4104 = vmatmul.mubr.msk.f32.gmra.mrb[4].mxu0 %vm55_vm0, %v3230_v33  ;;  %v3466_v33 = vld [vmem:[%s6100_s0 + $0x148] sm:$0xff] }
  0x32   :  { %4050 = vmatprep.mubr.msk.f32.mxu1 %vm55_vm0, %v3231_v34  ;;  %4106 = vmatprep.mubr.msk.f32.mxu0 %vm55_vm0, %v3231_v34  ;;  %v3467_v34 = vld [vmem:[%s6100_s0 + $0x150] sm:$0xff] }
  0x35   :  { %4051 = vmatmul.mubr.msk.f32.gmra.mrb[22].mxu1 %vm55_vm0, %v3232_v35  ;;  %4107 = vmatmul.mubr.msk.f32.gmra.mrb[6].mxu0 %vm55_vm0, %v3232_v35  ;;  %v3468_v35 = vld [vmem:[%s6100_s0 + $0x158] sm:$0xff] }
  0x36   :  { %4053 = vmatprep.mubr.msk.f32.mxu1 %vm55_vm0, %v3233_v36  ;;  %4109 = vmatprep.mubr.msk.f32.mxu0 %vm55_vm0, %v3233_v36  ;;  %v3469_v36 = vld [vmem:[%s6100_s0 + $0x160] sm:$0xff] }
  0x39   :  { %4054 = vmatmul.mubr.msk.f32.gmra.mrb[24].mxu1 %vm55_vm0, %v3234_v37  ;;  %4110 = vmatmul.mubr.msk.f32.gmra.mrb[8].mxu0 %vm55_vm0, %v3234_v37  ;;  %v3470_v37 = vld [vmem:[%s6100_s0 + $0x168] sm:$0xff] }
  0x3a   :  { %4056 = vmatprep.mubr.msk.f32.mxu1 %vm55_vm0, %v3235_v38  ;;  %4112 = vmatprep.mubr.msk.f32.mxu0 %vm55_vm0, %v3235_v38  ;;  %v3471_v38 = vld [vmem:[%s6100_s0 + $0x170] sm:$0xff] }
  0x3d   :  { %4057 = vmatmul.mubr.msk.f32.gmra.mrb[26].mxu1 %vm55_vm0, %v3236_v39  ;;  %4113 = vmatmul.mubr.msk.f32.gmra.mrb[10].mxu0 %vm55_vm0, %v3236_v39  ;;  %v3472_v39 = vld [vmem:[%s6100_s0 + $0x178] sm:$0xff] }
  0x3e   :  { %4059 = vmatprep.mubr.msk.f32.mxu1 %vm55_vm0, %v3237_v40  ;;  %4115 = vmatprep.mubr.msk.f32.mxu0 %vm55_vm0, %v3237_v40  ;;  %v3473_v40 = vld [vmem:[%s6100_s0 + $0x300] sm:$0xff] }
  0x41   :  { %4060 = vmatmul.mubr.msk.f32.gmra.mrb[28].mxu1 %vm55_vm0, %v3238_v41  ;;  %4116 = vmatmul.mubr.msk.f32.gmra.mrb[12].mxu0 %vm55_vm0, %v3238_v41  ;;  %v3474_v41 = vld [vmem:[%s6100_s0 + $0x308] sm:$0xff] }
  0x42   :  { %4062 = vmatprep.mubr.msk.f32.mxu1 %vm55_vm0, %v3239_v42  ;;  %4118 = vmatprep.mubr.msk.f32.mxu0 %vm55_vm0, %v3239_v42  ;;  %v3475_v42 = vld [vmem:[%s6100_s0 + $0x310] sm:$0xff] }
  0x45   :  { %4063 = vmatmul.mubr.msk.f32.gmra.mrb[30].mxu1 %vm55_vm0, %v3240_v43  ;;  %4119 = vmatmul.mubr.msk.f32.gmra.mrb[14].mxu0 %vm55_vm0, %v3240_v43  ;;  %v3476_v43 = vld [vmem:[%s6100_s0 + $0x318] sm:$0xff] }
  0x46   :  { %4125 = vmatprep.mubr.msk.f32.mxu1 %vm55_vm0, %v3325_v44  ;;  %4181 = vmatprep.mubr.msk.f32.mxu0 %vm55_vm0, %v3325_v44  ;;  %v3477_v44 = vld [vmem:[%s6100_s0 + $0x320] sm:$0xff] }
  0x49   :  { %4126 = vmatmul.mubr.msk.f32.vlgmr.msra.gmra.mrb[32].mxu1 %vm55_vm0, %v3326_v47  ;;  %4182 = vmatmul.mubr.msk.f32.vlgmr.msra.gmra.mrb[16].mxu0 %vm55_vm0, %v3326_v47  ;;  %v3480_v47 = vld [vmem:[%s6100_s0 + $0x338] sm:$0xff] }
  0x4a   :  { %4480 = vmatpush3.bf16.msra.mxu1 %v4652_v16  ;;  %4128 = vmatprep.mubr.msk.f32.mxu1 %vm55_vm0, %v3327_v50  ;;  %v3355_v16 = vld [vmem:[%s6100_s0 + $0x2f0] sm:$0xff] }
  0x4b   :  { %4184 = vmatprep.mubr.msk.f32.mxu0 %vm55_vm0, %v3327_v50  ;;  %4488 = vmatpush3.bf16.msra.mxu0 %v4639_v12  ;;  %v3351_v12 = vld [vmem:[%s6100_s0 + $0x2d0] sm:$0xff] }
  0x4c   :  { %4490 = vmatprep.subr.bf16.mxu1 %v4822_v51  ;;  %4498 = vmatprep.subr.bf16.mxu0 %v4825_v52  ;;  %v3483_v50 = vld [vmem:[%s6100_s0 + $0x350] sm:$0xff] }
  0x4d   :  { %4129 = vmatmul.mubr.msk.f32.gmra.mrb[34].mxu1 %vm55_vm0, %v3328_v53  ;;  %4185 = vmatmul.mubr.msk.f32.gmra.mrb[18].mxu0 %vm55_vm0, %v3328_v53  ;;  %v3486_v53 = vld [vmem:[%s6100_s0 + $0x368] sm:$0xff] }
  0x4e   :  { %4131 = vmatprep.mubr.msk.f32.mxu1 %vm55_vm0, %v3329_v54  ;;  %4187 = vmatprep.mubr.msk.f32.mxu0 %vm55_vm0, %v3329_v54  ;;  %v3487_v54 = vld [vmem:[%s6100_s0 + $0x370] sm:$0xff] }
  0x51   :  { %4132 = vmatmul.mubr.msk.f32.gmra.mrb[36].mxu1 %vm55_vm0, %v3330_v55  ;;  %4188 = vmatmul.mubr.msk.f32.gmra.mrb[20].mxu0 %vm55_vm0, %v3330_v55  ;;  %v3488_v55 = vld [vmem:[%s6100_s0 + $0x378] sm:$0xff] }
  0x52   :  { %4134 = vmatprep.mubr.msk.f32.mxu1 %vm55_vm0, %v3331_v56  ;;  %4190 = vmatprep.mubr.msk.f32.mxu0 %vm55_vm0, %v3331_v56  ;;  %v3589_v56 = vld [vmem:[%s6100_s0 + $0x180] sm:$0xff] }
  0x55   :  { %4135 = vmatmul.mubr.msk.f32.gmra.mrb[38].mxu1 %vm55_vm0, %v3332_v57  ;;  %4191 = vmatmul.mubr.msk.f32.gmra.mrb[22].mxu0 %vm55_vm0, %v3332_v57  ;;  %v3590_v57 = vld [vmem:[%s6100_s0 + $0x188] sm:$0xff] }
  0x56   :  { %4137 = vmatprep.mubr.msk.f32.mxu1 %vm55_vm0, %v3333_v58  ;;  %4193 = vmatprep.mubr.msk.f32.mxu0 %vm55_vm0, %v3333_v58  ;;  %v3591_v58 = vld [vmem:[%s6100_s0 + $0x190] sm:$0xff] }
  0x59   :  { %4138 = vmatmul.mubr.msk.f32.gmra.mrb[40].mxu1 %vm55_vm0, %v3334_v59  ;;  %4194 = vmatmul.mubr.msk.f32.gmra.mrb[24].mxu0 %vm55_vm0, %v3334_v59  ;;  %v3592_v59 = vld [vmem:[%s6100_s0 + $0x198] sm:$0xff] }
  0x5a   :  { %4140 = vmatprep.mubr.msk.f32.mxu1 %vm55_vm0, %v3335_v60  ;;  %4196 = vmatprep.mubr.msk.f32.mxu0 %vm55_vm0, %v3335_v60  ;;  %v3593_v60 = vld [vmem:[%s6100_s0 + $0x1a0] sm:$0xff] }
  0x5d   :  { %4141 = vmatmul.mubr.msk.f32.gmra.mrb[42].mxu1 %vm55_vm0, %v3336_v61  ;;  %4197 = vmatmul.mubr.msk.f32.gmra.mrb[26].mxu0 %vm55_vm0, %v3336_v61  ;;  %v3594_v61 = vld [vmem:[%s6100_s0 + $0x1a8] sm:$0xff] }
  0x5e   :  { %4143 = vmatprep.mubr.msk.f32.mxu1 %vm55_vm0, %v3337_v62  ;;  %4199 = vmatprep.mubr.msk.f32.mxu0 %vm55_vm0, %v3337_v62  ;;  %v3595_v62 = vld [vmem:[%s6100_s0 + $0x1b0] sm:$0xff] }
  0x61   :  { %4144 = vmatmul.mubr.msk.f32.gmra.mrb[44].mxu1 %vm55_vm0, %v3338_v63  ;;  %4200 = vmatmul.mubr.msk.f32.gmra.mrb[28].mxu0 %vm55_vm0, %v3338_v63  ;;  %v3596_v63 = vld [vmem:[%s6100_s0 + $0x1b8] sm:$0xff] }
  0x62   :  { %4146 = vmatprep.mubr.msk.f32.mxu1 %vm55_vm0, %v3339_v0  ;;  %4202 = vmatprep.mubr.msk.f32.mxu0 %vm55_vm0, %v3339_v0  ;;  %v3597_v0 = vld [vmem:[%s6100_s0 + $0x1c0] sm:$0xff] }
  0x65   :  { %4147 = vmatmul.mubr.msk.f32.gmra.mrb[46].mxu1 %vm55_vm0, %v3340_v1  ;;  %4203 = vmatmul.mubr.msk.f32.gmra.mrb[30].mxu0 %vm55_vm0, %v3340_v1  ;;  %v3598_v1 = vld [vmem:[%s6100_s0 + $0x1c8] sm:$0xff] }
  0x66   :  { %4153 = vmatprep.mubr.msk.f32.mxu1 %vm55_vm0, %v3341_v2  ;;  %4209 = vmatprep.mubr.msk.f32.mxu0 %vm55_vm0, %v3341_v2  ;;  %v3599_v2 = vld [vmem:[%s6100_s0 + $0x1d0] sm:$0xff] }
  0x69   :  { %4154 = vmatmul.mubr.msk.f32.vlgmr.msra.gmra.mrb[48].mxu1 %vm55_vm0, %v3342_v3  ;;  %4210 = vmatmul.mubr.msk.f32.vlgmr.msra.gmra.mrb[16].mxu0 %vm55_vm0, %v3342_v3  ;;  %v3600_v3 = vld [vmem:[%s6100_s0 + $0x1d8] sm:$0xff] }
  0x6a   :  { %4492 = vmatpush3.bf16.msra.mxu1 %v4822_v51  ;;  %4156 = vmatprep.mubr.msk.f32.mxu1 %vm55_vm0, %v3343_v4 }
  0x6b   :  { %4212 = vmatprep.mubr.msk.f32.mxu0 %vm55_vm0, %v3343_v4  ;;  %4500 = vmatpush3.bf16.msra.mxu0 %v4825_v52  ;;  %v3601_v4 = vld [vmem:[%s6100_s0 + $0x1e0] sm:$0xff] }
  0x6c   :  { %4494 = vmatprep.subr.bf16.mxu1 %v4825_v52  ;;  %4502 = vmatprep.subr.bf16.mxu0 %v4822_v51 }
  0x6d   :  { %4157 = vmatmul.mubr.msk.f32.gmra.mrb[50].mxu1 %vm55_vm0, %v3344_v5  ;;  %4213 = vmatmul.mubr.msk.f32.gmra.mrb[18].mxu0 %vm55_vm0, %v3344_v5 }
  0x6e   :  { %4159 = vmatprep.mubr.msk.f32.mxu1 %vm55_vm0, %v3345_v6  ;;  %4215 = vmatprep.mubr.msk.f32.mxu0 %vm55_vm0, %v3345_v6 }
  0x71   :  { %4160 = vmatmul.mubr.msk.f32.gmra.mrb[52].mxu1 %vm55_vm0, %v3346_v7  ;;  %4216 = vmatmul.mubr.msk.f32.gmra.mrb[20].mxu0 %vm55_vm0, %v3346_v7  ;;  %v3602_v7 = vld [vmem:[%s6100_s0 + $0x1e8] sm:$0xff] }
  0x72   :  { %4162 = vmatprep.mubr.msk.f32.mxu1 %vm55_vm0, %v3347_v8  ;;  %4218 = vmatprep.mubr.msk.f32.mxu0 %vm55_vm0, %v3347_v8  ;;  %v3603_v8 = vld [vmem:[%s6100_s0 + $0x1f0] sm:$0xff] }
  0x75   :  { %4163 = vmatmul.mubr.msk.f32.gmra.mrb[54].mxu1 %vm55_vm0, %v3348_v9  ;;  %4219 = vmatmul.mubr.msk.f32.gmra.mrb[22].mxu0 %vm55_vm0, %v3348_v9 }
  0x76   :  { %4165 = vmatprep.mubr.msk.f32.mxu1 %vm55_vm0, %v3349_v10  ;;  %4221 = vmatprep.mubr.msk.f32.mxu0 %vm55_vm0, %v3349_v10 }
  0x79   :  { %4166 = vmatmul.mubr.msk.f32.gmra.mrb[56].mxu1 %vm55_vm0, %v3350_v11  ;;  %4222 = vmatmul.mubr.msk.f32.gmra.mrb[24].mxu0 %vm55_vm0, %v3350_v11  ;;  %v3604_v11 = vld [vmem:[%s6100_s0 + $0x1f8] sm:$0xff] }
  0x7a   :  { %4168 = vmatprep.mubr.msk.f32.mxu1 %vm55_vm0, %v3351_v12  ;;  %4224 = vmatprep.mubr.msk.f32.mxu0 %vm55_vm0, %v3351_v12  ;;  %v3605_v12 = vld [vmem:[%s6100_s0 + $0x380] sm:$0xff] }
  0x7d   :  { %4169 = vmatmul.mubr.msk.f32.gmra.mrb[58].mxu1 %vm55_vm0, %v3352_v13  ;;  %4225 = vmatmul.mubr.msk.f32.gmra.mrb[26].mxu0 %vm55_vm0, %v3352_v13 }
  0x7e   :  { %4171 = vmatprep.mubr.msk.f32.mxu1 %vm55_vm0, %v3353_v14  ;;  %4227 = vmatprep.mubr.msk.f32.mxu0 %vm55_vm0, %v3353_v14 }
  0x81   :  { %4172 = vmatmul.mubr.msk.f32.gmra.mrb[60].mxu1 %vm55_vm0, %v3354_v15  ;;  %4228 = vmatmul.mubr.msk.f32.gmra.mrb[28].mxu0 %vm55_vm0, %v3354_v15  ;;  %v3606_v15 = vld [vmem:[%s6100_s0 + $0x388] sm:$0xff] }
  0x82   :  { %4174 = vmatprep.mubr.msk.f32.mxu1 %vm55_vm0, %v3355_v16  ;;  %4230 = vmatprep.mubr.msk.f32.mxu0 %vm55_vm0, %v3355_v16  ;;  %v3607_v16 = vld [vmem:[%s6100_s0 + $0x390] sm:$0xff] }
  0x85   :  { %4175 = vmatmul.mubr.msk.f32.gmra.mrb[62].mxu1 %vm55_vm0, %v3356_v17  ;;  %4231 = vmatmul.mubr.msk.f32.gmra.mrb[30].mxu0 %vm55_vm0, %v3356_v17 }
  0x86   :  { %4237 = vmatprep.mubr.msk.f32.mxu1 %vm55_vm0, %v3457_v18  ;;  %4293 = vmatprep.mubr.msk.f32.mxu0 %vm55_vm0, %v3457_v18 }
  0x89   :  { %4238 = vmatmul.mubr.msk.f32.vlgmr.msra.gmra.mrb[64].mxu1 %vm55_vm0, %v3458_v21  ;;  %4294 = vmatmul.mubr.msk.f32.vlgmr.msra.gmra.mrb[32].mxu0 %vm55_vm0, %v3458_v21 }
  0x8a   :  { %4496 = vmatpush3.bf16.msra.mxu1 %v4825_v52  ;;  %4240 = vmatprep.mubr.msk.f32.mxu1 %vm55_vm0, %v3459_v24  ;;  %v3485_v52 = vld [vmem:[%s6100_s0 + $0x360] sm:$0xff] }
  0x8b   :  { %4296 = vmatprep.mubr.msk.f32.mxu0 %vm55_vm0, %v3459_v24  ;;  %4504 = vmatpush3.bf16.msra.mxu0 %v4822_v51  ;;  %v3484_v51 = vld [vmem:[%s6100_s0 + $0x358] sm:$0xff]  ;;  %v3611_v24 = vld [vmem:[%s6100_s0 + $0x3b0] sm:$0xff] }
  0x8c   :  { %4506 = vmatprep.subr.bf16.mxu1 %v5006_v25  ;;  %4514 = vmatprep.subr.bf16.mxu0 %v5009_v26 }
  0x8d   :  { %4241 = vmatmul.mubr.msk.f32.gmra.mrb[66].mxu1 %vm55_vm0, %v3460_v27  ;;  %4297 = vmatmul.mubr.msk.f32.gmra.mrb[34].mxu0 %vm55_vm0, %v3460_v27  ;;  %v3612_v27 = vld [vmem:[%s6100_s0 + $0x3b8] sm:$0xff] }
  0x8e   :  { %4243 = vmatprep.mubr.msk.f32.mxu1 %vm55_vm0, %v3461_v28  ;;  %4299 = vmatprep.mubr.msk.f32.mxu0 %vm55_vm0, %v3461_v28  ;;  %v3613_v28 = vld [vmem:[%s6100_s0 + $0x3c0] sm:$0xff] }
  0x91   :  { %4244 = vmatmul.mubr.msk.f32.gmra.mrb[68].mxu1 %vm55_vm0, %v3462_v29  ;;  %4300 = vmatmul.mubr.msk.f32.gmra.mrb[36].mxu0 %vm55_vm0, %v3462_v29 }
  0x92   :  { %4246 = vmatprep.mubr.msk.f32.mxu1 %vm55_vm0, %v3463_v30  ;;  %4302 = vmatprep.mubr.msk.f32.mxu0 %vm55_vm0, %v3463_v30 }
  0x95   :  { %4247 = vmatmul.mubr.msk.f32.gmra.mrb[70].mxu1 %vm55_vm0, %v3464_v31  ;;  %4303 = vmatmul.mubr.msk.f32.gmra.mrb[38].mxu0 %vm55_vm0, %v3464_v31  ;;  %v3614_v31 = vld [vmem:[%s6100_s0 + $0x3c8] sm:$0xff] }
  0x96   :  { %4249 = vmatprep.mubr.msk.f32.mxu1 %vm55_vm0, %v3465_v32  ;;  %4305 = vmatprep.mubr.msk.f32.mxu0 %vm55_vm0, %v3465_v32  ;;  %v3615_v32 = vld [vmem:[%s6100_s0 + $0x3d0] sm:$0xff] }
  0x99   :  { %4250 = vmatmul.mubr.msk.f32.gmra.mrb[72].mxu1 %vm55_vm0, %v3466_v33  ;;  %4306 = vmatmul.mubr.msk.f32.gmra.mrb[40].mxu0 %vm55_vm0, %v3466_v33 }
  0x9a   :  { %4252 = vmatprep.mubr.msk.f32.mxu1 %vm55_vm0, %v3467_v34  ;;  %4308 = vmatprep.mubr.msk.f32.mxu0 %vm55_vm0, %v3467_v34 }
  0x9d   :  { %4253 = vmatmul.mubr.msk.f32.gmra.mrb[74].mxu1 %vm55_vm0, %v3468_v35  ;;  %4309 = vmatmul.mubr.msk.f32.gmra.mrb[42].mxu0 %vm55_vm0, %v3468_v35  ;;  %v3616_v35 = vld [vmem:[%s6100_s0 + $0x3d8] sm:$0xff] }
  0x9e   :  { %4255 = vmatprep.mubr.msk.f32.mxu1 %vm55_vm0, %v3469_v36  ;;  %4311 = vmatprep.mubr.msk.f32.mxu0 %vm55_vm0, %v3469_v36  ;;  %v5341_v36 = vld [vmem:[%s6101_s2 + $0x1] ss:$0 sm:$0xff] }
  0xa1   :  { %4256 = vmatmul.mubr.msk.f32.gmra.mrb[76].mxu1 %vm55_vm0, %v3470_v37  ;;  %4312 = vmatmul.mubr.msk.f32.gmra.mrb[44].mxu0 %vm55_vm0, %v3470_v37  ;;  %v3617_v37 = vld [vmem:[%s6100_s0 + $0x3e0] sm:$0xff] }
  0xa2   :  { %4258 = vmatprep.mubr.msk.f32.mxu1 %vm55_vm0, %v3471_v38  ;;  %4314 = vmatprep.mubr.msk.f32.mxu0 %vm55_vm0, %v3471_v38  ;;  %v5350_v38 = vld [vmem:[%s6101_s2] ss:$0 sm:$0xff] }
  0xa5   :  { %4259 = vmatmul.mubr.msk.f32.gmra.mrb[78].mxu1 %vm55_vm0, %v3472_v39  ;;  %4315 = vmatmul.mubr.msk.f32.gmra.mrb[46].mxu0 %vm55_vm0, %v3472_v39 }
  0xa6   :  { %4265 = vmatprep.mubr.msk.f32.mxu1 %vm55_vm0, %v3473_v40  ;;  %4321 = vmatprep.mubr.msk.f32.mxu0 %vm55_vm0, %v3473_v40 }
  0xa9   :  { %4266 = vmatmul.mubr.msk.f32.vlgmr.msra.gmra.mrb[80].mxu1 %vm55_vm0, %v3474_v41  ;;  %4322 = vmatmul.mubr.msk.f32.vlgmr.msra.gmra.mrb[32].mxu0 %vm55_vm0, %v3474_v41 }
  0xaa   :  { %4508 = vmatpush3.bf16.msra.mxu1 %v5006_v25  ;;  %4268 = vmatprep.mubr.msk.f32.mxu1 %vm55_vm0, %v3475_v42 }
  0xab   :  { %4324 = vmatprep.mubr.msk.f32.mxu0 %vm55_vm0, %v3475_v42  ;;  %4516 = vmatpush3.bf16.msra.mxu0 %v5009_v26 }
  0xac   :  { %4510 = vmatprep.subr.bf16.mxu1 %v5009_v26  ;;  %4518 = vmatprep.subr.bf16.mxu0 %v5006_v25 }
  0xad   :  { %4269 = vmatmul.mubr.msk.f32.gmra.mrb[82].mxu1 %vm55_vm0, %v3476_v43  ;;  %4325 = vmatmul.mubr.msk.f32.gmra.mrb[34].mxu0 %vm55_vm0, %v3476_v43 }
  0xae   :  { %4271 = vmatprep.mubr.msk.f32.mxu1 %vm55_vm0, %v3477_v44  ;;  %4327 = vmatprep.mubr.msk.f32.mxu0 %vm55_vm0, %v3477_v44 }
  0xb1   :  { %4272 = vmatmul.mubr.msk.f32.gmra.mrb[84].mxu1 %vm55_vm0, %v3478_v45  ;;  %4328 = vmatmul.mubr.msk.f32.gmra.mrb[36].mxu0 %vm55_vm0, %v3478_v45 }
  0xb2   :  { %4274 = vmatprep.mubr.msk.f32.mxu1 %vm55_vm0, %v3479_v46  ;;  %4330 = vmatprep.mubr.msk.f32.mxu0 %vm55_vm0, %v3479_v46  ;;  %v3618_v46 = vld [vmem:[%s6100_s0 + $0x3e8] sm:$0xff] }
  0xb5   :  { %4275 = vmatmul.mubr.msk.f32.gmra.mrb[86].mxu1 %vm55_vm0, %v3480_v47  ;;  %4331 = vmatmul.mubr.msk.f32.gmra.mrb[38].mxu0 %vm55_vm0, %v3480_v47 }
  0xb6   :  { %4277 = vmatprep.mubr.msk.f32.mxu1 %vm55_vm0, %v3481_v48  ;;  %4333 = vmatprep.mubr.msk.f32.mxu0 %vm55_vm0, %v3481_v48 }
  0xb9   :  { %4278 = vmatmul.mubr.msk.f32.gmra.mrb[88].mxu1 %vm55_vm0, %v3482_v49  ;;  %4334 = vmatmul.mubr.msk.f32.gmra.mrb[40].mxu0 %vm55_vm0, %v3482_v49  ;;  %v3619_v49 = vld [vmem:[%s6100_s0 + $0x3f0] sm:$0xff] }
  0xba   :  { %4280 = vmatprep.mubr.msk.f32.mxu1 %vm55_vm0, %v3483_v50  ;;  %4336 = vmatprep.mubr.msk.f32.mxu0 %vm55_vm0, %v3483_v50 }
  0xbd   :  { %4281 = vmatmul.mubr.msk.f32.gmra.mrb[90].mxu1 %vm55_vm0, %v3484_v51  ;;  %4337 = vmatmul.mubr.msk.f32.gmra.mrb[42].mxu0 %vm55_vm0, %v3484_v51 }
  0xbe   :  { %4283 = vmatprep.mubr.msk.f32.mxu1 %vm55_vm0, %v3485_v52  ;;  %4339 = vmatprep.mubr.msk.f32.mxu0 %vm55_vm0, %v3485_v52 }
  0xc1   :  { %4284 = vmatmul.mubr.msk.f32.gmra.mrb[92].mxu1 %vm55_vm0, %v3486_v53  ;;  %4340 = vmatmul.mubr.msk.f32.gmra.mrb[44].mxu0 %vm55_vm0, %v3486_v53 }
  0xc2   :  { %4286 = vmatprep.mubr.msk.f32.mxu1 %vm55_vm0, %v3487_v54  ;;  %4342 = vmatprep.mubr.msk.f32.mxu0 %vm55_vm0, %v3487_v54 }
  0xc5   :  { %4287 = vmatmul.mubr.msk.f32.gmra.mrb[94].mxu1 %vm55_vm0, %v3488_v55  ;;  %4343 = vmatmul.mubr.msk.f32.gmra.mrb[46].mxu0 %vm55_vm0, %v3488_v55 }
  0xc6   :  { %4349 = vmatprep.mubr.msk.f32.mxu1 %vm55_vm0, %v3589_v56  ;;  %4405 = vmatprep.mubr.msk.f32.mxu0 %vm55_vm0, %v3589_v56 }
  0xc9   :  { %4350 = vmatmul.mubr.msk.f32.vlgmr.msra.gmra.mrb[96].mxu1 %vm55_vm0, %v3590_v57  ;;  %4406 = vmatmul.mubr.msk.f32.vlgmr.msra.gmra.mrb[48].mxu0 %vm55_vm0, %v3590_v57 }
  0xca   :  { %4512 = vmatpush3.bf16.msra.mxu1 %v5009_v26  ;;  %4352 = vmatprep.mubr.msk.f32.mxu1 %vm55_vm0, %v3591_v58 }
  0xcb   :  { %4408 = vmatprep.mubr.msk.f32.mxu0 %vm55_vm0, %v3591_v58  ;;  %4520 = vmatpush3.bf16.msra.mxu0 %v5006_v25  ;;  %v3620_v58 = vld [vmem:[%s6100_s0 + $0x3f8] sm:$0xff] }
  0xcd   :  { %4353 = vmatmul.mubr.msk.f32.gmra.mrb[98].mxu1 %vm55_vm0, %v3592_v59  ;;  %4409 = vmatmul.mubr.msk.f32.gmra.mrb[50].mxu0 %vm55_vm0, %v3592_v59 }
  0xce   :  { %4355 = vmatprep.mubr.msk.f32.mxu1 %vm55_vm0, %v3593_v60  ;;  %4411 = vmatprep.mubr.msk.f32.mxu0 %vm55_vm0, %v3593_v60 }
  0xd1   :  { %4356 = vmatmul.mubr.msk.f32.gmra.mrb[100].mxu1 %vm55_vm0, %v3594_v61  ;;  %4412 = vmatmul.mubr.msk.f32.gmra.mrb[52].mxu0 %vm55_vm0, %v3594_v61 }
  0xd2   :  { %4358 = vmatprep.mubr.msk.f32.mxu1 %vm55_vm0, %v3595_v62  ;;  %4414 = vmatprep.mubr.msk.f32.mxu0 %vm55_vm0, %v3595_v62 }
  0xd5   :  { %4359 = vmatmul.mubr.msk.f32.gmra.mrb[102].mxu1 %vm55_vm0, %v3596_v63  ;;  %4415 = vmatmul.mubr.msk.f32.gmra.mrb[54].mxu0 %vm55_vm0, %v3596_v63 }
  0xd6   :  { %4361 = vmatprep.mubr.msk.f32.mxu1 %vm55_vm0, %v3597_v0  ;;  %4417 = vmatprep.mubr.msk.f32.mxu0 %vm55_vm0, %v3597_v0 }
  0xd9   :  { %4362 = vmatmul.mubr.msk.f32.gmra.mrb[104].mxu1 %vm55_vm0, %v3598_v1  ;;  %4418 = vmatmul.mubr.msk.f32.gmra.mrb[56].mxu0 %vm55_vm0, %v3598_v1 }
  0xda   :  { %4364 = vmatprep.mubr.msk.f32.mxu1 %vm55_vm0, %v3599_v2  ;;  %4420 = vmatprep.mubr.msk.f32.mxu0 %vm55_vm0, %v3599_v2 }
  0xdc   :  { %v5230_v5 = vpop.f32.mrb[0].mxu1 }
  0xdd   :  { %v5232_v6 = vpop.f32.mrb[1].mxu1  ;;  %4365 = vmatmul.mubr.msk.f32.gmra.mrb[106].mxu1 %vm55_vm0, %v3600_v3  ;;  %4421 = vmatmul.mubr.msk.f32.gmra.mrb[58].mxu0 %vm55_vm0, %v3600_v3 }
  0xde   :  { %4367 = vmatprep.mubr.msk.f32.mxu1 %vm55_vm0, %v3601_v4  ;;  %4423 = vmatprep.mubr.msk.f32.mxu0 %vm55_vm0, %v3601_v4 }
  0xe0   :  { %v5244_v9 = vpop.f32.mrb[2].mxu1 }
  0xe1   :  { %v5246_v10 = vpop.f32.mrb[3].mxu1  ;;  %4368 = vmatmul.mubr.msk.f32.gmra.mrb[108].mxu1 %vm55_vm0, %v3602_v7  ;;  %4424 = vmatmul.mubr.msk.f32.gmra.mrb[60].mxu0 %vm55_vm0, %v3602_v7 }
  0xe2   :  { %4370 = vmatprep.mubr.msk.f32.mxu1 %vm55_vm0, %v3603_v8  ;;  %4426 = vmatprep.mubr.msk.f32.mxu0 %vm55_vm0, %v3603_v8 }
  0xe4   :  { %v5258_v13 = vpop.f32.mrb[4].mxu1 }
  0xe5   :  { %v5260_v14 = vpop.f32.mrb[5].mxu1  ;;  %4371 = vmatmul.mubr.msk.f32.gmra.mrb[110].mxu1 %vm55_vm0, %v3604_v11  ;;  %4427 = vmatmul.mubr.msk.f32.gmra.mrb[62].mxu0 %vm55_vm0, %v3604_v11 }
  0xe6   :  { %4377 = vmatprep.mubr.msk.f32.mxu1 %vm55_vm0, %v3605_v12  ;;  %4433 = vmatprep.mubr.msk.f32.mxu0 %vm55_vm0, %v3605_v12 }
  0xe8   :  { %v5272_v17 = vpop.f32.mrb[6].mxu1 }
  0xe9   :  { %v5274_v18 = vpop.f32.mrb[7].mxu1  ;;  %4378 = vmatmul.mubr.msk.f32.vlgmr.msra.gmra.mrb[112].mxu1 %vm55_vm0, %v3606_v15  ;;  %4434 = vmatmul.mubr.msk.f32.vlgmr.msra.gmra.mrb[48].mxu0 %vm55_vm0, %v3606_v15 }
  0xea   :  { %4380 = vmatprep.mubr.msk.f32.mxu1 %vm55_vm0, %v3607_v16  ;;  %4436 = vmatprep.mubr.msk.f32.mxu0 %vm55_vm0, %v3607_v16 }
  0xec   :  { %v5286_v21 = vpop.f32.mrb[8].mxu1 }
  0xed   :  { %v5288_v22 = vpop.f32.mrb[9].mxu1  ;;  %4381 = vmatmul.mubr.msk.f32.gmra.mrb[114].mxu1 %vm55_vm0, %v3608_v19  ;;  %4437 = vmatmul.mubr.msk.f32.gmra.mrb[50].mxu0 %vm55_vm0, %v3608_v19 }
  0xee   :  { %4383 = vmatprep.mubr.msk.f32.mxu1 %vm55_vm0, %v3609_v20  ;;  %4439 = vmatprep.mubr.msk.f32.mxu0 %vm55_vm0, %v3609_v20 }
  0xf0   :  { %v5300_v25 = vpop.f32.mrb[10].mxu1 }
  0xf1   :  { %v5302_v26 = vpop.f32.mrb[11].mxu1  ;;  %4384 = vmatmul.mubr.msk.f32.gmra.mrb[116].mxu1 %vm55_vm0, %v3610_v23  ;;  %4440 = vmatmul.mubr.msk.f32.gmra.mrb[52].mxu0 %vm55_vm0, %v3610_v23 }
  0xf2   :  { %4386 = vmatprep.mubr.msk.f32.mxu1 %vm55_vm0, %v3611_v24  ;;  %4442 = vmatprep.mubr.msk.f32.mxu0 %vm55_vm0, %v3611_v24 }
  0xf4   :  { %v5314_v29 = vpop.f32.mrb[12].mxu1 }
  0xf5   :  { %v5316_v30 = vpop.f32.mrb[13].mxu1  ;;  %4387 = vmatmul.mubr.msk.f32.gmra.mrb[118].mxu1 %vm55_vm0, %v3612_v27  ;;  %4443 = vmatmul.mubr.msk.f32.gmra.mrb[54].mxu0 %vm55_vm0, %v3612_v27 }
  0xf6   :  { %4389 = vmatprep.mubr.msk.f32.mxu1 %vm55_vm0, %v3613_v28  ;;  %4445 = vmatprep.mubr.msk.f32.mxu0 %vm55_vm0, %v3613_v28 }
  0xf8   :  { %v5328_v33 = vpop.f32.mrb[14].mxu1 }
  0xf9   :  { %v5330_v34 = vpop.f32.mrb[15].mxu1  ;;  %4390 = vmatmul.mubr.msk.f32.gmra.mrb[120].mxu1 %vm55_vm0, %v3614_v31  ;;  %4446 = vmatmul.mubr.msk.f32.gmra.mrb[56].mxu0 %vm55_vm0, %v3614_v31 }
  0xfa   :  { %4392 = vmatprep.mubr.msk.f32.mxu1 %vm55_vm0, %v3615_v32  ;;  %4448 = vmatprep.mubr.msk.f32.mxu0 %vm55_vm0, %v3615_v32 }
  0xfc   :  { %v4043_v39 = vpop.f32.mrb[16].mxu1  ;;  %v4099_v41 = vpop.f32.mrb[0].mxu0 }
  0xfd   :  { %v443_v40 = vsub.f32 %v5230_v5, %v4043_v39  ;;  %v363_v42 = vpop.f32.mrb[17].mxu1  ;;  %4393 = vmatmul.mubr.msk.f32.gmra.mrb[122].mxu1 %vm55_vm0, %v3616_v35  ;;  %v777_v43 = vadd.f32 %v4099_v41, %v5341_v36  ;;  %v691_v45 = vpop.f32.mrb[1].mxu0  ;;  %4449 = vmatmul.mubr.msk.f32.gmra.mrb[58].mxu0 %vm55_vm0, %v3616_v35 }
  0xfe   :  { %v442_v44 = vsub.f32 %v5232_v6, %v363_v42  ;;  %4395 = vmatprep.mubr.msk.f32.mxu1 %vm55_vm0, %v3617_v37  ;;  %v776_v48 = vadd.f32 %v5341_v36, %v691_v45  ;;  %4451 = vmatprep.mubr.msk.f32.mxu0 %vm55_vm0, %v3617_v37 }
  0xff   :  { %v465_v47 = vadd.f32 %v5350_v38, %v443_v40  ;;  %3310 = vst.msk [vmem:[%s6102_s3 + $0x208] sm:$0xff] %vm792_vm1, %v777_v43 }
 0x100   :  { %v464_v50 = vadd.f32 %v5350_v38, %v442_v44  ;;  %v4046_v51 = vpop.f32.mrb[18].mxu1  ;;  %3309 = vst.msk [vmem:[%s6102_s3 + $0x200] sm:$0xff] %vm792_vm1, %v776_v48  ;;  %v4102_v53 = vpop.f32.mrb[2].mxu0 }
 0x101   :  { %794 = vst.msk [vmem:[%s6102_s3 + $0x8] sm:$0xff] %vm792_vm1, %v465_v47  ;;  %v445_v52 = vsub.f32 %v5244_v9, %v4046_v51  ;;  %v373_v54 = vpop.f32.mrb[19].mxu1  ;;  %4396 = vmatmul.mubr.msk.f32.gmra.mrb[124].mxu1 %vm55_vm0, %v3618_v46  ;;  %v779_v55 = vadd.f32 %v4102_v53, %v5341_v36  ;;  %v701_v57 = vpop.f32.mrb[3].mxu0  ;;  %4452 = vmatmul.mubr.msk.f32.gmra.mrb[60].mxu0 %vm55_vm0, %v3618_v46 }
 0x102   :  { %793 = vst.msk [vmem:[%s6102_s3] sm:$0xff] %vm792_vm1, %v464_v50  ;;  %v444_v56 = vsub.f32 %v5246_v10, %v373_v54  ;;  %4398 = vmatprep.mubr.msk.f32.mxu1 %vm55_vm0, %v3619_v49  ;;  %v778_v60 = vadd.f32 %v5341_v36, %v701_v57  ;;  %4454 = vmatprep.mubr.msk.f32.mxu0 %vm55_vm0, %v3619_v49 }
 0x103   :  { %v467_v59 = vadd.f32 %v5350_v38, %v445_v52  ;;  %3312 = vst.msk [vmem:[%s6102_s3 + $0x218] sm:$0xff] %vm792_vm1, %v779_v55 }
 0x104   :  { %v466_v61 = vadd.f32 %v5350_v38, %v444_v56  ;;  %v4049_v62 = vpop.f32.mrb[20].mxu1  ;;  %3311 = vst.msk [vmem:[%s6102_s3 + $0x210] sm:$0xff] %vm792_vm1, %v778_v60  ;;  %v4105_v0 = vpop.f32.mrb[4].mxu0 }
 0x105   :  { %796 = vst.msk [vmem:[%s6102_s3 + $0x18] sm:$0xff] %vm792_vm1, %v467_v59  ;;  %v447_v63 = vsub.f32 %v5258_v13, %v4049_v62  ;;  %v383_v1 = vpop.f32.mrb[21].mxu1  ;;  %4399 = vmatmul.mubr.msk.f32.gmra.mrb[126].mxu1 %vm55_vm0, %v3620_v58  ;;  %v781_v2 = vadd.f32 %v4105_v0, %v5341_v36  ;;  %v711_v4 = vpop.f32.mrb[5].mxu0  ;;  %4455 = vmatmul.mubr.msk.f32.gmra.mrb[62].mxu0 %vm55_vm0, %v3620_v58 }
 0x106   :  { %795 = vst.msk [vmem:[%s6102_s3 + $0x10] sm:$0xff] %vm792_vm1, %v466_v61  ;;  %v446_v3 = vsub.f32 %v5260_v14, %v383_v1  ;;  %v780_v6 = vadd.f32 %v5341_v36, %v711_v4 }
 0x107   :  { %v469_v5 = vadd.f32 %v5350_v38, %v447_v63  ;;  %3314 = vst.msk [vmem:[%s6102_s3 + $0x228] sm:$0xff] %vm792_vm1, %v781_v2 }
 0x108   :  { %v468_v7 = vadd.f32 %v5350_v38, %v446_v3  ;;  %v4052_v8 = vpop.f32.mrb[22].mxu1  ;;  %3313 = vst.msk [vmem:[%s6102_s3 + $0x220] sm:$0xff] %vm792_vm1, %v780_v6  ;;  %v4108_v10 = vpop.f32.mrb[6].mxu0 }
 0x109   :  { %798 = vst.msk [vmem:[%s6102_s3 + $0x28] sm:$0xff] %vm792_vm1, %v469_v5  ;;  %v449_v9 = vsub.f32 %v5272_v17, %v4052_v8  ;;  %v393_v11 = vpop.f32.mrb[23].mxu1  ;;  %v783_v12 = vadd.f32 %v4108_v10, %v5341_v36  ;;  %v721_v14 = vpop.f32.mrb[7].mxu0 }
 0x10a   :  { %797 = vst.msk [vmem:[%s6102_s3 + $0x20] sm:$0xff] %vm792_vm1, %v468_v7  ;;  %v448_v13 = vsub.f32 %v5274_v18, %v393_v11  ;;  %v782_v16 = vadd.f32 %v5341_v36, %v721_v14 }
 0x10b   :  { %v471_v15 = vadd.f32 %v5350_v38, %v449_v9  ;;  %3316 = vst.msk [vmem:[%s6102_s3 + $0x238] sm:$0xff] %vm792_vm1, %v783_v12 }
 0x10c   :  { %v470_v17 = vadd.f32 %v5350_v38, %v448_v13  ;;  %v4055_v19 = vpop.f32.mrb[24].mxu1  ;;  %3315 = vst.msk [vmem:[%s6102_s3 + $0x230] sm:$0xff] %vm792_vm1, %v782_v16  ;;  %v4111_v20 = vpop.f32.mrb[8].mxu0 }
 0x10d   :  { %800 = vst.msk [vmem:[%s6102_s3 + $0x38] sm:$0xff] %vm792_vm1, %v471_v15  ;;  %v451_v18 = vsub.f32 %v5286_v21, %v4055_v19  ;;  %v403_v23 = vpop.f32.mrb[25].mxu1  ;;  %v785_v24 = vadd.f32 %v4111_v20, %v5341_v36  ;;  %v731_v28 = vpop.f32.mrb[9].mxu0 }
 0x10e   :  { %799 = vst.msk [vmem:[%s6102_s3 + $0x30] sm:$0xff] %vm792_vm1, %v470_v17  ;;  %v450_v27 = vsub.f32 %v5288_v22, %v403_v23  ;;  %v784_v32 = vadd.f32 %v5341_v36, %v731_v28 }
 0x10f   :  { %v473_v31 = vadd.f32 %v5350_v38, %v451_v18  ;;  %3318 = vst.msk [vmem:[%s6102_s3 + $0x248] sm:$0xff] %vm792_vm1, %v785_v24 }
 0x110   :  { %v472_v21 = vadd.f32 %v5350_v38, %v450_v27  ;;  %v4058_v35 = vpop.f32.mrb[26].mxu1  ;;  %3317 = vst.msk [vmem:[%s6102_s3 + $0x240] sm:$0xff] %vm792_vm1, %v784_v32  ;;  %v4114_v37 = vpop.f32.mrb[10].mxu0 }
 0x111   :  { %802 = vst.msk [vmem:[%s6102_s3 + $0x48] sm:$0xff] %vm792_vm1, %v473_v31  ;;  %v453_v22 = vsub.f32 %v5300_v25, %v4058_v35  ;;  %v413_v39 = vpop.f32.mrb[27].mxu1  ;;  %v787_v40 = vadd.f32 %v4114_v37, %v5341_v36  ;;  %v741_v42 = vpop.f32.mrb[11].mxu0 }
 0x112   :  { %801 = vst.msk [vmem:[%s6102_s3 + $0x40] sm:$0xff] %vm792_vm1, %v472_v21  ;;  %v452_v41 = vsub.f32 %v5302_v26, %v413_v39  ;;  %v786_v44 = vadd.f32 %v5341_v36, %v741_v42 }
 0x113   :  { %v475_v43 = vadd.f32 %v5350_v38, %v453_v22  ;;  %3320 = vst.msk [vmem:[%s6102_s3 + $0x258] sm:$0xff] %vm792_vm1, %v787_v40 }
 0x114   :  { %v474_v25 = vadd.f32 %v5350_v38, %v452_v41  ;;  %v4061_v45 = vpop.f32.mrb[28].mxu1  ;;  %3319 = vst.msk [vmem:[%s6102_s3 + $0x250] sm:$0xff] %vm792_vm1, %v786_v44  ;;  %v4117_v46 = vpop.f32.mrb[12].mxu0 }
 0x115   :  { %804 = vst.msk [vmem:[%s6102_s3 + $0x58] sm:$0xff] %vm792_vm1, %v475_v43  ;;  %v455_v26 = vsub.f32 %v5314_v29, %v4061_v45  ;;  %v423_v47 = vpop.f32.mrb[29].mxu1  ;;  %v789_v48 = vadd.f32 %v4117_v46, %v5341_v36  ;;  %v751_v50 = vpop.f32.mrb[13].mxu0 }
 0x116   :  { %803 = vst.msk [vmem:[%s6102_s3 + $0x50] sm:$0xff] %vm792_vm1, %v474_v25  ;;  %v454_v49 = vsub.f32 %v5316_v30, %v423_v47  ;;  %v788_v52 = vadd.f32 %v5341_v36, %v751_v50 }
 0x117   :  { %v477_v51 = vadd.f32 %v5350_v38, %v455_v26  ;;  %3322 = vst.msk [vmem:[%s6102_s3 + $0x268] sm:$0xff] %vm792_vm1, %v789_v48 }
 0x118   :  { %v476_v29 = vadd.f32 %v5350_v38, %v454_v49  ;;  %v4064_v53 = vpop.f32.mrb[30].mxu1  ;;  %3321 = vst.msk [vmem:[%s6102_s3 + $0x260] sm:$0xff] %vm792_vm1, %v788_v52  ;;  %v4120_v54 = vpop.f32.mrb[14].mxu0 }
 0x119   :  { %806 = vst.msk [vmem:[%s6102_s3 + $0x68] sm:$0xff] %vm792_vm1, %v477_v51  ;;  %v457_v30 = vsub.f32 %v5328_v33, %v4064_v53  ;;  %v433_v55 = vpop.f32.mrb[31].mxu1  ;;  %v791_v56 = vadd.f32 %v4120_v54, %v5341_v36  ;;  %v761_v58 = vpop.f32.mrb[15].mxu0 }
 0x11a   :  { %805 = vst.msk [vmem:[%s6102_s3 + $0x60] sm:$0xff] %vm792_vm1, %v476_v29  ;;  %v456_v57 = vsub.f32 %v5330_v34, %v433_v55  ;;  %v790_v60 = vadd.f32 %v5341_v36, %v761_v58 }
 0x11b   :  { %v479_v59 = vadd.f32 %v5350_v38, %v457_v30  ;;  %3324 = vst.msk [vmem:[%s6102_s3 + $0x278] sm:$0xff] %vm792_vm1, %v791_v56 }
 0x11c   :  { %v478_v33 = vadd.f32 %v5350_v38, %v456_v57  ;;  %v4127_v61 = vpop.f32.mrb[32].mxu1  ;;  %3323 = vst.msk [vmem:[%s6102_s3 + $0x270] sm:$0xff] %vm792_vm1, %v790_v60 }
 0x11d   :  { %808 = vst.msk [vmem:[%s6102_s3 + $0x78] sm:$0xff] %vm792_vm1, %v479_v59  ;;  %v980_v34 = vpop.f32.mrb[33].mxu1 }
 0x11e   :  { %807 = vst.msk [vmem:[%s6102_s3 + $0x70] sm:$0xff] %vm792_vm1, %v478_v33 }
 0x120   :  { %v4130_v62 = vpop.f32.mrb[34].mxu1 }
 0x121   :  { %v990_v63 = vpop.f32.mrb[35].mxu1 }
 0x124   :  { %v4133_v0 = vpop.f32.mrb[36].mxu1 }
 0x125   :  { %v1000_v1 = vpop.f32.mrb[37].mxu1 }
 0x128   :  { %v4136_v2 = vpop.f32.mrb[38].mxu1 }
 0x129   :  { %v1010_v3 = vpop.f32.mrb[39].mxu1 }
 0x12c   :  { %v5547_v4 = vpop.f32.mrb[40].mxu1 }
 0x12d   :  { %v5549_v5 = vpop.f32.mrb[41].mxu1 }
 0x130   :  { %v5551_v6 = vpop.f32.mrb[42].mxu1 }
 0x131   :  { %v5553_v7 = vpop.f32.mrb[43].mxu1 }
 0x134   :  { %v5555_v8 = vpop.f32.mrb[44].mxu1 }
 0x135   :  { %v5557_v9 = vpop.f32.mrb[45].mxu1 }
 0x138   :  { %v5559_v10 = vpop.f32.mrb[46].mxu1 }
 0x139   :  { %v5561_v11 = vpop.f32.mrb[47].mxu1 }
 0x13c   :  { %v4155_v12 = vpop.f32.mrb[48].mxu1  ;;  %v4211_v14 = vpop.f32.mrb[16].mxu0 }
 0x13d   :  { %v1253_v13 = vsub.f32 %v4127_v61, %v4155_v12  ;;  %v1173_v15 = vpop.f32.mrb[49].mxu1  ;;  %v1575_v16 = vadd.f32 %v4211_v14, %v5341_v36  ;;  %v1495_v19 = vpop.f32.mrb[17].mxu0 }
 0x13e   :  { %v1252_v17 = vsub.f32 %v980_v34, %v1173_v15  ;;  %v1574_v20 = vadd.f32 %v5341_v36, %v1495_v19 }
 0x13f   :  { %v1269_v18 = vadd.f32 %v5350_v38, %v1253_v13  ;;  %3442 = vst.msk [vmem:[%s6102_s3 + $0x288] sm:$0xff] %vm792_vm1, %v1575_v16 }
 0x140   :  { %v1268_v23 = vadd.f32 %v5350_v38, %v1252_v17  ;;  %v4158_v24 = vpop.f32.mrb[50].mxu1  ;;  %3441 = vst.msk [vmem:[%s6102_s3 + $0x280] sm:$0xff] %vm792_vm1, %v1574_v20  ;;  %v4214_v28 = vpop.f32.mrb[18].mxu0 }
 0x141   :  { %3426 = vst.msk [vmem:[%s6102_s3 + $0x88] sm:$0xff] %vm792_vm1, %v1269_v18  ;;  %v1255_v27 = vsub.f32 %v4130_v62, %v4158_v24  ;;  %v1183_v31 = vpop.f32.mrb[51].mxu1  ;;  %v1577_v32 = vadd.f32 %v4214_v28, %v5341_v36  ;;  %v1505_v35 = vpop.f32.mrb[19].mxu0 }
 0x142   :  { %3425 = vst.msk [vmem:[%s6102_s3 + $0x80] sm:$0xff] %vm792_vm1, %v1268_v23  ;;  %v1254_v21 = vsub.f32 %v990_v63, %v1183_v31  ;;  %v1576_v37 = vadd.f32 %v5341_v36, %v1505_v35 }
 0x143   :  { %v1271_v22 = vadd.f32 %v5350_v38, %v1255_v27  ;;  %3444 = vst.msk [vmem:[%s6102_s3 + $0x298] sm:$0xff] %vm792_vm1, %v1577_v32 }
 0x144   :  { %v1270_v39 = vadd.f32 %v5350_v38, %v1254_v21  ;;  %v4161_v40 = vpop.f32.mrb[52].mxu1  ;;  %3443 = vst.msk [vmem:[%s6102_s3 + $0x290] sm:$0xff] %vm792_vm1, %v1576_v37  ;;  %v4217_v42 = vpop.f32.mrb[20].mxu0 }
 0x145   :  { %3428 = vst.msk [vmem:[%s6102_s3 + $0x98] sm:$0xff] %vm792_vm1, %v1271_v22  ;;  %v1257_v41 = vsub.f32 %v4133_v0, %v4161_v40  ;;  %v1193_v43 = vpop.f32.mrb[53].mxu1  ;;  %v1579_v44 = vadd.f32 %v4217_v42, %v5341_v36  ;;  %v1515_v45 = vpop.f32.mrb[21].mxu0 }
 0x146   :  { %3427 = vst.msk [vmem:[%s6102_s3 + $0x90] sm:$0xff] %vm792_vm1, %v1270_v39  ;;  %v1256_v25 = vsub.f32 %v1000_v1, %v1193_v43  ;;  %v1578_v46 = vadd.f32 %v5341_v36, %v1515_v45 }
 0x147   :  { %v1273_v26 = vadd.f32 %v5350_v38, %v1257_v41  ;;  %3446 = vst.msk [vmem:[%s6102_s3 + $0x2a8] sm:$0xff] %vm792_vm1, %v1579_v44 }
 0x148   :  { %v1272_v47 = vadd.f32 %v5350_v38, %v1256_v25  ;;  %v4164_v48 = vpop.f32.mrb[54].mxu1  ;;  %3445 = vst.msk [vmem:[%s6102_s3 + $0x2a0] sm:$0xff] %vm792_vm1, %v1578_v46  ;;  %v4220_v50 = vpop.f32.mrb[22].mxu0 }
 0x149   :  { %3430 = vst.msk [vmem:[%s6102_s3 + $0xa8] sm:$0xff] %vm792_vm1, %v1273_v26  ;;  %v1259_v49 = vsub.f32 %v4136_v2, %v4164_v48  ;;  %v1203_v51 = vpop.f32.mrb[55].mxu1  ;;  %v1581_v52 = vadd.f32 %v4220_v50, %v5341_v36  ;;  %v1525_v53 = vpop.f32.mrb[23].mxu0 }
 0x14a   :  { %3429 = vst.msk [vmem:[%s6102_s3 + $0xa0] sm:$0xff] %vm792_vm1, %v1272_v47  ;;  %v1258_v29 = vsub.f32 %v1010_v3, %v1203_v51  ;;  %v1580_v54 = vadd.f32 %v5341_v36, %v1525_v53 }
 0x14b   :  { %v1275_v30 = vadd.f32 %v5350_v38, %v1259_v49  ;;  %3448 = vst.msk [vmem:[%s6102_s3 + $0x2b8] sm:$0xff] %vm792_vm1, %v1581_v52 }
 0x14c   :  { %v1274_v55 = vadd.f32 %v5350_v38, %v1258_v29  ;;  %v4167_v56 = vpop.f32.mrb[56].mxu1  ;;  %3447 = vst.msk [vmem:[%s6102_s3 + $0x2b0] sm:$0xff] %vm792_vm1, %v1580_v54  ;;  %v4223_v58 = vpop.f32.mrb[24].mxu0 }
 0x14d   :  { %3432 = vst.msk [vmem:[%s6102_s3 + $0xb8] sm:$0xff] %vm792_vm1, %v1275_v30  ;;  %v1261_v57 = vsub.f32 %v5547_v4, %v4167_v56  ;;  %v1213_v59 = vpop.f32.mrb[57].mxu1  ;;  %v1583_v60 = vadd.f32 %v4223_v58, %v5341_v36  ;;  %v1535_v61 = vpop.f32.mrb[25].mxu0 }
 0x14e   :  { %3431 = vst.msk [vmem:[%s6102_s3 + $0xb0] sm:$0xff] %vm792_vm1, %v1274_v55  ;;  %v1260_v33 = vsub.f32 %v5549_v5, %v1213_v59  ;;  %v1582_v62 = vadd.f32 %v5341_v36, %v1535_v61 }
 0x14f   :  { %v1277_v34 = vadd.f32 %v5350_v38, %v1261_v57  ;;  %3450 = vst.msk [vmem:[%s6102_s3 + $0x2c8] sm:$0xff] %vm792_vm1, %v1583_v60 }
 0x150   :  { %v1276_v63 = vadd.f32 %v5350_v38, %v1260_v33  ;;  %v4170_v0 = vpop.f32.mrb[58].mxu1  ;;  %3449 = vst.msk [vmem:[%s6102_s3 + $0x2c0] sm:$0xff] %vm792_vm1, %v1582_v62  ;;  %v4226_v2 = vpop.f32.mrb[26].mxu0 }
 0x151   :  { %3434 = vst.msk [vmem:[%s6102_s3 + $0xc8] sm:$0xff] %vm792_vm1, %v1277_v34  ;;  %v1263_v1 = vsub.f32 %v5551_v6, %v4170_v0  ;;  %v1223_v3 = vpop.f32.mrb[59].mxu1  ;;  %v1585_v4 = vadd.f32 %v4226_v2, %v5341_v36  ;;  %v1545_v12 = vpop.f32.mrb[27].mxu0 }
 0x152   :  { %3433 = vst.msk [vmem:[%s6102_s3 + $0xc0] sm:$0xff] %vm792_vm1, %v1276_v63  ;;  %v1262_v5 = vsub.f32 %v5553_v7, %v1223_v3  ;;  %v1584_v14 = vadd.f32 %v5341_v36, %v1545_v12 }
 0x153   :  { %v1279_v13 = vadd.f32 %v5350_v38, %v1263_v1  ;;  %3452 = vst.msk [vmem:[%s6102_s3 + $0x2d8] sm:$0xff] %vm792_vm1, %v1585_v4 }
 0x154   :  { %v1278_v6 = vadd.f32 %v5350_v38, %v1262_v5  ;;  %v4173_v15 = vpop.f32.mrb[60].mxu1  ;;  %3451 = vst.msk [vmem:[%s6102_s3 + $0x2d0] sm:$0xff] %vm792_vm1, %v1584_v14  ;;  %v4229_v16 = vpop.f32.mrb[28].mxu0 }
 0x155   :  { %3436 = vst.msk [vmem:[%s6102_s3 + $0xd8] sm:$0xff] %vm792_vm1, %v1279_v13  ;;  %v1265_v7 = vsub.f32 %v5555_v8, %v4173_v15  ;;  %v1233_v17 = vpop.f32.mrb[61].mxu1  ;;  %v1587_v19 = vadd.f32 %v4229_v16, %v5341_v36  ;;  %v1555_v20 = vpop.f32.mrb[29].mxu0 }
 0x156   :  { %3435 = vst.msk [vmem:[%s6102_s3 + $0xd0] sm:$0xff] %vm792_vm1, %v1278_v6  ;;  %v1264_v18 = vsub.f32 %v5557_v9, %v1233_v17  ;;  %v1586_v24 = vadd.f32 %v5341_v36, %v1555_v20 }
 0x157   :  { %v1281_v23 = vadd.f32 %v5350_v38, %v1265_v7  ;;  %3454 = vst.msk [vmem:[%s6102_s3 + $0x2e8] sm:$0xff] %vm792_vm1, %v1587_v19 }
 0x158   :  { %v1280_v8 = vadd.f32 %v5350_v38, %v1264_v18  ;;  %v4176_v27 = vpop.f32.mrb[62].mxu1  ;;  %3453 = vst.msk [vmem:[%s6102_s3 + $0x2e0] sm:$0xff] %vm792_vm1, %v1586_v24  ;;  %v4232_v28 = vpop.f32.mrb[30].mxu0 }
 0x159   :  { %3438 = vst.msk [vmem:[%s6102_s3 + $0xe8] sm:$0xff] %vm792_vm1, %v1281_v23  ;;  %v1267_v9 = vsub.f32 %v5559_v10, %v4176_v27  ;;  %v1243_v31 = vpop.f32.mrb[63].mxu1  ;;  %v1589_v32 = vadd.f32 %v4232_v28, %v5341_v36  ;;  %v1565_v35 = vpop.f32.mrb[31].mxu0 }
 0x15a   :  { %3437 = vst.msk [vmem:[%s6102_s3 + $0xe0] sm:$0xff] %vm792_vm1, %v1280_v8  ;;  %v1266_v21 = vsub.f32 %v5561_v11, %v1243_v31  ;;  %v1588_v37 = vadd.f32 %v5341_v36, %v1565_v35 }
 0x15b   :  { %v1283_v22 = vadd.f32 %v5350_v38, %v1267_v9  ;;  %3456 = vst.msk [vmem:[%s6102_s3 + $0x2f8] sm:$0xff] %vm792_vm1, %v1589_v32 }
 0x15c   :  { %v1282_v10 = vadd.f32 %v5350_v38, %v1266_v21  ;;  %v4239_v39 = vpop.f32.mrb[64].mxu1  ;;  %3455 = vst.msk [vmem:[%s6102_s3 + $0x2f0] sm:$0xff] %vm792_vm1, %v1588_v37 }
 0x15d   :  { %3440 = vst.msk [vmem:[%s6102_s3 + $0xf8] sm:$0xff] %vm792_vm1, %v1283_v22  ;;  %v1778_v11 = vpop.f32.mrb[65].mxu1 }
 0x15e   :  { %3439 = vst.msk [vmem:[%s6102_s3 + $0xf0] sm:$0xff] %vm792_vm1, %v1282_v10 }
 0x160   :  { %v4242_v40 = vpop.f32.mrb[66].mxu1 }
 0x161   :  { %v1788_v41 = vpop.f32.mrb[67].mxu1 }
 0x164   :  { %v4245_v42 = vpop.f32.mrb[68].mxu1 }
 0x165   :  { %v1798_v43 = vpop.f32.mrb[69].mxu1 }
 0x168   :  { %v4248_v44 = vpop.f32.mrb[70].mxu1 }
 0x169   :  { %v1808_v25 = vpop.f32.mrb[71].mxu1 }
 0x16c   :  { %v5731_v45 = vpop.f32.mrb[72].mxu1 }
 0x16d   :  { %v5733_v26 = vpop.f32.mrb[73].mxu1 }
 0x170   :  { %v5735_v46 = vpop.f32.mrb[74].mxu1 }
 0x171   :  { %v5737_v47 = vpop.f32.mrb[75].mxu1 }
 0x174   :  { %v5739_v48 = vpop.f32.mrb[76].mxu1 }
 0x175   :  { %v5741_v49 = vpop.f32.mrb[77].mxu1 }
 0x178   :  { %v5743_v50 = vpop.f32.mrb[78].mxu1 }
 0x179   :  { %v5745_v51 = vpop.f32.mrb[79].mxu1 }
 0x17c   :  { %v4267_v52 = vpop.f32.mrb[80].mxu1  ;;  %v4323_v53 = vpop.f32.mrb[32].mxu0 }
 0x17d   :  { %v2051_v29 = vsub.f32 %v4239_v39, %v4267_v52  ;;  %v1971_v30 = vpop.f32.mrb[81].mxu1  ;;  %v2373_v54 = vadd.f32 %v4323_v53, %v5341_v36  ;;  %v2293_v56 = vpop.f32.mrb[33].mxu0 }
 0x17e   :  { %v2050_v55 = vsub.f32 %v1778_v11, %v1971_v30  ;;  %v2372_v58 = vadd.f32 %v5341_v36, %v2293_v56 }
 0x17f   :  { %v2067_v57 = vadd.f32 %v5350_v38, %v2051_v29  ;;  %3574 = vst.msk [vmem:[%s6102_s3 + $0x308] sm:$0xff] %vm792_vm1, %v2373_v54 }
 0x180   :  { %v2066_v59 = vadd.f32 %v5350_v38, %v2050_v55  ;;  %v4270_v60 = vpop.f32.mrb[82].mxu1  ;;  %3573 = vst.msk [vmem:[%s6102_s3 + $0x300] sm:$0xff] %vm792_vm1, %v2372_v58  ;;  %v4326_v61 = vpop.f32.mrb[34].mxu0 }
 0x181   :  { %3558 = vst.msk [vmem:[%s6102_s3 + $0x108] sm:$0xff] %vm792_vm1, %v2067_v57  ;;  %v2053_v33 = vsub.f32 %v4242_v40, %v4270_v60  ;;  %v1981_v34 = vpop.f32.mrb[83].mxu1  ;;  %v2375_v62 = vadd.f32 %v4326_v61, %v5341_v36  ;;  %v2303_v0 = vpop.f32.mrb[35].mxu0 }
 0x182   :  { %3557 = vst.msk [vmem:[%s6102_s3 + $0x100] sm:$0xff] %vm792_vm1, %v2066_v59  ;;  %v2052_v63 = vsub.f32 %v1788_v41, %v1981_v34  ;;  %v2374_v2 = vadd.f32 %v5341_v36, %v2303_v0 }
 0x183   :  { %v2069_v1 = vadd.f32 %v5350_v38, %v2053_v33  ;;  %3576 = vst.msk [vmem:[%s6102_s3 + $0x318] sm:$0xff] %vm792_vm1, %v2375_v62 }
 0x184   :  { %v2068_v3 = vadd.f32 %v5350_v38, %v2052_v63  ;;  %v4273_v4 = vpop.f32.mrb[84].mxu1  ;;  %3575 = vst.msk [vmem:[%s6102_s3 + $0x310] sm:$0xff] %vm792_vm1, %v2374_v2  ;;  %v4329_v12 = vpop.f32.mrb[36].mxu0 }
 0x185   :  { %3560 = vst.msk [vmem:[%s6102_s3 + $0x118] sm:$0xff] %vm792_vm1, %v2069_v1  ;;  %v2055_v5 = vsub.f32 %v4245_v42, %v4273_v4  ;;  %v1991_v13 = vpop.f32.mrb[85].mxu1  ;;  %v2377_v14 = vadd.f32 %v4329_v12, %v5341_v36  ;;  %v2313_v15 = vpop.f32.mrb[37].mxu0 }
 0x186   :  { %3559 = vst.msk [vmem:[%s6102_s3 + $0x110] sm:$0xff] %vm792_vm1, %v2068_v3  ;;  %v2054_v6 = vsub.f32 %v1798_v43, %v1991_v13  ;;  %v2376_v16 = vadd.f32 %v5341_v36, %v2313_v15 }
 0x187   :  { %v2071_v7 = vadd.f32 %v5350_v38, %v2055_v5  ;;  %3578 = vst.msk [vmem:[%s6102_s3 + $0x328] sm:$0xff] %vm792_vm1, %v2377_v14 }
 0x188   :  { %v2070_v17 = vadd.f32 %v5350_v38, %v2054_v6  ;;  %v4276_v19 = vpop.f32.mrb[86].mxu1  ;;  %3577 = vst.msk [vmem:[%s6102_s3 + $0x320] sm:$0xff] %vm792_vm1, %v2376_v16  ;;  %v4332_v20 = vpop.f32.mrb[38].mxu0 }
 0x189   :  { %3562 = vst.msk [vmem:[%s6102_s3 + $0x128] sm:$0xff] %vm792_vm1, %v2071_v7  ;;  %v2057_v18 = vsub.f32 %v4248_v44, %v4276_v19  ;;  %v2001_v23 = vpop.f32.mrb[87].mxu1  ;;  %v2379_v24 = vadd.f32 %v4332_v20, %v5341_v36  ;;  %v2323_v27 = vpop.f32.mrb[39].mxu0 }
 0x18a   :  { %3561 = vst.msk [vmem:[%s6102_s3 + $0x120] sm:$0xff] %vm792_vm1, %v2070_v17  ;;  %v2056_v8 = vsub.f32 %v1808_v25, %v2001_v23  ;;  %v2378_v28 = vadd.f32 %v5341_v36, %v2323_v27 }
 0x18b   :  { %v2073_v9 = vadd.f32 %v5350_v38, %v2057_v18  ;;  %3580 = vst.msk [vmem:[%s6102_s3 + $0x338] sm:$0xff] %vm792_vm1, %v2379_v24 }
 0x18c   :  { %v2072_v31 = vadd.f32 %v5350_v38, %v2056_v8  ;;  %v4279_v32 = vpop.f32.mrb[88].mxu1  ;;  %3579 = vst.msk [vmem:[%s6102_s3 + $0x330] sm:$0xff] %vm792_vm1, %v2378_v28  ;;  %v4335_v35 = vpop.f32.mrb[40].mxu0 }
 0x18d   :  { %3564 = vst.msk [vmem:[%s6102_s3 + $0x138] sm:$0xff] %vm792_vm1, %v2073_v9  ;;  %v2059_v21 = vsub.f32 %v5731_v45, %v4279_v32  ;;  %v2011_v22 = vpop.f32.mrb[89].mxu1  ;;  %v2381_v37 = vadd.f32 %v4335_v35, %v5341_v36  ;;  %v2333_v39 = vpop.f32.mrb[41].mxu0 }
 0x18e   :  { %3563 = vst.msk [vmem:[%s6102_s3 + $0x130] sm:$0xff] %vm792_vm1, %v2072_v31  ;;  %v2058_v10 = vsub.f32 %v5733_v26, %v2011_v22  ;;  %v2380_v40 = vadd.f32 %v5341_v36, %v2333_v39 }
 0x18f   :  { %v2075_v11 = vadd.f32 %v5350_v38, %v2059_v21  ;;  %3582 = vst.msk [vmem:[%s6102_s3 + $0x348] sm:$0xff] %vm792_vm1, %v2381_v37 }
 0x190   :  { %v2074_v41 = vadd.f32 %v5350_v38, %v2058_v10  ;;  %v4282_v42 = vpop.f32.mrb[90].mxu1  ;;  %3581 = vst.msk [vmem:[%s6102_s3 + $0x340] sm:$0xff] %vm792_vm1, %v2380_v40  ;;  %v4338_v44 = vpop.f32.mrb[42].mxu0 }
 0x191   :  { %3566 = vst.msk [vmem:[%s6102_s3 + $0x148] sm:$0xff] %vm792_vm1, %v2075_v11  ;;  %v2061_v43 = vsub.f32 %v5735_v46, %v4282_v42  ;;  %v2021_v25 = vpop.f32.mrb[91].mxu1  ;;  %v2383_v45 = vadd.f32 %v4338_v44, %v5341_v36  ;;  %v2343_v52 = vpop.f32.mrb[43].mxu0 }
 0x192   :  { %3565 = vst.msk [vmem:[%s6102_s3 + $0x140] sm:$0xff] %vm792_vm1, %v2074_v41  ;;  %v2060_v26 = vsub.f32 %v5737_v47, %v2021_v25  ;;  %v2382_v53 = vadd.f32 %v5341_v36, %v2343_v52 }
 0x193   :  { %v2077_v29 = vadd.f32 %v5350_v38, %v2061_v43  ;;  %3584 = vst.msk [vmem:[%s6102_s3 + $0x358] sm:$0xff] %vm792_vm1, %v2383_v45 }
 0x194   :  { %v2076_v46 = vadd.f32 %v5350_v38, %v2060_v26  ;;  %v4285_v30 = vpop.f32.mrb[92].mxu1  ;;  %3583 = vst.msk [vmem:[%s6102_s3 + $0x350] sm:$0xff] %vm792_vm1, %v2382_v53  ;;  %v4341_v54 = vpop.f32.mrb[44].mxu0 }
 0x195   :  { %3568 = vst.msk [vmem:[%s6102_s3 + $0x158] sm:$0xff] %vm792_vm1, %v2077_v29  ;;  %v2063_v47 = vsub.f32 %v5739_v48, %v4285_v30  ;;  %v2031_v55 = vpop.f32.mrb[93].mxu1  ;;  %v2385_v56 = vadd.f32 %v4341_v54, %v5341_v36  ;;  %v2353_v58 = vpop.f32.mrb[45].mxu0 }
 0x196   :  { %3567 = vst.msk [vmem:[%s6102_s3 + $0x150] sm:$0xff] %vm792_vm1, %v2076_v46  ;;  %v2062_v57 = vsub.f32 %v5741_v49, %v2031_v55  ;;  %v2384_v60 = vadd.f32 %v5341_v36, %v2353_v58 }
 0x197   :  { %v2079_v59 = vadd.f32 %v5350_v38, %v2063_v47  ;;  %3586 = vst.msk [vmem:[%s6102_s3 + $0x368] sm:$0xff] %vm792_vm1, %v2385_v56 }
 0x198   :  { %v2078_v48 = vadd.f32 %v5350_v38, %v2062_v57  ;;  %v4288_v33 = vpop.f32.mrb[94].mxu1  ;;  %3585 = vst.msk [vmem:[%s6102_s3 + $0x360] sm:$0xff] %vm792_vm1, %v2384_v60  ;;  %v4344_v61 = vpop.f32.mrb[46].mxu0 }
 0x199   :  { %3570 = vst.msk [vmem:[%s6102_s3 + $0x168] sm:$0xff] %vm792_vm1, %v2079_v59  ;;  %v2065_v49 = vsub.f32 %v5743_v50, %v4288_v33  ;;  %v2041_v34 = vpop.f32.mrb[95].mxu1  ;;  %v2387_v62 = vadd.f32 %v4344_v61, %v5341_v36  ;;  %v2363_v0 = vpop.f32.mrb[47].mxu0 }
 0x19a   :  { %3569 = vst.msk [vmem:[%s6102_s3 + $0x160] sm:$0xff] %vm792_vm1, %v2078_v48  ;;  %v2064_v63 = vsub.f32 %v5745_v51, %v2041_v34  ;;  %v2386_v2 = vadd.f32 %v5341_v36, %v2363_v0 }
 0x19b   :  { %v2081_v1 = vadd.f32 %v5350_v38, %v2065_v49  ;;  %3588 = vst.msk [vmem:[%s6102_s3 + $0x378] sm:$0xff] %vm792_vm1, %v2387_v62 }
 0x19c   :  { %v2080_v50 = vadd.f32 %v5350_v38, %v2064_v63  ;;  %v4351_v3 = vpop.f32.mrb[96].mxu1  ;;  %3587 = vst.msk [vmem:[%s6102_s3 + $0x370] sm:$0xff] %vm792_vm1, %v2386_v2 }
 0x19d   :  { %3572 = vst.msk [vmem:[%s6102_s3 + $0x178] sm:$0xff] %vm792_vm1, %v2081_v1  ;;  %v2576_v51 = vpop.f32.mrb[97].mxu1 }
 0x19e   :  { %3571 = vst.msk [vmem:[%s6102_s3 + $0x170] sm:$0xff] %vm792_vm1, %v2080_v50 }
 0x1a0   :  { %v4354_v4 = vpop.f32.mrb[98].mxu1 }
 0x1a1   :  { %v2586_v5 = vpop.f32.mrb[99].mxu1 }
 0x1a4   :  { %v4357_v12 = vpop.f32.mrb[100].mxu1 }
 0x1a5   :  { %v2596_v13 = vpop.f32.mrb[101].mxu1 }
 0x1a8   :  { %v4360_v14 = vpop.f32.mrb[102].mxu1 }
 0x1a9   :  { %v2606_v6 = vpop.f32.mrb[103].mxu1 }
 0x1ac   :  { %v5915_v15 = vpop.f32.mrb[104].mxu1 }
 0x1ad   :  { %v5917_v7 = vpop.f32.mrb[105].mxu1 }
 0x1b0   :  { %v5919_v16 = vpop.f32.mrb[106].mxu1 }
 0x1b1   :  { %v5921_v17 = vpop.f32.mrb[107].mxu1 }
 0x1b4   :  { %v5923_v19 = vpop.f32.mrb[108].mxu1 }
 0x1b5   :  { %v5925_v18 = vpop.f32.mrb[109].mxu1 }
 0x1b8   :  { %v5927_v20 = vpop.f32.mrb[110].mxu1 }
 0x1b9   :  { %v5929_v23 = vpop.f32.mrb[111].mxu1 }
 0x1bc   :  { %v4379_v24 = vpop.f32.mrb[112].mxu1  ;;  %v4435_v27 = vpop.f32.mrb[48].mxu0 }
 0x1bd   :  { %v2849_v8 = vsub.f32 %v4351_v3, %v4379_v24  ;;  %v2769_v9 = vpop.f32.mrb[113].mxu1  ;;  %v3171_v28 = vadd.f32 %v4435_v27, %v5341_v36  ;;  %v3091_v32 = vpop.f32.mrb[49].mxu0 }
 0x1be   :  { %v2848_v31 = vsub.f32 %v2576_v51, %v2769_v9  ;;  %v3170_v35 = vadd.f32 %v5341_v36, %v3091_v32 }
 0x1bf   :  { %v2865_v21 = vadd.f32 %v5350_v38, %v2849_v8  ;;  %3706 = vst.msk [vmem:[%s6102_s3 + $0x388] sm:$0xff] %vm792_vm1, %v3171_v28 }
 0x1c0   :  { %v2864_v22 = vadd.f32 %v5350_v38, %v2848_v31  ;;  %v4382_v37 = vpop.f32.mrb[114].mxu1  ;;  %3705 = vst.msk [vmem:[%s6102_s3 + $0x380] sm:$0xff] %vm792_vm1, %v3170_v35  ;;  %v4438_v39 = vpop.f32.mrb[50].mxu0 }
 0x1c1   :  { %3690 = vst.msk [vmem:[%s6102_s3 + $0x188] sm:$0xff] %vm792_vm1, %v2865_v21  ;;  %v2851_v10 = vsub.f32 %v4354_v4, %v4382_v37  ;;  %v2779_v11 = vpop.f32.mrb[115].mxu1  ;;  %v3173_v40 = vadd.f32 %v4438_v39, %v5341_v36  ;;  %v3101_v42 = vpop.f32.mrb[51].mxu0 }
 0x1c2   :  { %3689 = vst.msk [vmem:[%s6102_s3 + $0x180] sm:$0xff] %vm792_vm1, %v2864_v22  ;;  %v2850_v41 = vsub.f32 %v2586_v5, %v2779_v11  ;;  %v3172_v44 = vadd.f32 %v5341_v36, %v3101_v42 }
 0x1c3   :  { %v2867_v43 = vadd.f32 %v5350_v38, %v2851_v10  ;;  %3708 = vst.msk [vmem:[%s6102_s3 + $0x398] sm:$0xff] %vm792_vm1, %v3173_v40 }
 0x1c4   :  { %v2866_v25 = vadd.f32 %v5350_v38, %v2850_v41  ;;  %v4385_v45 = vpop.f32.mrb[116].mxu1  ;;  %3707 = vst.msk [vmem:[%s6102_s3 + $0x390] sm:$0xff] %vm792_vm1, %v3172_v44  ;;  %v4441_v52 = vpop.f32.mrb[52].mxu0 }
 0x1c5   :  { %3692 = vst.msk [vmem:[%s6102_s3 + $0x198] sm:$0xff] %vm792_vm1, %v2867_v43  ;;  %v2853_v26 = vsub.f32 %v4357_v12, %v4385_v45  ;;  %v2789_v29 = vpop.f32.mrb[117].mxu1  ;;  %v3175_v53 = vadd.f32 %v4441_v52, %v5341_v36  ;;  %v3111_v30 = vpop.f32.mrb[53].mxu0 }
 0x1c6   :  { %3691 = vst.msk [vmem:[%s6102_s3 + $0x190] sm:$0xff] %vm792_vm1, %v2866_v25  ;;  %v2852_v46 = vsub.f32 %v2596_v13, %v2789_v29  ;;  %v3174_v54 = vadd.f32 %v5341_v36, %v3111_v30 }
 0x1c7   :  { %v2869_v47 = vadd.f32 %v5350_v38, %v2853_v26  ;;  %3710 = vst.msk [vmem:[%s6102_s3 + $0x3a8] sm:$0xff] %vm792_vm1, %v3175_v53 }
 0x1c8   :  { %v2868_v55 = vadd.f32 %v5350_v38, %v2852_v46  ;;  %v4388_v56 = vpop.f32.mrb[118].mxu1  ;;  %3709 = vst.msk [vmem:[%s6102_s3 + $0x3a0] sm:$0xff] %vm792_vm1, %v3174_v54  ;;  %v4444_v58 = vpop.f32.mrb[54].mxu0 }
 0x1c9   :  { %3694 = vst.msk [vmem:[%s6102_s3 + $0x1a8] sm:$0xff] %vm792_vm1, %v2869_v47  ;;  %v2855_v57 = vsub.f32 %v4360_v14, %v4388_v56  ;;  %v2799_v59 = vpop.f32.mrb[119].mxu1  ;;  %v3177_v60 = vadd.f32 %v4444_v58, %v5341_v36  ;;  %v3121_v33 = vpop.f32.mrb[55].mxu0 }
 0x1ca   :  { %3693 = vst.msk [vmem:[%s6102_s3 + $0x1a0] sm:$0xff] %vm792_vm1, %v2868_v55  ;;  %v2854_v48 = vsub.f32 %v2606_v6, %v2799_v59  ;;  %v3176_v61 = vadd.f32 %v5341_v36, %v3121_v33 }
 0x1cb   :  { %v2871_v49 = vadd.f32 %v5350_v38, %v2855_v57  ;;  %3712 = vst.msk [vmem:[%s6102_s3 + $0x3b8] sm:$0xff] %vm792_vm1, %v3177_v60 }
 0x1cc   :  { %v2870_v34 = vadd.f32 %v5350_v38, %v2854_v48  ;;  %v4391_v62 = vpop.f32.mrb[120].mxu1  ;;  %3711 = vst.msk [vmem:[%s6102_s3 + $0x3b0] sm:$0xff] %vm792_vm1, %v3176_v61  ;;  %v4447_v0 = vpop.f32.mrb[56].mxu0 }
 0x1cd   :  { %3696 = vst.msk [vmem:[%s6102_s3 + $0x1b8] sm:$0xff] %vm792_vm1, %v2871_v49  ;;  %v2857_v63 = vsub.f32 %v5915_v15, %v4391_v62  ;;  %v2809_v1 = vpop.f32.mrb[121].mxu1  ;;  %v3179_v2 = vadd.f32 %v4447_v0, %v5341_v36  ;;  %v3131_v3 = vpop.f32.mrb[57].mxu0 }
 0x1ce   :  { %3695 = vst.msk [vmem:[%s6102_s3 + $0x1b0] sm:$0xff] %vm792_vm1, %v2870_v34  ;;  %v2856_v50 = vsub.f32 %v5917_v7, %v2809_v1  ;;  %v3178_v4 = vadd.f32 %v5341_v36, %v3131_v3 }
 0x1cf   :  { %v2873_v51 = vadd.f32 %v5350_v38, %v2857_v63  ;;  %3714 = vst.msk [vmem:[%s6102_s3 + $0x3c8] sm:$0xff] %vm792_vm1, %v3179_v2 }
 0x1d0   :  { %v2872_v5 = vadd.f32 %v5350_v38, %v2856_v50  ;;  %v4394_v12 = vpop.f32.mrb[122].mxu1  ;;  %3713 = vst.msk [vmem:[%s6102_s3 + $0x3c0] sm:$0xff] %vm792_vm1, %v3178_v4  ;;  %v4450_v14 = vpop.f32.mrb[58].mxu0 }
 0x1d1   :  { %3698 = vst.msk [vmem:[%s6102_s3 + $0x1c8] sm:$0xff] %vm792_vm1, %v2873_v51  ;;  %v2859_v13 = vsub.f32 %v5919_v16, %v4394_v12  ;;  %v2819_v6 = vpop.f32.mrb[123].mxu1  ;;  %v3181_v15 = vadd.f32 %v4450_v14, %v5341_v36  ;;  %v3141_v24 = vpop.f32.mrb[59].mxu0 }
 0x1d2   :  { %3697 = vst.msk [vmem:[%s6102_s3 + $0x1c0] sm:$0xff] %vm792_vm1, %v2872_v5  ;;  %v2858_v7 = vsub.f32 %v5921_v17, %v2819_v6  ;;  %v3180_v27 = vadd.f32 %v5341_v36, %v3141_v24 }
 0x1d3   :  { %v2875_v8 = vadd.f32 %v5350_v38, %v2859_v13  ;;  %3716 = vst.msk [vmem:[%s6102_s3 + $0x3d8] sm:$0xff] %vm792_vm1, %v3181_v15 }
 0x1d4   :  { %v2874_v16 = vadd.f32 %v5350_v38, %v2858_v7  ;;  %v4397_v9 = vpop.f32.mrb[124].mxu1  ;;  %3715 = vst.msk [vmem:[%s6102_s3 + $0x3d0] sm:$0xff] %vm792_vm1, %v3180_v27  ;;  %v4453_v28 = vpop.f32.mrb[60].mxu0 }
 0x1d5   :  { %3700 = vst.msk [vmem:[%s6102_s3 + $0x1d8] sm:$0xff] %vm792_vm1, %v2875_v8  ;;  %v2861_v17 = vsub.f32 %v5923_v19, %v4397_v9  ;;  %v2829_v31 = vpop.f32.mrb[125].mxu1  ;;  %v3183_v32 = vadd.f32 %v4453_v28, %v5341_v36  ;;  %v3151_v35 = vpop.f32.mrb[61].mxu0 }
 0x1d6   :  { %3699 = vst.msk [vmem:[%s6102_s3 + $0x1d0] sm:$0xff] %vm792_vm1, %v2874_v16  ;;  %v2860_v21 = vsub.f32 %v5925_v18, %v2829_v31  ;;  %v3182_v37 = vadd.f32 %v5341_v36, %v3151_v35 }
 0x1d7   :  { %v2877_v22 = vadd.f32 %v5350_v38, %v2861_v17  ;;  %3718 = vst.msk [vmem:[%s6102_s3 + $0x3e8] sm:$0xff] %vm792_vm1, %v3183_v32 }
 0x1d8   :  { %v2876_v19 = vadd.f32 %v5350_v38, %v2860_v21  ;;  %v4400_v10 = vpop.f32.mrb[126].mxu1  ;;  %3717 = vst.msk [vmem:[%s6102_s3 + $0x3e0] sm:$0xff] %vm792_vm1, %v3182_v37  ;;  %v4456_v39 = vpop.f32.mrb[62].mxu0 }
 0x1d9   :  { %3702 = vst.msk [vmem:[%s6102_s3 + $0x1e8] sm:$0xff] %vm792_vm1, %v2877_v22  ;;  %v2863_v18 = vsub.f32 %v5927_v20, %v4400_v10  ;;  %v2839_v11 = vpop.f32.mrb[127].mxu1  ;;  %v3185_v40 = vadd.f32 %v4456_v39, %v5341_v36  ;;  %v3161_v42 = vpop.f32.mrb[63].mxu0 }
 0x1da   :  { %3701 = vst.msk [vmem:[%s6102_s3 + $0x1e0] sm:$0xff] %vm792_vm1, %v2876_v19  ;;  %v2862_v41 = vsub.f32 %v5929_v23, %v2839_v11  ;;  %v3184_v44 = vadd.f32 %v5341_v36, %v3161_v42 }
 0x1db   :  { %v2879_v43 = vadd.f32 %v5350_v38, %v2863_v18  ;;  %3720 = vst.msk [vmem:[%s6102_s3 + $0x3f8] sm:$0xff] %vm792_vm1, %v3185_v40 }
 0x1dc   :  { %v2878_v20 = vadd.f32 %v5350_v38, %v2862_v41  ;;  %3719 = vst.msk [vmem:[%s6102_s3 + $0x3f0] sm:$0xff] %vm792_vm1, %v3184_v44 }
 0x1dd   :  { %3704 = vst.msk [vmem:[%s6102_s3 + $0x1f8] sm:$0xff] %vm792_vm1, %v2879_v43 }
 0x1de   :  { %3703 = vst.msk [vmem:[%s6102_s3 + $0x1f0] sm:$0xff] %vm792_vm1, %v2878_v20 }

</bundles_post_ra>
